<compile_context>
chip_gen: v6e
topology: v6e:2x2x1
jax: 0.10.0
libtpu: 0.0.40
codegen_flags: <defaults>
</compile_context>

<pallas_src>
import functools

import jax
import jax.numpy as jnp
from jax.experimental import pallas as pl
from jax.experimental.pallas import tpu as pltpu

# ----------------------------- configuration --------------------------------
B = 2               # batch
C_IN = 3            # input image channels (RGB)
CIN_PAD = 8         # channels zero-padded to one sublane group
IMG = 32            # image spatial size (stand-in for 448)
OBJ = 32            # object crop is resized back to backbone input size
C_FEAT = 32         # backbone feature channels (stand-in for 2048)
POOL = 4            # spatial downsample factor of the saliency pool
HF = IMG // POOL    # saliency-map height
WF = IMG // POOL    # saliency-map width
HW = IMG * IMG      # pixels per image
SAL_CELLS = HF * WF         # 64 pooled cells
SAL_PAD = 128               # saliency row padded to a full 128-lane register
NUM_CLASSES = 10
NC_PAD = 128                # classifier output padded to a full 128 lanes
NUMS = 2                    # number of parts (used only for parts_logits)


# ---------------- fused backbone + classifier + saliency kernel --------------
def _backbone_cls_kernel(x_ref, w1t_ref, b1_ref, wc_ref, bc_ref, pool_ref,
                         logits_ref, sal_ref):
    """One grid step == one block of samples; everything stays in VMEM.

    Lane-dense layouts throughout: feat is (C_FEAT, HW), the conv / pooling
    contractions run on the (otherwise idle) MXU, outputs are stored as
    full-128-lane rows."""
    bb = x_ref.shape[0]
    w1t = w1t_ref[...]          # (C_FEAT, CIN_PAD)   f32
    b1 = b1_ref[...]            # (C_FEAT, 1)
    wc = wc_ref[...]            # (C_FEAT, NC_PAD)
    bc = bc_ref[...]            # (1, NC_PAD)
    pmat = pool_ref[...]        # (HW, SAL_PAD); col j<SAL_CELLS holds 1/16's

    logit_rows = []
    sal_rows = []
    for s in range(bb):                             # static unroll, bb tiny
        xb = x_ref[s]                               # (CIN_PAD, HW) lane-dense
        # 1x1 conv as a single MXU matmul, bias + ReLU on the VPU in f32.
        feat = jnp.maximum(
            jnp.dot(w1t, xb, preferred_element_type=jnp.float32) + b1, 0.0)
        # 4x4 mean pool of every channel in one MXU matmul (cols >= 64 are 0).
        pooled = jnp.dot(feat, pmat, preferred_element_type=jnp.float32)
        # DSAS saliency = channel sum of the pooled map (cheap sublane reduce).
        sal_rows.append(jnp.sum(pooled, axis=0, keepdims=True))   # (1, SAL_PAD)
        # Global average pool == mean of the 64 equal-size cell means.
        emb = jnp.sum(pooled, axis=1, keepdims=True) * (1.0 / SAL_CELLS)
        # Classifier: broadcast FMA + sublane reduce, lane-dense logits row.
        logit_rows.append(jnp.sum(wc * emb, axis=0, keepdims=True) + bc)
    logits_ref[...] = jnp.concatenate(logit_rows, axis=0).reshape(bb, 1, NC_PAD)
    sal_ref[...] = jnp.concatenate(sal_rows, axis=0).reshape(bb, 1, SAL_PAD)


def backbone_classifier(params, x_nchw, batch_block=None):
    """Fused stand-in backbone + rawcls_net.

    Returns (logits (B, NUM_CLASSES), saliency (B, HF, WF)).
    batch_block=None -> whole batch in one grid step (best on 1-TC v5e/v6e);
    on v7x pass batch_block = B // 2 so the parallel grid spans both TCs."""
    b = x_nchw.shape[0]
    bb = b if batch_block is None else batch_block
    assert b % bb == 0
    nb = b // bb

    # NCHW -> (B, C_IN, HW) is a pure reshape (no transpose); pad channels to 8.
    xb = x_nchw.reshape(b, C_IN, HW).astype(jnp.float32)
    xb = jnp.pad(xb, ((0, 0), (0, CIN_PAD - C_IN), (0, 0)))

    logits_pad, sal_pad = pl.pallas_call(
        _backbone_cls_kernel,
        out_shape=(
            jax.ShapeDtypeStruct((b, 1, NC_PAD), jnp.float32),
            jax.ShapeDtypeStruct((b, 1, SAL_PAD), jnp.float32),
        ),
        grid=(nb,),
        in_specs=[
            pl.BlockSpec((bb, CIN_PAD, HW), lambda i: (i, 0, 0)),
            pl.BlockSpec((C_FEAT, CIN_PAD), lambda i: (0, 0)),
            pl.BlockSpec((C_FEAT, 1), lambda i: (0, 0)),
            pl.BlockSpec((C_FEAT, NC_PAD), lambda i: (0, 0)),
            pl.BlockSpec((1, NC_PAD), lambda i: (0, 0)),
            pl.BlockSpec((HW, SAL_PAD), lambda i: (0, 0)),
        ],
        out_specs=(
            pl.BlockSpec((bb, 1, NC_PAD), lambda i: (i, 0, 0)),
            pl.BlockSpec((bb, 1, SAL_PAD), lambda i: (i, 0, 0)),
        ),
        compiler_params=pltpu.CompilerParams(
            dimension_semantics=("parallel",)),
    )(xb, params["w1t"], params["b1col"], params["wc_pad"], params["bc_pad"],
      params["poolmat"])

    logits = logits_pad[:, 0, :NUM_CLASSES]
    sal = sal_pad[:, 0, :SAL_CELLS].reshape(b, HF, WF)
    return logits, sal


# --------------------------------- DSAS glue ---------------------------------
def dsas_boxes(sal, img_h, img_w):
    """Saliency map (B, HF, WF) -> per-sample box [x0, y0, x1, y1] in image
    coords (x = height axis, y = width axis, inclusive), SCDA-style mean
    threshold.  Falls back to the full image if the map is constant."""
    b, fm_h, fm_w = sal.shape
    mean = jnp.mean(sal, axis=(1, 2), keepdims=True)
    mask = sal > mean
    rows = jnp.any(mask, axis=2)                      # (B, fm_h)
    cols = jnp.any(mask, axis=1)                      # (B, fm_w)

    def first_last(v, n):
        idx = jnp.arange(n)
        has = jnp.any(v)
        first = jnp.where(has, jnp.min(jnp.where(v, idx, n - 1)), 0)
        last = jnp.where(has, jnp.max(jnp.where(v, idx, 0)), n - 1)
        return first, jnp.maximum(last, first)

    x0, x1 = jax.vmap(lambda rr: first_last(rr, fm_h))(rows)
    y0, y1 = jax.vmap(lambda cc: first_last(cc, fm_w))(cols)
    rh = img_h // fm_h
    rw = img_w // fm_w
    box = jnp.stack(
        [x0 * rh, y0 * rw, (x1 + 1) * rh - 1, (y1 + 1) * rw - 1], axis=1)
    return box.astype(jnp.int32)


# ------------------- bilinear crop + resize (align_corners=True) -------------
# TODO(synk): per-sample data-dependent crop + bilinear resize stays in plain
# JAX (would need scalar-prefetch gathers in Pallas; not worth it here).
def crop_resize_bilinear_nchw(img, box, out_h, out_w):
    """img: (C, H, W). box: [x0, y0, x1, y1] inclusive (x=height, y=width)."""
    c, h, w = img.shape
    x0, y0, x1, y1 = (box[0].astype(jnp.float32), box[1].astype(jnp.float32),
                      box[2].astype(jnp.float32), box[3].astype(jnp.float32))
    th = jnp.arange(out_h, dtype=jnp.float32) / max(out_h - 1, 1)
    tw = jnp.arange(out_w, dtype=jnp.float32) / max(out_w - 1, 1)
    src_h = x0 + th * (x1 - x0)
    src_w = y0 + tw * (y1 - y0)
    h0f = jnp.floor(src_h)
    w0f = jnp.floor(src_w)
    fh = (src_h - h0f)[None, :, None]
    fw = (src_w - w0f)[None, None, :]
    h0 = jnp.clip(h0f.astype(jnp.int32), 0, h - 1)
    w0 = jnp.clip(w0f.astype(jnp.int32), 0, w - 1)
    h1 = jnp.clip(h0 + 1, 0, h - 1)
    w1 = jnp.clip(w0 + 1, 0, w - 1)

    flat = img.reshape(c, h * w)

    def gat(hi, wi):                                  # single fused gather
        idx = hi[:, None] * w + wi[None, :]           # (out_h, out_w)
        return flat[:, idx]                           # (C, out_h, out_w)

    v00, v01 = gat(h0, w0), gat(h0, w1)
    v10, v11 = gat(h1, w0), gat(h1, w1)
    top = v00 * (1.0 - fw) + v01 * fw
    bot = v10 * (1.0 - fw) + v11 * fw
    return top * (1.0 - fh) + bot * fh


# --------------------------------- MainNet -----------------------------------
def _make_poolmat():
    """(HW, SAL_PAD) matrix whose column j (< SAL_CELLS) holds 1/16 at the 16
    pixels of 4x4 cell j; remaining columns are zero (lane padding)."""
    rows = jnp.arange(HW, dtype=jnp.int32) // IMG
    cols = jnp.arange(HW, dtype=jnp.int32) % IMG
    cell = (rows // POOL) * WF + (cols // POOL)
    onehot = cell[:, None] == jnp.arange(SAL_PAD, dtype=jnp.int32)[None, :]
    return onehot.astype(jnp.float32) / float(POOL * POOL)


def init_params(key):
    k1, k2, k3, k4 = jax.random.split(key, 4)
    w1 = jax.random.normal(k1, (C_IN, C_FEAT), jnp.float32) * 0.2
    b1 = jax.random.normal(k2, (C_FEAT,), jnp.float32) * 0.05
    wc = jax.random.normal(k3, (C_FEAT, NUM_CLASSES), jnp.float32) * 0.1
    bc = jax.random.normal(k4, (NUM_CLASSES,), jnp.float32) * 0.05
    # Kernel-friendly layouts / paddings done ONCE here (not per forward):
    w1t_pad = jnp.zeros((C_FEAT, CIN_PAD), jnp.float32).at[:, :C_IN].set(w1.T)
    wc_pad = jnp.zeros((C_FEAT, NC_PAD), jnp.float32).at[:, :NUM_CLASSES].set(wc)
    bc_pad = jnp.zeros((1, NC_PAD), jnp.float32).at[:, :NUM_CLASSES].set(bc[None, :])
    return {
        "w1t": w1t_pad,                   # (C_FEAT, CIN_PAD)
        "b1col": b1.reshape(C_FEAT, 1),   # (C_FEAT, 1)
        "wc_pad": wc_pad,                 # (C_FEAT, NC_PAD)
        "bc_pad": bc_pad,                 # (1, NC_PAD)
        "poolmat": _make_poolmat(),       # (HW, SAL_PAD)
    }


def mainnet_forward(params, x, status="test"):
    """x: (B, 3, IMG, IMG) NCHW, like the PyTorch module."""
    b = x.shape[0]

    # 1) fused backbone + raw classifier + saliency on the full image
    raw_logits, sal = backbone_classifier(params, x)

    # 2) DSAS object localization (tiny scalar glue on in-kernel saliency)
    coords = dsas_boxes(jax.lax.stop_gradient(sal), IMG, IMG)

    # 3) per-sample crop + bilinear resize (align_corners=True) to OBJ x OBJ
    object_imgs = jax.vmap(
        lambda im, cc: crop_resize_bilinear_nchw(im, cc, OBJ, OBJ))(x, coords)

    # 4) fused backbone + classifier on the detached object images
    object_logits, _ = backbone_classifier(
        params, jax.lax.stop_gradient(object_imgs))

    # 5) parts branch: test path only (GRQL parts-attention module is not
    #    provided in the reference source).
    # TODO(synk): 'train' branch (GRQL parts attention) not implemented.
    parts_logits = jnp.zeros((b * NUMS, NUM_CLASSES), jnp.float32)

    return raw_logits, object_logits, parts_logits


if __name__ == "__main__":
    key = jax.random.PRNGKey(0)
    pkey, xkey = jax.random.split(key)
    params = init_params(pkey)
    x = jax.random.normal(xkey, (B, C_IN, IMG, IMG), jnp.float32)

    fwd = jax.jit(functools.partial(mainnet_forward, status="test"))
    raw_logits, object_logits, parts_logits = fwd(params, x)
    jax.block_until_ready((raw_logits, object_logits, parts_logits))

    assert raw_logits.shape == (B, NUM_CLASSES)
    assert object_logits.shape == (B, NUM_CLASSES)
    assert parts_logits.shape == (B * NUMS, NUM_CLASSES)
    print("KERNEL_OK")
</pallas_src>

<mosaic_0001>
module attributes {stable_mosaic.version = 11 : i64} {
  func.func @_backbone_cls_kernel(%arg0: i32, %arg1: memref<2x8x1024xf32, #tpu.memory_space<vmem>>, %arg2: memref<32x8xf32, #tpu.memory_space<vmem>>, %arg3: memref<32x1xf32, #tpu.memory_space<vmem>>, %arg4: memref<32x128xf32, #tpu.memory_space<vmem>>, %arg5: memref<1x128xf32, #tpu.memory_space<vmem>>, %arg6: memref<1024x128xf32, #tpu.memory_space<vmem>>, %arg7: memref<2x1x128xf32, #tpu.memory_space<vmem>>, %arg8: memref<2x1x128xf32, #tpu.memory_space<vmem>>) attributes {dimension_semantics = [#tpu.dimension_semantics<parallel>], iteration_bounds = array<i64: 1>, scalar_prefetch = 0 : i64, scratch_operands = 0 : i64, tpu.core_type = #tpu.core_type<tc>, window_params = [{transform_indices = @transform_0, window_bounds = array<i64: 2, 8, 1024>}, {pipeline_mode = #tpu.pipeline_mode<synchronous>, transform_indices = @transform_1, window_bounds = array<i64: 32, 8>}, {pipeline_mode = #tpu.pipeline_mode<synchronous>, transform_indices = @transform_2, window_bounds = array<i64: 32, 1>}, {pipeline_mode = #tpu.pipeline_mode<synchronous>, transform_indices = @transform_3, window_bounds = array<i64: 32, 128>}, {pipeline_mode = #tpu.pipeline_mode<synchronous>, transform_indices = @transform_4, window_bounds = array<i64: 1, 128>}, {pipeline_mode = #tpu.pipeline_mode<synchronous>, transform_indices = @transform_5, window_bounds = array<i64: 1024, 128>}, {transform_indices = @transform_6, window_bounds = array<i64: 2, 1, 128>}, {transform_indices = @transform_7, window_bounds = array<i64: 2, 1, 128>}]} {
    %c0 = arith.constant 0 : index
    %c0_0 = arith.constant 0 : index
    %0 = vector.load %arg2[%c0, %c0_0] : memref<32x8xf32, #tpu.memory_space<vmem>>, vector<32x8xf32>
    %c0_1 = arith.constant 0 : index
    %c0_2 = arith.constant 0 : index
    %1 = vector.load %arg3[%c0_1, %c0_2] : memref<32x1xf32, #tpu.memory_space<vmem>>, vector<32x1xf32>
    %c0_3 = arith.constant 0 : index
    %c0_4 = arith.constant 0 : index
    %2 = vector.load %arg4[%c0_3, %c0_4] : memref<32x128xf32, #tpu.memory_space<vmem>>, vector<32x128xf32>
    %c0_5 = arith.constant 0 : index
    %c0_6 = arith.constant 0 : index
    %3 = vector.load %arg5[%c0_5, %c0_6] : memref<1x128xf32, #tpu.memory_space<vmem>>, vector<1x128xf32>
    %c0_7 = arith.constant 0 : index
    %c0_8 = arith.constant 0 : index
    %4 = vector.load %arg6[%c0_7, %c0_8] : memref<1024x128xf32, #tpu.memory_space<vmem>>, vector<1024x128xf32>
    %c0_9 = arith.constant 0 : index
    %c0_10 = arith.constant 0 : index
    %c0_11 = arith.constant 0 : index
    %5 = vector.load %arg1[%c0_9, %c0_10, %c0_11] : memref<2x8x1024xf32, #tpu.memory_space<vmem>>, vector<1x8x1024xf32>
    %6 = vector.shape_cast %5 : vector<1x8x1024xf32> to vector<8x1024xf32>
    %cst = arith.constant dense<0.000000e+00> : vector<32x1024xf32>
    %7 = tpu.matmul %0, %6, %cst {dimension_numbers = #tpu.dot_dimension_numbers<[1], [0], [0], [1], [0, 0, 1, 1], [], []>} : vector<32x8xf32>, vector<8x1024xf32>, vector<32x1024xf32> -> vector<32x1024xf32>
    %8 = vector.broadcast %1 : vector<32x1xf32> to vector<32x1024xf32>
    %9 = arith.addf %7, %8 : vector<32x1024xf32>
    %cst_12 = arith.constant 0.000000e+00 : f32
    %10 = vector.broadcast %cst_12 : f32 to vector<32x1024xf32>
    %11 = arith.maximumf %9, %10 : vector<32x1024xf32>
    %cst_13 = arith.constant dense<0.000000e+00> : vector<32x128xf32>
    %12 = tpu.matmul %11, %4, %cst_13 {dimension_numbers = #tpu.dot_dimension_numbers<[1], [0], [0], [1], [0, 0, 1, 1], [], []>} : vector<32x1024xf32>, vector<1024x128xf32>, vector<32x128xf32> -> vector<32x128xf32>
    %cst_14 = arith.constant dense<0.000000e+00> : vector<128xf32>
    %13 = vector.multi_reduction <add>, %12, %cst_14 [0] : vector<32x128xf32> to vector<128xf32>
    %14 = vector.shape_cast %13 : vector<128xf32> to vector<1x128xf32>
    %cst_15 = arith.constant dense<0.000000e+00> : vector<32xf32>
    %15 = vector.multi_reduction <add>, %12, %cst_15 [1] : vector<32x128xf32> to vector<32xf32>
    %16 = vector.shape_cast %15 : vector<32xf32> to vector<32x1xf32>
    %cst_16 = arith.constant 1.562500e-02 : f32
    %17 = vector.broadcast %cst_16 : f32 to vector<32x1xf32>
    %18 = arith.mulf %16, %17 : vector<32x1xf32>
    %19 = vector.broadcast %18 : vector<32x1xf32> to vector<32x128xf32>
    %20 = arith.mulf %2, %19 : vector<32x128xf32>
    %cst_17 = arith.constant dense<0.000000e+00> : vector<128xf32>
    %21 = vector.multi_reduction <add>, %20, %cst_17 [0] : vector<32x128xf32> to vector<128xf32>
    %22 = vector.shape_cast %21 : vector<128xf32> to vector<1x128xf32>
    %23 = arith.addf %22, %3 : vector<1x128xf32>
    %c1 = arith.constant 1 : index
    %c0_18 = arith.constant 0 : index
    %c0_19 = arith.constant 0 : index
    %24 = vector.load %arg1[%c1, %c0_18, %c0_19] : memref<2x8x1024xf32, #tpu.memory_space<vmem>>, vector<1x8x1024xf32>
    %25 = vector.shape_cast %24 : vector<1x8x1024xf32> to vector<8x1024xf32>
    %cst_20 = arith.constant dense<0.000000e+00> : vector<32x1024xf32>
    %26 = tpu.matmul %0, %25, %cst_20 {dimension_numbers = #tpu.dot_dimension_numbers<[1], [0], [0], [1], [0, 0, 1, 1], [], []>} : vector<32x8xf32>, vector<8x1024xf32>, vector<32x1024xf32> -> vector<32x1024xf32>
    %27 = vector.broadcast %1 : vector<32x1xf32> to vector<32x1024xf32>
    %28 = arith.addf %26, %27 : vector<32x1024xf32>
    %cst_21 = arith.constant 0.000000e+00 : f32
    %29 = vector.broadcast %cst_21 : f32 to vector<32x1024xf32>
    %30 = arith.maximumf %28, %29 : vector<32x1024xf32>
    %cst_22 = arith.constant dense<0.000000e+00> : vector<32x128xf32>
    %31 = tpu.matmul %30, %4, %cst_22 {dimension_numbers = #tpu.dot_dimension_numbers<[1], [0], [0], [1], [0, 0, 1, 1], [], []>} : vector<32x1024xf32>, vector<1024x128xf32>, vector<32x128xf32> -> vector<32x128xf32>
    %cst_23 = arith.constant dense<0.000000e+00> : vector<128xf32>
    %32 = vector.multi_reduction <add>, %31, %cst_23 [0] : vector<32x128xf32> to vector<128xf32>
    %33 = vector.shape_cast %32 : vector<128xf32> to vector<1x128xf32>
    %cst_24 = arith.constant dense<0.000000e+00> : vector<32xf32>
    %34 = vector.multi_reduction <add>, %31, %cst_24 [1] : vector<32x128xf32> to vector<32xf32>
    %35 = vector.shape_cast %34 : vector<32xf32> to vector<32x1xf32>
    %cst_25 = arith.constant 1.562500e-02 : f32
    %36 = vector.broadcast %cst_25 : f32 to vector<32x1xf32>
    %37 = arith.mulf %35, %36 : vector<32x1xf32>
    %38 = vector.broadcast %37 : vector<32x1xf32> to vector<32x128xf32>
    %39 = arith.mulf %2, %38 : vector<32x128xf32>
    %cst_26 = arith.constant dense<0.000000e+00> : vector<128xf32>
    %40 = vector.multi_reduction <add>, %39, %cst_26 [0] : vector<32x128xf32> to vector<128xf32>
    %41 = vector.shape_cast %40 : vector<128xf32> to vector<1x128xf32>
    %42 = arith.addf %41, %3 : vector<1x128xf32>
    %43 = tpu.concatenate %23, %42 in 0 : vector<1x128xf32>, vector<1x128xf32> -> vector<2x128xf32>
    %44 = vector.shape_cast %43 : vector<2x128xf32> to vector<2x1x128xf32>
    %c0_27 = arith.constant 0 : index
    %c0_28 = arith.constant 0 : index
    %c0_29 = arith.constant 0 : index
    %45 = vector.load %arg7[%c0_27, %c0_28, %c0_29] : memref<2x1x128xf32, #tpu.memory_space<vmem>>, vector<2x1x128xf32>
    tpu.vector_store %arg7[%c0_27, %c0_28, %c0_29], %44 {strides = array<i32>} : memref<2x1x128xf32, #tpu.memory_space<vmem>>, vector<2x1x128xf32>,
    %46 = tpu.concatenate %14, %33 in 0 : vector<1x128xf32>, vector<1x128xf32> -> vector<2x128xf32>
    %47 = vector.shape_cast %46 : vector<2x128xf32> to vector<2x1x128xf32>
    %c0_30 = arith.constant 0 : index
    %c0_31 = arith.constant 0 : index
    %c0_32 = arith.constant 0 : index
    %48 = vector.load %arg8[%c0_30, %c0_31, %c0_32] : memref<2x1x128xf32, #tpu.memory_space<vmem>>, vector<2x1x128xf32>
    tpu.vector_store %arg8[%c0_30, %c0_31, %c0_32], %47 {strides = array<i32>} : memref<2x1x128xf32, #tpu.memory_space<vmem>>, vector<2x1x128xf32>,
    return
  }
  func.func @transform_0(%arg0: i32) -> (i32, i32, i32) {
    %c0_i32 = arith.constant 0 : i32
    %c0_i32_0 = arith.constant 0 : i32
    %c0_i32_1 = arith.constant 0 : i32
    return %arg0, %c0_i32, %c0_i32_0 : i32, i32, i32
  }
  func.func @transform_1(%arg0: i32) -> (i32, i32) {
    %c0_i32 = arith.constant 0 : i32
    %c0_i32_0 = arith.constant 0 : i32
    %c0_i32_1 = arith.constant 0 : i32
    return %c0_i32, %c0_i32_0 : i32, i32
  }
  func.func @transform_2(%arg0: i32) -> (i32, i32) {
    %c0_i32 = arith.constant 0 : i32
    %c0_i32_0 = arith.constant 0 : i32
    %c0_i32_1 = arith.constant 0 : i32
    return %c0_i32, %c0_i32_0 : i32, i32
  }
  func.func @transform_3(%arg0: i32) -> (i32, i32) {
    %c0_i32 = arith.constant 0 : i32
    %c0_i32_0 = arith.constant 0 : i32
    %c0_i32_1 = arith.constant 0 : i32
    return %c0_i32, %c0_i32_0 : i32, i32
  }
  func.func @transform_4(%arg0: i32) -> (i32, i32) {
    %c0_i32 = arith.constant 0 : i32
    %c0_i32_0 = arith.constant 0 : i32
    %c0_i32_1 = arith.constant 0 : i32
    return %c0_i32, %c0_i32_0 : i32, i32
  }
  func.func @transform_5(%arg0: i32) -> (i32, i32) {
    %c0_i32 = arith.constant 0 : i32
    %c0_i32_0 = arith.constant 0 : i32
    %c0_i32_1 = arith.constant 0 : i32
    return %c0_i32, %c0_i32_0 : i32, i32
  }
  func.func @transform_6(%arg0: i32) -> (i32, i32, i32) {
    %c0_i32 = arith.constant 0 : i32
    %c0_i32_0 = arith.constant 0 : i32
    %c0_i32_1 = arith.constant 0 : i32
    return %arg0, %c0_i32, %c0_i32_0 : i32, i32, i32
  }
  func.func @transform_7(%arg0: i32) -> (i32, i32, i32) {
    %c0_i32 = arith.constant 0 : i32
    %c0_i32_0 = arith.constant 0 : i32
    %c0_i32_1 = arith.constant 0 : i32
    return %arg0, %c0_i32, %c0_i32_0 : i32, i32, i32
  }
}

module attributes {stable_mosaic.version = 11 : i64} {
  func.func @_backbone_cls_kernel(%arg0: i32, %arg1: memref<2x8x1024xf32, #tpu.memory_space<vmem>>, %arg2: memref<32x8xf32, #tpu.memory_space<vmem>>, %arg3: memref<32x1xf32, #tpu.memory_space<vmem>>, %arg4: memref<32x128xf32, #tpu.memory_space<vmem>>, %arg5: memref<1x128xf32, #tpu.memory_space<vmem>>, %arg6: memref<1024x128xf32, #tpu.memory_space<vmem>>, %arg7: memref<2x1x128xf32, #tpu.memory_space<vmem>>, %arg8: memref<2x1x128xf32, #tpu.memory_space<vmem>>) attributes {dimension_semantics = [#tpu.dimension_semantics<parallel>], iteration_bounds = array<i64: 1>, scalar_prefetch = 0 : i64, scratch_operands = 0 : i64, tpu.core_type = #tpu.core_type<tc>, window_params = [{transform_indices = @transform_0, window_bounds = array<i64: 2, 8, 1024>}, {pipeline_mode = #tpu.pipeline_mode<synchronous>, transform_indices = @transform_1, window_bounds = array<i64: 32, 8>}, {pipeline_mode = #tpu.pipeline_mode<synchronous>, transform_indices = @transform_2, window_bounds = array<i64: 32, 1>}, {pipeline_mode = #tpu.pipeline_mode<synchronous>, transform_indices = @transform_3, window_bounds = array<i64: 32, 128>}, {pipeline_mode = #tpu.pipeline_mode<synchronous>, transform_indices = @transform_4, window_bounds = array<i64: 1, 128>}, {pipeline_mode = #tpu.pipeline_mode<synchronous>, transform_indices = @transform_5, window_bounds = array<i64: 1024, 128>}, {transform_indices = @transform_6, window_bounds = array<i64: 2, 1, 128>}, {transform_indices = @transform_7, window_bounds = array<i64: 2, 1, 128>}]} {
    %c0 = arith.constant 0 : index
    %c0_0 = arith.constant 0 : index
    %0 = vector.load %arg2[%c0, %c0_0] : memref<32x8xf32, #tpu.memory_space<vmem>>, vector<32x8xf32>
    %c0_1 = arith.constant 0 : index
    %c0_2 = arith.constant 0 : index
    %1 = vector.load %arg3[%c0_1, %c0_2] : memref<32x1xf32, #tpu.memory_space<vmem>>, vector<32x1xf32>
    %c0_3 = arith.constant 0 : index
    %c0_4 = arith.constant 0 : index
    %2 = vector.load %arg4[%c0_3, %c0_4] : memref<32x128xf32, #tpu.memory_space<vmem>>, vector<32x128xf32>
    %c0_5 = arith.constant 0 : index
    %c0_6 = arith.constant 0 : index
    %3 = vector.load %arg5[%c0_5, %c0_6] : memref<1x128xf32, #tpu.memory_space<vmem>>, vector<1x128xf32>
    %c0_7 = arith.constant 0 : index
    %c0_8 = arith.constant 0 : index
    %4 = vector.load %arg6[%c0_7, %c0_8] : memref<1024x128xf32, #tpu.memory_space<vmem>>, vector<1024x128xf32>
    %c0_9 = arith.constant 0 : index
    %c0_10 = arith.constant 0 : index
    %c0_11 = arith.constant 0 : index
    %5 = vector.load %arg1[%c0_9, %c0_10, %c0_11] : memref<2x8x1024xf32, #tpu.memory_space<vmem>>, vector<1x8x1024xf32>
    %6 = vector.shape_cast %5 : vector<1x8x1024xf32> to vector<8x1024xf32>
    %cst = arith.constant dense<0.000000e+00> : vector<32x1024xf32>
    %7 = tpu.matmul %0, %6, %cst {dimension_numbers = #tpu.dot_dimension_numbers<[1], [0], [0], [1], [0, 0, 1, 1], [], []>} : vector<32x8xf32>, vector<8x1024xf32>, vector<32x1024xf32> -> vector<32x1024xf32>
    %8 = vector.broadcast %1 : vector<32x1xf32> to vector<32x1024xf32>
    %9 = arith.addf %7, %8 : vector<32x1024xf32>
    %cst_12 = arith.constant 0.000000e+00 : f32
    %10 = vector.broadcast %cst_12 : f32 to vector<32x1024xf32>
    %11 = arith.maximumf %9, %10 : vector<32x1024xf32>
    %cst_13 = arith.constant dense<0.000000e+00> : vector<32x128xf32>
    %12 = tpu.matmul %11, %4, %cst_13 {dimension_numbers = #tpu.dot_dimension_numbers<[1], [0], [0], [1], [0, 0, 1, 1], [], []>} : vector<32x1024xf32>, vector<1024x128xf32>, vector<32x128xf32> -> vector<32x128xf32>
    %cst_14 = arith.constant dense<0.000000e+00> : vector<128xf32>
    %13 = vector.multi_reduction <add>, %12, %cst_14 [0] : vector<32x128xf32> to vector<128xf32>
    %14 = vector.shape_cast %13 : vector<128xf32> to vector<1x128xf32>
    %cst_15 = arith.constant dense<0.000000e+00> : vector<32xf32>
    %15 = vector.multi_reduction <add>, %12, %cst_15 [1] : vector<32x128xf32> to vector<32xf32>
    %16 = vector.shape_cast %15 : vector<32xf32> to vector<32x1xf32>
    %cst_16 = arith.constant 1.562500e-02 : f32
    %17 = vector.broadcast %cst_16 : f32 to vector<32x1xf32>
    %18 = arith.mulf %16, %17 : vector<32x1xf32>
    %19 = vector.broadcast %18 : vector<32x1xf32> to vector<32x128xf32>
    %20 = arith.mulf %2, %19 : vector<32x128xf32>
    %cst_17 = arith.constant dense<0.000000e+00> : vector<128xf32>
    %21 = vector.multi_reduction <add>, %20, %cst_17 [0] : vector<32x128xf32> to vector<128xf32>
    %22 = vector.shape_cast %21 : vector<128xf32> to vector<1x128xf32>
    %23 = arith.addf %22, %3 : vector<1x128xf32>
    %c1 = arith.constant 1 : index
    %c0_18 = arith.constant 0 : index
    %c0_19 = arith.constant 0 : index
    %24 = vector.load %arg1[%c1, %c0_18, %c0_19] : memref<2x8x1024xf32, #tpu.memory_space<vmem>>, vector<1x8x1024xf32>
    %25 = vector.shape_cast %24 : vector<1x8x1024xf32> to vector<8x1024xf32>
    %cst_20 = arith.constant dense<0.000000e+00> : vector<32x1024xf32>
    %26 = tpu.matmul %0, %25, %cst_20 {dimension_numbers = #tpu.dot_dimension_numbers<[1], [0], [0], [1], [0, 0, 1, 1], [], []>} : vector<32x8xf32>, vector<8x1024xf32>, vector<32x1024xf32> -> vector<32x1024xf32>
    %27 = vector.broadcast %1 : vector<32x1xf32> to vector<32x1024xf32>
    %28 = arith.addf %26, %27 : vector<32x1024xf32>
    %cst_21 = arith.constant 0.000000e+00 : f32
    %29 = vector.broadcast %cst_21 : f32 to vector<32x1024xf32>
    %30 = arith.maximumf %28, %29 : vector<32x1024xf32>
    %cst_22 = arith.constant dense<0.000000e+00> : vector<32x128xf32>
    %31 = tpu.matmul %30, %4, %cst_22 {dimension_numbers = #tpu.dot_dimension_numbers<[1], [0], [0], [1], [0, 0, 1, 1], [], []>} : vector<32x1024xf32>, vector<1024x128xf32>, vector<32x128xf32> -> vector<32x128xf32>
    %cst_23 = arith.constant dense<0.000000e+00> : vector<128xf32>
    %32 = vector.multi_reduction <add>, %31, %cst_23 [0] : vector<32x128xf32> to vector<128xf32>
    %33 = vector.shape_cast %32 : vector<128xf32> to vector<1x128xf32>
    %cst_24 = arith.constant dense<0.000000e+00> : vector<32xf32>
    %34 = vector.multi_reduction <add>, %31, %cst_24 [1] : vector<32x128xf32> to vector<32xf32>
    %35 = vector.shape_cast %34 : vector<32xf32> to vector<32x1xf32>
    %cst_25 = arith.constant 1.562500e-02 : f32
    %36 = vector.broadcast %cst_25 : f32 to vector<32x1xf32>
    %37 = arith.mulf %35, %36 : vector<32x1xf32>
    %38 = vector.broadcast %37 : vector<32x1xf32> to vector<32x128xf32>
    %39 = arith.mulf %2, %38 : vector<32x128xf32>
    %cst_26 = arith.constant dense<0.000000e+00> : vector<128xf32>
    %40 = vector.multi_reduction <add>, %39, %cst_26 [0] : vector<32x128xf32> to vector<128xf32>
    %41 = vector.shape_cast %40 : vector<128xf32> to vector<1x128xf32>
    %42 = arith.addf %41, %3 : vector<1x128xf32>
    %43 = tpu.concatenate %23, %42 in 0 : vector<1x128xf32>, vector<1x128xf32> -> vector<2x128xf32>
    %44 = vector.shape_cast %43 : vector<2x128xf32> to vector<2x1x128xf32>
    %c0_27 = arith.constant 0 : index
    %c0_28 = arith.constant 0 : index
    %c0_29 = arith.constant 0 : index
    %45 = vector.load %arg7[%c0_27, %c0_28, %c0_29] : memref<2x1x128xf32, #tpu.memory_space<vmem>>, vector<2x1x128xf32>
    tpu.vector_store %arg7[%c0_27, %c0_28, %c0_29], %44 {strides = array<i32>} : memref<2x1x128xf32, #tpu.memory_space<vmem>>, vector<2x1x128xf32>,
    %46 = tpu.concatenate %14, %33 in 0 : vector<1x128xf32>, vector<1x128xf32> -> vector<2x128xf32>
    %47 = vector.shape_cast %46 : vector<2x128xf32> to vector<2x1x128xf32>
    %c0_30 = arith.constant 0 : index
    %c0_31 = arith.constant 0 : index
    %c0_32 = arith.constant 0 : index
    %48 = vector.load %arg8[%c0_30, %c0_31, %c0_32] : memref<2x1x128xf32, #tpu.memory_space<vmem>>, vector<2x1x128xf32>
    tpu.vector_store %arg8[%c0_30, %c0_31, %c0_32], %47 {strides = array<i32>} : memref<2x1x128xf32, #tpu.memory_space<vmem>>, vector<2x1x128xf32>,
    return
  }
  func.func @transform_0(%arg0: i32) -> (i32, i32, i32) {
    %c0_i32 = arith.constant 0 : i32
    %c0_i32_0 = arith.constant 0 : i32
    %c0_i32_1 = arith.constant 0 : i32
    return %arg0, %c0_i32, %c0_i32_0 : i32, i32, i32
  }
  func.func @transform_1(%arg0: i32) -> (i32, i32) {
    %c0_i32 = arith.constant 0 : i32
    %c0_i32_0 = arith.constant 0 : i32
    %c0_i32_1 = arith.constant 0 : i32
    return %c0_i32, %c0_i32_0 : i32, i32
  }
  func.func @transform_2(%arg0: i32) -> (i32, i32) {
    %c0_i32 = arith.constant 0 : i32
    %c0_i32_0 = arith.constant 0 : i32
    %c0_i32_1 = arith.constant 0 : i32
    return %c0_i32, %c0_i32_0 : i32, i32
  }
  func.func @transform_3(%arg0: i32) -> (i32, i32) {
    %c0_i32 = arith.constant 0 : i32
    %c0_i32_0 = arith.constant 0 : i32
    %c0_i32_1 = arith.constant 0 : i32
    return %c0_i32, %c0_i32_0 : i32, i32
  }
  func.func @transform_4(%arg0: i32) -> (i32, i32) {
    %c0_i32 = arith.constant 0 : i32
    %c0_i32_0 = arith.constant 0 : i32
    %c0_i32_1 = arith.constant 0 : i32
    return %c0_i32, %c0_i32_0 : i32, i32
  }
  func.func @transform_5(%arg0: i32) -> (i32, i32) {
    %c0_i32 = arith.constant 0 : i32
    %c0_i32_0 = arith.constant 0 : i32
    %c0_i32_1 = arith.constant 0 : i32
    return %c0_i32, %c0_i32_0 : i32, i32
  }
  func.func @transform_6(%arg0: i32) -> (i32, i32, i32) {
    %c0_i32 = arith.constant 0 : i32
    %c0_i32_0 = arith.constant 0 : i32
    %c0_i32_1 = arith.constant 0 : i32
    return %arg0, %c0_i32, %c0_i32_0 : i32, i32, i32
  }
  func.func @transform_7(%arg0: i32) -> (i32, i32, i32) {
    %c0_i32 = arith.constant 0 : i32
    %c0_i32_0 = arith.constant 0 : i32
    %c0_i32_1 = arith.constant 0 : i32
    return %arg0, %c0_i32, %c0_i32_0 : i32, i32, i32
  }
}

</mosaic_0001>

<bundles_post_ra>
// kernel: squeeze.4
= control target key start
LH: loop header
LB: loop body
LE: loop exit
PB: predicated region body
PF: predicated region fallthrough
CT: control target
= control target key end

     0   :  { %s67_s8 = smov 104   ;;  %vm8_vm0 = vcmask 64512   ;;  %s68_s11 = smov 112   ;;  %s118_s0 = inlined_call_operand.vmem [shape: f32[2,64], index: 0, kind: input, shape index: {}]   ;;  %s119_s1 = inlined_call_operand.vmem [shape: f32[2,8,8], index: 1, kind: output, shape index: {}]  }
   0x1   :  { %v5_v0 = vld [vmem:[%s118_s0] sm:$0x3]  ;;  %s66_s0 = smov 120   ;;  %s69_s12 = smov 96  }
   0x2   :  { %6 = vst [vmem:[#allocation0] sm:$0x3] %v5_v0  ;;  %s70_s13 = smov 88   ;;  %s71_s14 = smov 80  }
   0x3   :  { %s72_s15 = smov 72  }
   0x9   :  { %v10_v1 = vld [vmem:[#allocation0] sm:$0x3]  }
   0xa   :  { %v22_v2 = vld [vmem:[#allocation0] sm:$0x3]   ;;  %11 = vrot.lane.b32.xlu0 %v10_v1, %s66_s0 }
   0xb   :  { %23 = vrot.lane.b32.xlu1 %v22_v2, %s67_s8  ;;  %v16_v3 = vld [vmem:[#allocation0] sm:$0x3]  }
   0xc   :  { %v28_v4 = vld [vmem:[#allocation0] sm:$0x3]  }
   0xd   :  { %v7_v5 = vld [vmem:[#allocation0] sm:$0x3]  }
   0xe   :  { %9 = vst.msk [vmem:[%s119_s1] ss:$8 sm:$0x3] %vm8_vm0, %v7_v5   ;;  %17 = vrot.lane.b32.xlu0 %v16_v3, %s68_s11  ;;  %v34_v6 = vld [vmem:[#allocation0] sm:$0x3]  }
   0xf   :  { %29 = vrot.lane.b32.xlu1 %v28_v4, %s69_s12  ;;  %v40_v7 = vld [vmem:[#allocation0] sm:$0x3]  }
  0x10   :  { %v46_v8 = vld [vmem:[#allocation0] sm:$0x3]  }
  0x12   :  { %35 = vrot.lane.b32.xlu0 %v34_v6, %s70_s13 }
  0x13   :  { %41 = vrot.lane.b32.xlu1 %v40_v7, %s71_s14 }
  0x16   :  { %47 = vrot.lane.b32.xlu0 %v46_v8, %s72_s15 }
  0x7c   :  { %v12_v9 = vpop.permute.xlu0 %11  }
  0x7d   :  { %v24_v10 = vpop.permute.xlu1 %23   ;;  %52 = vst.msk [vmem:[%s119_s1 + $0x1] ss:$8 sm:$0x3] %vm8_vm0, %v12_v9  }
  0x7e   :  { %54 = vst.msk [vmem:[%s119_s1 + $0x3] ss:$8 sm:$0x3] %vm8_vm0, %v24_v10  }
  0x80   :  { %v18_v11 = vpop.permute.xlu0 %17  }
  0x81   :  { %v30_v12 = vpop.permute.xlu1 %29   ;;  %53 = vst.msk [vmem:[%s119_s1 + $0x2] ss:$8 sm:$0x3] %vm8_vm0, %v18_v11  }
  0x82   :  { %55 = vst.msk [vmem:[%s119_s1 + $0x4] ss:$8 sm:$0x3] %vm8_vm0, %v30_v12  }
  0x84   :  { %v36_v13 = vpop.permute.xlu0 %35  }
  0x85   :  { %v42_v14 = vpop.permute.xlu1 %41   ;;  %56 = vst.msk [vmem:[%s119_s1 + $0x5] ss:$8 sm:$0x3] %vm8_vm0, %v36_v13  }
  0x86   :  { %57 = vst.msk [vmem:[%s119_s1 + $0x6] ss:$8 sm:$0x3] %vm8_vm0, %v42_v14  }
  0x88   :  { %v48_v15 = vpop.permute.xlu0 %47  }
  0x89   :  { %58 = vst.msk [vmem:[%s119_s1 + $0x7] ss:$8 sm:$0x3] %vm8_vm0, %v48_v15  }

// kernel: mainnet_forward.2
= control target key start
LH: loop header
LB: loop body
LE: loop exit
PB: predicated region body
PF: predicated region fallthrough
CT: control target
= control target key end

     0   :  { %13 = vsyncpa [#allocation3], 0  ;;  %s3163_s0 = inlined_call_operand.vmem [shape: f32[2,8,1024], index: 0, kind: input, shape index: {}]   ;;  %s3164_s1 = inlined_call_operand.vmem [shape: f32[32,8], index: 1, kind: input, shape index: {}]   ;;  %s3165_s2 = inlined_call_operand.vmem [shape: f32[32,1], index: 2, kind: input, shape index: {}]   ;;  %s3166_s3 = inlined_call_operand.vmem [shape: f32[32,128], index: 3, kind: input, shape index: {}]   ;;  %s3167_s4 = inlined_call_operand.vmem [shape: f32[1,128], index: 4, kind: input, shape index: {}]   ;;  %s3168_s5 = inlined_call_operand.hbm [shape: f32[1024,128], index: 5, kind: input, shape index: {}]   ;;  %s3169_s6 = inlined_call_operand.hbm [shape: f32[2,1,128], index: 6, kind: output, shape index: {0}]   ;;  %s3170_s7 = inlined_call_operand.vmem [shape: f32[2,1,128], index: 7, kind: output, shape index: {1}]  }
   0x1   :  { %14 = vsyncpa [#allocation4], 0  ;;  %s2289_s24 = smov [#allocation2]  }
   0x2   :  { %s30_s25 = sshll.u32 %s2289_s24, 4  ;;  %s31_s25 = int_to_ptr.vmem [resolvable:$true] %s30_s25 }
   0x3   :  { %s2253_s26 = scalar_lea.vmem %s31_s25, 16384  ;;  %p2258_p1 = scmp.lt.s32.totalorder %s31_s25, %s31_s25 }
   0x4   :  { %p2254_p0 = scmp.ne.s32.totalorder %s31_s25, %s2253_s26  ;;  %p2259_p2 = scmp.lt.s32.totalorder %s2253_s26, %s2253_s26 }
   0x6   :  { %p2260_p3 = por %p2259_p2, %p2258_p1 }
   0x8   :  { %p2261_p4 = pnand %p2260_p3, %p2254_p0 }
   0xa   :  { %2264 = shalt.err (!%p2261_p4)
}
   0xb   :  { %s2290_s27 = smov 128   ;;  %s2291_s28 = smov 8  }
   0xc   :  { %36 = dma.hbm_to_vmem [thread:$0]  %s3168_s5, 16384, %s31_s25, [#allocation3], %s2290_s27, %s2290_s27, %s2291_s28  }
   0xd   :  { %2285 = dma.done.wait [#allocation3], 16384  }
   0xe   :  { %2286 = vsyncadd [#allocation3], 4294950912  ;;  %v3171_v0 = vmov 0.0   ;;  %v2293_v1 = vmov 0   ;;  %v182_v2 = vld [vmem:[%s3163_s0 + $0x8] sm:$0xff]  ;;  %v184_v3 = vld [vmem:[%s3163_s0 + $0x18] sm:$0xff] }
   0xf   :  { %286 = vmatprep.mubr.f32.mxu0 %v3171_v0  ;;  %375 = vmatprep.mubr.f32.mxu1 %v3171_v0  ;;  %v181_v4 = vld [vmem:[%s3163_s0] sm:$0xff]  ;;  %vm209_vm0 = vcmask 64512   ;;  %v183_v5 = vld [vmem:[%s3163_s0 + $0x10] sm:$0xff]  ;;  %v186_v7 = vld [vmem:[%s3163_s0 + $0x28] sm:$0xff]  ;;  %vm1760_vm1 = vcmask 1040384  }
  0x10   :  { %2243 = vset.pattern.permute.xlu0 %v2293_v1  ;;  %2244 = vset.pattern.permute.xlu1 %v2293_v1  ;;  %v2358_v6 = vld [vmem:[%s3164_s1] sm:$0xff]  ;;  %v188_v8 = vld [vmem:[%s3163_s0 + $0x38] sm:$0xff]  ;;  %v187_v10 = vld [vmem:[%s3163_s0 + $0x30] sm:$0xff] }
  0x11   :  { %252 = vmatprep.subr.mxu0 %v182_v2  ;;  %341 = vmatprep.subr.mxu1 %v184_v3  ;;  %v185_v9 = vld [vmem:[%s3163_s0 + $0x20] sm:$0xff]  ;;  %v2381_v11 = vld [vmem:[%s3164_s1 + $0x8] sm:$0xff]  ;;  %v46_v13 = vld [vmem:[%s3165_s2 + $0x10] sm:$0xff] }
  0x12   :  { %253 = vmatpush1.msra.mxu0 %v181_v4  ;;  %342 = vmatpush1.msra.mxu1 %v183_v5  ;;  %v44_v12 = vld [vmem:[%s3165_s2] sm:$0xff]  ;;  %v2393_v14 = vld [vmem:[#allocation2 + $0xf8] sm:$0xff]  ;;  %v2402_v16 = vld [vmem:[%s3164_s1 + $0x10] sm:$0xff] }
  0x13   :  { %1838 = vmatmul.mubr.msk.f32.vlgmr.msra.gmra.mxu0 %vm209_vm0, %v2358_v6  ;;  %1842 = vmatmul.mubr.msk.f32.vlgmr.msra.gmra.mxu1 %vm209_vm0, %v2358_v6  ;;  %v2395_v15 = vld [vmem:[#allocation2 + $0x1f8] sm:$0xff]  ;;  %v45_v17 = vld [vmem:[%s3165_s2 + $0x8] sm:$0xff]  ;;  %v2437_v22 = vld [vmem:[#allocation2 + $0xf0] sm:$0xff] }
  0x14   :  { %292 = vmatprep.mubr.f32.mxu0 %v3171_v0  ;;  %381 = vmatprep.mubr.f32.mxu1 %v3171_v0  ;;  %v47_v18 = vld [vmem:[%s3165_s2 + $0x18] sm:$0xff]  ;;  %v2439_v23 = vld [vmem:[#allocation2 + $0x1f0] sm:$0xff]  ;;  %v2455_v26 = vld [vmem:[#allocation2 + $0xe8] sm:$0xff]  ;;  %s2295_s2 = smov [#allocation5]  }
  0x15   :  { %430 = vmatprep.subr.mxu0 %v186_v7  ;;  %519 = vmatprep.subr.mxu1 %v188_v8  ;;  %v2421_v19 = vld [vmem:[%s3164_s1 + $0x18] sm:$0xff]  ;;  %v2447_v24 = vld [vmem:[#allocation2 + $0x70] sm:$0xff]  ;;  %v2457_v27 = vld [vmem:[#allocation2 + $0x1e8] sm:$0xff]  ;;  %s1822_s15 = sshll.u32 %s2295_s2, 4  ;;  %s1823_s15 = int_to_ptr.vmem [resolvable:$true] %s1822_s15 }
  0x16   :  { %431 = vmatpush1.msra.mxu0 %v185_v9  ;;  %520 = vmatpush1.msra.mxu1 %v187_v10  ;;  %v2429_v20 = vld [vmem:[#allocation2 + $0x78] sm:$0xff]  ;;  %v2449_v25 = vld [vmem:[#allocation2 + $0x170] sm:$0xff]  ;;  %v2465_v28 = vld [vmem:[#allocation2 + $0x68] sm:$0xff]  ;;  %s2265_s16 = scalar_lea.vmem %s1823_s15, 32  ;;  %p2270_p6 = scmp.lt.s32.totalorder %s1823_s15, %s1823_s15 }
  0x17   :  { %1839 = vmatmul.mubr.msk.f32.gmra.mxu0 %vm209_vm0, %v2381_v11  ;;  %1843 = vmatmul.mubr.msk.f32.gmra.mxu1 %vm209_vm0, %v2381_v11  ;;  %v2431_v21 = vld [vmem:[#allocation2 + $0x178] sm:$0xff]  ;;  %v2467_v29 = vld [vmem:[#allocation2 + $0x168] sm:$0xff]  ;;  %v2473_v30 = vld [vmem:[#allocation2 + $0xe0] sm:$0xff]  ;;  %p2266_p5 = scmp.ne.s32.totalorder %s1823_s15, %s2265_s16  ;;  %p2271_p7 = scmp.lt.s32.totalorder %s2265_s16, %s2265_s16 }
  0x18   :  { %298 = vmatprep.mubr.f32.mxu0 %v3171_v0  ;;  %387 = vmatprep.mubr.f32.mxu1 %v3171_v0  ;;  %v2475_v31 = vld [vmem:[#allocation2 + $0x1e0] sm:$0xff]  ;;  %v2487_v34 = vld [vmem:[#allocation2 + $0xd8] sm:$0xff]  ;;  %v2501_v38 = vld [vmem:[#allocation2 + $0xd0] sm:$0xff] }
  0x19   :  { %191 = vperm.xlu0 %2243, %v44_v12   ;;  %201 = vperm.xlu1 %2244, %v46_v13   ;;  %v2481_v32 = vld [vmem:[#allocation2 + $0x60] sm:$0xff]  ;;  %v2489_v35 = vld [vmem:[#allocation2 + $0x1d8] sm:$0xff]  ;;  %v2503_v39 = vld [vmem:[#allocation2 + $0x1d0] sm:$0xff]  ;;  %p2272_p8 = por %p2271_p7, %p2270_p6 }
  0x1a   :  { %1882 = vmatprep.subr.mxu0 %v2393_v14  ;;  %1926 = vmatprep.subr.mxu1 %v2395_v15  ;;  %v2483_v33 = vld [vmem:[#allocation2 + $0x160] sm:$0xff]  ;;  %v2495_v36 = vld [vmem:[#allocation2 + $0x58] sm:$0xff]  ;;  %v2507_v40 = vld [vmem:[#allocation2 + $0x50] sm:$0xff] }
  0x1b   :  { %1840 = vmatmul.mubr.msk.f32.gmra.mxu0 %vm209_vm0, %v2402_v16  ;;  %1844 = vmatmul.mubr.msk.f32.gmra.mxu1 %vm209_vm0, %v2402_v16  ;;  %v2497_v37 = vld [vmem:[#allocation2 + $0x158] sm:$0xff]  ;;  %v2509_v41 = vld [vmem:[#allocation2 + $0x150] sm:$0xff]  ;;  %v2513_v42 = vld [vmem:[#allocation2 + $0xc8] sm:$0xff]  ;;  %p2273_p9 = pnand %p2272_p8, %p2266_p5 }
  0x1c   :  { %304 = vmatprep.mubr.f32.mxu0 %v3171_v0  ;;  %393 = vmatprep.mubr.f32.mxu1 %v3171_v0  ;;  %v2515_v43 = vld [vmem:[#allocation2 + $0x1c8] sm:$0xff]  ;;  %v2525_v46 = vld [vmem:[#allocation2 + $0xc0] sm:$0xff]  ;;  %v2537_v50 = vld [vmem:[#allocation2 + $0xb8] sm:$0xff] }
  0x1d   :  { %196 = vperm.xlu0 %2243, %v45_v17   ;;  %206 = vperm.xlu1 %2244, %v47_v18   ;;  %v2519_v44 = vld [vmem:[#allocation2 + $0x48] sm:$0xff]  ;;  %v2527_v47 = vld [vmem:[#allocation2 + $0x1c0] sm:$0xff]  ;;  %3268 = vst [vmem:[#allocation8_spill] sm:$0xff] %v2537_v50  ;;  %v2539_v51 = vld [vmem:[#allocation2 + $0x1b8] sm:$0xff] }
  0x1e   :  { %v2521_v45 = vld [vmem:[#allocation2 + $0x148] sm:$0xff]  ;;  %v2531_v48 = vld [vmem:[#allocation2 + $0x40] sm:$0xff]  ;;  %3269 = vst [vmem:[#allocation9_spill] sm:$0xff] %v2539_v51  ;;  %v2543_v52 = vld [vmem:[#allocation2 + $0x38] sm:$0xff] }
  0x1f   :  { %1841 = vmatmul.mubr.msk.f32.gmra.mxu0 %vm209_vm0, %v2421_v19  ;;  %1845 = vmatmul.mubr.msk.f32.gmra.mxu1 %vm209_vm0, %v2421_v19  ;;  %v2533_v49 = vld [vmem:[#allocation2 + $0x140] sm:$0xff]  ;;  %3270 = vst [vmem:[#allocation10_spill] sm:$0xff] %v2543_v52  ;;  %v2545_v53 = vld [vmem:[#allocation2 + $0x138] sm:$0xff]  ;;  %v2549_v54 = vld [vmem:[#allocation2 + $0xb0] sm:$0xff] }
  0x20   :  { %464 = vmatprep.mubr.f32.mxu0 %v3171_v0  ;;  %553 = vmatprep.mubr.f32.mxu1 %v3171_v0  ;;  %3271 = vst [vmem:[#allocation11_spill] sm:$0xff] %v2545_v53  ;;  %3272 = vst [vmem:[#allocation12_spill] sm:$0xff] %v2549_v54  ;;  %v2551_v55 = vld [vmem:[#allocation2 + $0x1b0] sm:$0xff]  ;;  %v2561_v58 = vld [vmem:[#allocation2 + $0xa8] sm:$0xff] }
  0x21   :  { %3273 = vst [vmem:[#allocation13_spill] sm:$0xff] %v2551_v55  ;;  %v2555_v56 = vld [vmem:[#allocation2 + $0x30] sm:$0xff]  ;;  %3276 = vst [vmem:[#allocation16_spill] sm:$0xff] %v2561_v58  ;;  %v2563_v59 = vld [vmem:[#allocation2 + $0x1a8] sm:$0xff] }
  0x22   :  { %3274 = vst [vmem:[#allocation14_spill] sm:$0xff] %v2555_v56  ;;  %v2557_v57 = vld [vmem:[#allocation2 + $0x130] sm:$0xff]  ;;  %3277 = vst [vmem:[#allocation17_spill] sm:$0xff] %v2563_v59  ;;  %v2567_v60 = vld [vmem:[#allocation2 + $0x28] sm:$0xff] }
  0x23   :  { %1846 = vmatmul.mubr.msk.f32.vlgmr.msra.gmra.mxu0 %vm209_vm0, %v2358_v6  ;;  %1850 = vmatmul.mubr.msk.f32.vlgmr.msra.gmra.mxu1 %vm209_vm0, %v2358_v6  ;;  %3275 = vst [vmem:[#allocation15_spill] sm:$0xff] %v2557_v57  ;;  %3278 = vst [vmem:[#allocation18_spill] sm:$0xff] %v2567_v60  ;;  %v2569_v61 = vld [vmem:[#allocation2 + $0x128] sm:$0xff]  ;;  %v2573_v62 = vld [vmem:[#allocation2 + $0xa0] sm:$0xff] }
  0x24   :  { %470 = vmatprep.mubr.f32.mxu0 %v3171_v0  ;;  %559 = vmatprep.mubr.f32.mxu1 %v3171_v0  ;;  %3279 = vst [vmem:[#allocation19_spill] sm:$0xff] %v2569_v61  ;;  %3280 = vst [vmem:[#allocation20_spill] sm:$0xff] %v2573_v62  ;;  %v2575_v63 = vld [vmem:[#allocation2 + $0x1a0] sm:$0xff]  ;;  %v2585_v3 = vld [vmem:[#allocation2 + $0x98] sm:$0xff] }
  0x25   :  { %1883 = vmatpush3.msra.mxu0 %v2429_v20  ;;  %1927 = vmatpush3.msra.mxu1 %v2431_v21  ;;  %3281 = vst [vmem:[#allocation21_spill] sm:$0xff] %v2575_v63  ;;  %v2579_v1 = vld [vmem:[#allocation2 + $0x20] sm:$0xff]  ;;  %3284 = vst [vmem:[#allocation24_spill] sm:$0xff] %v2585_v3  ;;  %v2587_v4 = vld [vmem:[#allocation2 + $0x198] sm:$0xff] }
  0x26   :  { %1884 = vmatprep.subr.mxu0 %v2437_v22  ;;  %1928 = vmatprep.subr.mxu1 %v2439_v23  ;;  %3282 = vst [vmem:[#allocation22_spill] sm:$0xff] %v2579_v1  ;;  %v2581_v2 = vld [vmem:[#allocation2 + $0x120] sm:$0xff]  ;;  %3285 = vst [vmem:[#allocation25_spill] sm:$0xff] %v2587_v4  ;;  %v2595_v5 = vld [vmem:[#allocation2 + $0x18] sm:$0xff] }
  0x27   :  { %1847 = vmatmul.mubr.msk.f32.gmra.mxu0 %vm209_vm0, %v2381_v11  ;;  %1851 = vmatmul.mubr.msk.f32.gmra.mxu1 %vm209_vm0, %v2381_v11  ;;  %3283 = vst [vmem:[#allocation23_spill] sm:$0xff] %v2581_v2  ;;  %3286 = vst [vmem:[#allocation26_spill] sm:$0xff] %v2595_v5  ;;  %v2597_v7 = vld [vmem:[#allocation2 + $0x118] sm:$0xff]  ;;  %v2601_v8 = vld [vmem:[#allocation2 + $0x90] sm:$0xff] }
  0x28   :  { %476 = vmatprep.mubr.f32.mxu0 %v3171_v0  ;;  %565 = vmatprep.mubr.f32.mxu1 %v3171_v0  ;;  %3287 = vst [vmem:[#allocation27_spill] sm:$0xff] %v2597_v7  ;;  %3288 = vst [vmem:[#allocation28_spill] sm:$0xff] %v2601_v8  ;;  %v2603_v9 = vld [vmem:[#allocation2 + $0x190] sm:$0xff]  ;;  %v2613_v13 = vld [vmem:[#allocation2 + $0x88] sm:$0xff] }
  0x29   :  { %1885 = vmatpush3.msra.mxu0 %v2447_v24  ;;  %1929 = vmatpush3.msra.mxu1 %v2449_v25  ;;  %3289 = vst [vmem:[#allocation29_spill] sm:$0xff] %v2603_v9  ;;  %v2607_v10 = vld [vmem:[#allocation2 + $0x10] sm:$0xff]  ;;  %3292 = vst [vmem:[#allocation32_spill] sm:$0xff] %v2613_v13  ;;  %v2615_v17 = vld [vmem:[#allocation2 + $0x188] sm:$0xff] }
  0x2a   :  { %1886 = vmatprep.subr.mxu0 %v2455_v26  ;;  %1930 = vmatprep.subr.mxu1 %v2457_v27  ;;  %3290 = vst [vmem:[#allocation30_spill] sm:$0xff] %v2607_v10  ;;  %v2609_v12 = vld [vmem:[#allocation2 + $0x110] sm:$0xff]  ;;  %3293 = vst [vmem:[#allocation33_spill] sm:$0xff] %v2615_v17  ;;  %v2619_v18 = vld [vmem:[#allocation2 + $0x8] sm:$0xff] }
  0x2b   :  { %1848 = vmatmul.mubr.msk.f32.gmra.mxu0 %vm209_vm0, %v2402_v16  ;;  %1852 = vmatmul.mubr.msk.f32.gmra.mxu1 %vm209_vm0, %v2402_v16  ;;  %3291 = vst [vmem:[#allocation31_spill] sm:$0xff] %v2609_v12  ;;  %3294 = vst [vmem:[#allocation34_spill] sm:$0xff] %v2619_v18 }
  0x2c   :  { %482 = vmatprep.mubr.f32.mxu0 %v3171_v0  ;;  %571 = vmatprep.mubr.f32.mxu1 %v3171_v0  ;;  %v2621_v0 = vld [vmem:[#allocation2 + $0x108] sm:$0xff] }
  0x2d   :  { %1887 = vmatpush3.msra.mxu0 %v2465_v28  ;;  %1931 = vmatpush3.msra.mxu1 %v2467_v29  ;;  %3295 = vst [vmem:[#allocation35_spill] sm:$0xff] %v2621_v0 }
  0x2e   :  { %1888 = vmatprep.subr.mxu0 %v2473_v30  ;;  %1932 = vmatprep.subr.mxu1 %v2475_v31 }
  0x2f   :  { %1849 = vmatmul.mubr.msk.f32.gmra.mxu0 %vm209_vm0, %v2421_v19  ;;  %1853 = vmatmul.mubr.msk.f32.gmra.mxu1 %vm209_vm0, %v2421_v19 }
  0x30   :  { %1889 = vmatpush3.msra.mxu0 %v2481_v32  ;;  %1933 = vmatpush3.msra.mxu1 %v2483_v33 }
  0x31   :  { %1890 = vmatprep.subr.mxu0 %v2487_v34  ;;  %1934 = vmatprep.subr.mxu1 %v2489_v35 }
  0x32   :  { %1891 = vmatpush3.msra.mxu0 %v2495_v36  ;;  %1935 = vmatpush3.msra.mxu1 %v2497_v37 }
  0x33   :  { %1892 = vmatprep.subr.mxu0 %v2501_v38  ;;  %1936 = vmatprep.subr.mxu1 %v2503_v39 }
  0x34   :  { %1893 = vmatpush3.msra.mxu0 %v2507_v40  ;;  %1937 = vmatpush3.msra.mxu1 %v2509_v41 }
  0x35   :  { %1894 = vmatprep.subr.mxu0 %v2513_v42  ;;  %1938 = vmatprep.subr.mxu1 %v2515_v43 }
  0x36   :  { %1895 = vmatpush3.msra.mxu0 %v2519_v44  ;;  %1939 = vmatpush3.msra.mxu1 %v2521_v45 }
  0x37   :  { %1896 = vmatprep.subr.mxu0 %v2525_v46  ;;  %1940 = vmatprep.subr.mxu1 %v2527_v47 }
  0x38   :  { %1897 = vmatpush3.msra.mxu0 %v2531_v48  ;;  %1941 = vmatpush3.msra.mxu1 %v2533_v49 }
  0x39   :  { %1898 = vmatprep.subr.mxu0 %v2537_v50  ;;  %1942 = vmatprep.subr.mxu1 %v2539_v51 }
  0x3a   :  { %1899 = vmatpush3.msra.mxu0 %v2543_v52  ;;  %1943 = vmatpush3.msra.mxu1 %v2545_v53 }
  0x3b   :  { %1900 = vmatprep.subr.mxu0 %v2549_v54  ;;  %1944 = vmatprep.subr.mxu1 %v2551_v55 }
  0x3c   :  { %1901 = vmatpush3.msra.mxu0 %v2555_v56  ;;  %1945 = vmatpush3.msra.mxu1 %v2557_v57  ;;  %v2663_v57 = vld [vmem:[#allocation2 + $0x270] sm:$0xff] }
  0x3d   :  { %1902 = vmatprep.subr.mxu0 %v2561_v58  ;;  %1946 = vmatprep.subr.mxu1 %v2563_v59  ;;  %v2651_v59 = vld [vmem:[#allocation2 + $0x278] sm:$0xff]  ;;  %3306 = vst [vmem:[#allocation46_spill] sm:$0xff] %v2663_v57  ;;  %v2665_v56 = vld [vmem:[#allocation2 + $0x370] sm:$0xff] }
  0x3e   :  { %1903 = vmatpush3.msra.mxu0 %v2567_v60  ;;  %1947 = vmatpush3.msra.mxu1 %v2569_v61  ;;  %3302 = vst [vmem:[#allocation42_spill] sm:$0xff] %v2651_v59  ;;  %3307 = vst [vmem:[#allocation47_spill] sm:$0xff] %v2665_v56 }
  0x3f   :  { %1904 = vmatprep.subr.mxu0 %v2573_v62  ;;  %1948 = vmatprep.subr.mxu1 %v2575_v63 }
  0x40   :  { %1905 = vmatpush3.msra.mxu0 %v2579_v1  ;;  %1949 = vmatpush3.msra.mxu1 %v2581_v2 }
  0x41   :  { %1906 = vmatprep.subr.mxu0 %v2585_v3  ;;  %1950 = vmatprep.subr.mxu1 %v2587_v4 }
  0x42   :  { %1907 = vmatpush3.msra.mxu0 %v2595_v5  ;;  %1951 = vmatpush3.msra.mxu1 %v2597_v7 }
  0x43   :  { %1908 = vmatprep.subr.mxu0 %v2601_v8  ;;  %1952 = vmatprep.subr.mxu1 %v2603_v9  ;;  %v2625_v9 = vld [vmem:[#allocation2 + $0x80] sm:$0xff] }
  0x44   :  { %1909 = vmatpush3.msra.mxu0 %v2607_v10  ;;  %1953 = vmatpush3.msra.mxu1 %v2609_v12  ;;  %3296 = vst [vmem:[#allocation36_spill] sm:$0xff] %v2625_v9  ;;  %v2627_v10 = vld [vmem:[#allocation2 + $0x180] sm:$0xff] }
  0x45   :  { %1910 = vmatprep.subr.mxu0 %v2613_v13  ;;  %1954 = vmatprep.subr.mxu1 %v2615_v17  ;;  %3297 = vst [vmem:[#allocation37_spill] sm:$0xff] %v2627_v10  ;;  %v2631_v12 = vld [vmem:[#allocation2] sm:$0xff]  ;;  %v2637_v17 = vld [vmem:[#allocation2 + $0x2f8] sm:$0xff] }
  0x46   :  { %1911 = vmatpush3.msra.mxu0 %v2619_v18  ;;  %1955 = vmatpush3.msra.mxu1 %v2621_v0  ;;  %3298 = vst [vmem:[#allocation38_spill] sm:$0xff] %v2631_v12  ;;  %v2633_v13 = vld [vmem:[#allocation2 + $0x100] sm:$0xff]  ;;  %3300 = vst [vmem:[#allocation40_spill] sm:$0xff] %v2637_v17  ;;  %v2639_v18 = vld [vmem:[#allocation2 + $0x3f8] sm:$0xff] }
  0x47   :  { %1912 = vmatprep.subr.mxu0 %v2625_v9  ;;  %1956 = vmatprep.subr.mxu1 %v2627_v10  ;;  %3299 = vst [vmem:[#allocation39_spill] sm:$0xff] %v2633_v13  ;;  %3301 = vst [vmem:[#allocation41_spill] sm:$0xff] %v2639_v18 }
  0x48   :  { %1913 = vmatpush3.msra.mxu0 %v2631_v12  ;;  %1957 = vmatpush3.msra.mxu1 %v2633_v13 }
  0x49   :  { %1970 = vmatprep.subr.mxu0 %v2637_v17  ;;  %2014 = vmatprep.subr.mxu1 %v2639_v18 }
  0x94   :  { %v2643_v0 = vpop.permute.xlu0 %191 }
  0x98   :  { %v2649_v17 = vpop.permute.xlu0 %196 }
  0xd3   :  { %v288_v9 = vpop.f32.mrf.mxu0  ;;  %v377_v10 = vpop.f32.mrf.mxu1 }
  0xd4   :  { %v378_v8 = vadd.f32 %v377_v10, %v2643_v0  ;;  %v289_v7 = vadd.f32 %v288_v9, %v2643_v0  ;;  %v2653_v10 = vld [vmem:[#allocation2 + $0x378] sm:$0xff] }
  0xd5   :  { %v290_v5 = vpop.f32.mrf.mxu0  ;;  %v379_v12 = vpop.f32.mrf.mxu1  ;;  %3303 = vst [vmem:[#allocation43_spill] sm:$0xff] %v2653_v10 }
  0xd6   :  { %v291_v13 = vadd.f32 %v290_v5, %v2643_v0  ;;  %v380_v4 = vadd.f32 %v379_v12, %v2643_v0  ;;  %v580_v3 = vmax.f32 %v378_v8, 0.0  ;;  %v578_v62 = vmax.f32 %v289_v7, 0.0  ;;  %v2657_v8 = vld [vmem:[#allocation2 + $0x2f0] sm:$0xff] }
  0xd7   :  { %v294_v2 = vpop.f32.mrf.mxu0  ;;  %v383_v1 = vpop.f32.mrf.mxu1  ;;  %3304 = vst [vmem:[#allocation44_spill] sm:$0xff] %v2657_v8  ;;  %v2659_v12 = vld [vmem:[#allocation2 + $0x3f0] sm:$0xff] }
  0xd8   :  { %v579_v18 = vmax.f32 %v291_v13, 0.0  ;;  %v581_v63 = vmax.f32 %v380_v4, 0.0  ;;  %3305 = vst [vmem:[#allocation45_spill] sm:$0xff] %v2659_v12  ;;  %v295_v13 = vadd.f32 %v294_v2, %v2649_v17  ;;  %v384_v4 = vadd.f32 %v383_v1, %v2649_v17 }
  0xd9   :  { %v296_v61 = vpop.f32.mrf.mxu0  ;;  %v385_v60 = vpop.f32.mrf.mxu1 }
  0xda   :  { %v297_v9 = vadd.f32 %v296_v61, %v2649_v17  ;;  %v386_v5 = vadd.f32 %v385_v60, %v2649_v17  ;;  %674 = vmatprep.mubr.f32.mxu0 %v579_v18  ;;  %759 = vmatprep.mubr.f32.mxu1 %v581_v63  ;;  %v2669_v63 = vpop.permute.xlu1 %201  ;;  %v586_v18 = vmax.f32 %v295_v13, 0.0  ;;  %v2689_v13 = vld [vmem:[#allocation2 + $0x3e0] sm:$0xff] }
  0xdb   :  { %v300_v7 = vpop.f32.mrf.mxu0  ;;  %v389_v58 = vpop.f32.mrf.mxu1  ;;  %675 = vmatmul.mubr.f32.vlgmr.msra.gmra.mxu0 %v578_v62  ;;  %760 = vmatmul.mubr.f32.vlgmr.msra.gmra.mxu1 %v580_v3  ;;  %v2673_v62 = vld [vmem:[#allocation2 + $0x2e8] sm:$0xff]  ;;  %3313 = vst [vmem:[#allocation53_spill] sm:$0xff] %v2689_v13 }
  0xdc   :  { %v587_v61 = vmax.f32 %v297_v9, 0.0  ;;  %v589_v60 = vmax.f32 %v386_v5, 0.0  ;;  %1971 = vmatpush3.msra.mxu0 %v2651_v59  ;;  %2015 = vmatpush3.msra.mxu1 %v2653_v10  ;;  %3308 = vst [vmem:[#allocation48_spill] sm:$0xff] %v2673_v62  ;;  %v2675_v3 = vld [vmem:[#allocation2 + $0x3e8] sm:$0xff]  ;;  %v588_v9 = vmax.f32 %v384_v4, 0.0 }
  0xdd   :  { %1972 = vmatprep.subr.mxu0 %v2657_v8  ;;  %2016 = vmatprep.subr.mxu1 %v2659_v12  ;;  %v302_v1 = vpop.f32.mrf.mxu0  ;;  %v391_v2 = vpop.f32.mrf.mxu1  ;;  %3309 = vst [vmem:[#allocation49_spill] sm:$0xff] %v2675_v3  ;;  %v2679_v59 = vld [vmem:[#allocation2 + $0x268] sm:$0xff] }
  0xde   :  { %1973 = vmatpush3.msra.mxu0 %v2663_v57  ;;  %2017 = vmatpush3.msra.mxu1 %v2665_v56  ;;  %3310 = vst [vmem:[#allocation50_spill] sm:$0xff] %v2679_v59  ;;  %v2681_v8 = vld [vmem:[#allocation2 + $0x368] sm:$0xff]  ;;  %v303_v12 = vadd.f32 %v302_v1, %v2669_v63  ;;  %v392_v55 = vadd.f32 %v391_v2, %v2669_v63  ;;  %v2687_v57 = vld [vmem:[#allocation2 + $0x2e0] sm:$0xff] }
  0xdf   :  { %679 = vmatprep.mubr.f32.mxu0 %v587_v61  ;;  %764 = vmatprep.mubr.f32.mxu1 %v589_v60  ;;  %v306_v5 = vpop.f32.mrf.mxu0  ;;  %v395_v10 = vpop.f32.mrf.mxu1  ;;  %3311 = vst [vmem:[#allocation51_spill] sm:$0xff] %v2681_v8  ;;  %3312 = vst [vmem:[#allocation52_spill] sm:$0xff] %v2687_v57  ;;  %v2691_v60 = vld [vmem:[#allocation2 + $0x260] sm:$0xff]  ;;  %v301_v1 = vadd.f32 %v300_v7, %v2669_v63  ;;  %v390_v2 = vadd.f32 %v389_v58, %v2669_v63  ;;  %v2711_v7 = vld [vmem:[#allocation2 + $0x258] sm:$0xff] }
  0xe0   :  { %1974 = vmatprep.subr.mxu0 %v2673_v62  ;;  %2018 = vmatprep.subr.mxu1 %v2675_v3  ;;  %3314 = vst [vmem:[#allocation54_spill] sm:$0xff] %v2691_v60  ;;  %v2693_v56 = vld [vmem:[#allocation2 + $0x360] sm:$0xff]  ;;  %v2699_v3 = vld [vmem:[#allocation2 + $0x2d8] sm:$0xff]  ;;  %3318 = vst [vmem:[#allocation58_spill] sm:$0xff] %v2711_v7 }
  0xe1   :  { %680 = vmatmul.mubr.f32.gmra.mxu0 %v586_v18  ;;  %765 = vmatmul.mubr.f32.gmra.mxu1 %v588_v9  ;;  %v308_v4 = vpop.f32.mrf.mxu0  ;;  %v397_v61 = vpop.f32.mrf.mxu1  ;;  %3315 = vst [vmem:[#allocation55_spill] sm:$0xff] %v2693_v56  ;;  %3316 = vst [vmem:[#allocation56_spill] sm:$0xff] %v2699_v3  ;;  %v2701_v62 = vld [vmem:[#allocation2 + $0x3d8] sm:$0xff]  ;;  %v594_v53 = vmax.f32 %v301_v1, 0.0  ;;  %v596_v52 = vmax.f32 %v390_v2, 0.0  ;;  %v2742_v2 = vld [vmem:[#allocation2 + $0x348] sm:$0xff] }
  0xe2   :  { %1975 = vmatpush3.msra.mxu0 %v2679_v59  ;;  %2019 = vmatpush3.msra.mxu1 %v2681_v8  ;;  %3317 = vst [vmem:[#allocation57_spill] sm:$0xff] %v2701_v62  ;;  %v2703_v18 = vpop.permute.xlu1 %206  ;;  %v2713_v58 = vld [vmem:[#allocation2 + $0x358] sm:$0xff]  ;;  %v595_v59 = vmax.f32 %v303_v12, 0.0  ;;  %v597_v8 = vmax.f32 %v392_v55, 0.0  ;;  %3327 = vst [vmem:[#allocation67_spill] sm:$0xff] %v2742_v2 }
  0xe3   :  { %1976 = vmatprep.subr.mxu0 %v2687_v57  ;;  %2020 = vmatprep.subr.mxu1 %v2689_v13  ;;  %v2707_v9 = vpop.f32.mrf.mxu0  ;;  %v2709_v54 = vpop.f32.mrf.mxu1  ;;  %3319 = vst [vmem:[#allocation59_spill] sm:$0xff] %v2713_v58  ;;  %v2719_v57 = vld [vmem:[#allocation2 + $0x2d0] sm:$0xff]  ;;  %v309_v51 = vadd.f32 %v308_v4, %v2703_v18  ;;  %v398_v50 = vadd.f32 %v397_v61, %v2703_v18  ;;  %v2735_v4 = vld [vmem:[#allocation2 + $0x2c8] sm:$0xff] }
  0xe4   :  { %1977 = vmatpush3.msra.mxu0 %v2691_v60  ;;  %2021 = vmatpush3.msra.mxu1 %v2693_v56  ;;  %3320 = vst [vmem:[#allocation60_spill] sm:$0xff] %v2719_v57  ;;  %v2721_v13 = vld [vmem:[#allocation2 + $0x3d0] sm:$0xff]  ;;  %v307_v56 = vadd.f32 %v306_v5, %v2703_v18  ;;  %v396_v1 = vadd.f32 %v395_v10, %v2703_v18  ;;  %3324 = vst [vmem:[#allocation64_spill] sm:$0xff] %v2735_v4  ;;  %v2737_v61 = vld [vmem:[#allocation2 + $0x3c8] sm:$0xff] }
  0xe5   :  { %1978 = vmatprep.subr.mxu0 %v2699_v3  ;;  %2022 = vmatprep.subr.mxu1 %v2701_v62  ;;  %3321 = vst [vmem:[#allocation61_spill] sm:$0xff] %v2721_v13  ;;  %v468_v55 = vpop.f32.mrf.mxu0  ;;  %v557_v12 = vpop.f32.mrf.mxu1  ;;  %v2727_v3 = vld [vmem:[#allocation2 + $0x250] sm:$0xff]  ;;  %3325 = vst [vmem:[#allocation65_spill] sm:$0xff] %v2737_v61  ;;  %v605_v5 = vmax.f32 %v398_v50, 0.0 }
  0xe6   :  { %1979 = vmatpush3.msra.mxu0 %v2711_v7  ;;  %2023 = vmatpush3.msra.mxu1 %v2713_v58  ;;  %3322 = vst [vmem:[#allocation62_spill] sm:$0xff] %v2727_v3  ;;  %v2729_v62 = vld [vmem:[#allocation2 + $0x350] sm:$0xff]  ;;  %v603_v58 = vmax.f32 %v309_v51, 0.0  ;;  %v558_v10 = vadd.f32 %v557_v12, %v2643_v0  ;;  %v2755_v51 = vld [vmem:[#allocation2 + $0x240] sm:$0xff] }
  0xe7   :  { %684 = vmatprep.mubr.f32.mxu0 %v595_v59  ;;  %769 = vmatprep.mubr.f32.mxu1 %v597_v8  ;;  %3323 = vst [vmem:[#allocation63_spill] sm:$0xff] %v2729_v62  ;;  %v469_v59 = vadd.f32 %v468_v55, %v2643_v0  ;;  %v2740_v8 = vld [vmem:[#allocation2 + $0x248] sm:$0xff]  ;;  %v604_v55 = vmax.f32 %v396_v1, 0.0  ;;  %3330 = vst [vmem:[#allocation70_spill] sm:$0xff] %v2755_v51  ;;  %v2757_v12 = vld [vmem:[#allocation2 + $0x340] sm:$0xff]  ;;  %v2765_v1 = vpop.f32.mrf.mxu1 }
  0xe8   :  { %1980 = vmatprep.subr.mxu0 %v2719_v57  ;;  %2024 = vmatprep.subr.mxu1 %v2721_v13  ;;  %3326 = vst [vmem:[#allocation66_spill] sm:$0xff] %v2740_v8  ;;  %v2749_v13 = vld [vmem:[#allocation2 + $0x2c0] sm:$0xff]  ;;  %3331 = vst [vmem:[#allocation71_spill] sm:$0xff] %v2757_v12  ;;  %v2851_v57 = vld [vmem:[#allocation2 + $0x308] sm:$0xff] }
  0xe9   :  { %685 = vmatmul.mubr.f32.gmra.mxu0 %v594_v53  ;;  %770 = vmatmul.mubr.f32.gmra.mxu1 %v596_v52  ;;  %3328 = vst [vmem:[#allocation68_spill] sm:$0xff] %v2749_v13  ;;  %v2751_v53 = vld [vmem:[#allocation2 + $0x3c0] sm:$0xff]  ;;  %v602_v52 = vmax.f32 %v307_v56, 0.0  ;;  %v583_v50 = vmax.f32 %v469_v59, 0.0  ;;  %v2763_v56 = vld [vmem:[#allocation2 + $0x2b8] sm:$0xff] }
  0xea   :  { %1981 = vmatpush3.msra.mxu0 %v2727_v3  ;;  %2025 = vmatpush3.msra.mxu1 %v2729_v62  ;;  %3329 = vst [vmem:[#allocation69_spill] sm:$0xff] %v2751_v53  ;;  %v2759_v62 = vpop.f32.mrf.mxu0  ;;  %3332 = vst [vmem:[#allocation72_spill] sm:$0xff] %v2763_v56  ;;  %v2767_v59 = vld [vmem:[#allocation2 + $0x3b8] sm:$0xff]  ;;  %v467_v3 = vadd.f32 %v2707_v9, %v2643_v0  ;;  %v2858_v9 = vld [vmem:[#allocation2 + $0x380] sm:$0xff] }
  0xeb   :  { %1982 = vmatprep.subr.mxu0 %v2735_v4  ;;  %2026 = vmatprep.subr.mxu1 %v2737_v61  ;;  %v585_v4 = vmax.f32 %v558_v10, 0.0  ;;  %3333 = vst [vmem:[#allocation73_spill] sm:$0xff] %v2767_v59  ;;  %v2776_v10 = vld [vmem:[#allocation2 + $0x2b0] sm:$0xff]  ;;  %3360 = vst [vmem:[#allocation100_spill] sm:$0xff] %v2858_v9  ;;  %v473_v60 = vadd.f32 %v2759_v62, %v2649_v17  ;;  %v1854_v62 = vld [vmem:[%s3163_s0 + $0x40] sm:$0xff] }
  0xec   :  { %1983 = vmatpush3.msra.mxu0 %v2740_v8  ;;  %2027 = vmatpush3.msra.mxu1 %v2742_v2  ;;  %3336 = vst [vmem:[#allocation76_spill] sm:$0xff] %v2776_v10  ;;  %v2827_v8 = vld [vmem:[#allocation2 + $0x290] sm:$0xff] }
  0xed   :  { %689 = vmatprep.mubr.f32.mxu0 %v603_v58  ;;  %774 = vmatprep.mubr.f32.mxu1 %v605_v5  ;;  %v2771_v58 = vld [vmem:[#allocation2 + $0x238] sm:$0xff]  ;;  %3352 = vst [vmem:[#allocation92_spill] sm:$0xff] %v2827_v8 }
  0xee   :  { %1984 = vmatprep.subr.mxu0 %v2749_v13  ;;  %2028 = vmatprep.subr.mxu1 %v2751_v53  ;;  %3334 = vst [vmem:[#allocation74_spill] sm:$0xff] %v2771_v58  ;;  %v2773_v5 = vld [vmem:[#allocation2 + $0x338] sm:$0xff]  ;;  %v2778_v53 = vld [vmem:[#allocation2 + $0x3b0] sm:$0xff]  ;;  %v474_v13 = vpop.f32.mrf.mxu0 }
  0xef   :  { %690 = vmatmul.mubr.f32.gmra.mxu0 %v602_v52  ;;  %775 = vmatmul.mubr.f32.gmra.mxu1 %v604_v55  ;;  %3335 = vst [vmem:[#allocation75_spill] sm:$0xff] %v2773_v5  ;;  %3337 = vst [vmem:[#allocation77_spill] sm:$0xff] %v2778_v53  ;;  %v2781_v52 = vld [vmem:[#allocation2 + $0x230] sm:$0xff] }
  0xf0   :  { %1985 = vmatpush3.msra.mxu0 %v2755_v51  ;;  %2029 = vmatpush3.msra.mxu1 %v2757_v12  ;;  %3338 = vst [vmem:[#allocation78_spill] sm:$0xff] %v2781_v52  ;;  %v2783_v55 = vld [vmem:[#allocation2 + $0x330] sm:$0xff]  ;;  %v563_v12 = vpop.f32.mrf.mxu1  ;;  %v2787_v51 = vld [vmem:[#allocation2 + $0x2a8] sm:$0xff] }
  0xf1   :  { %1986 = vmatprep.subr.mxu0 %v2763_v56  ;;  %844 = vmatprep.mubr.f32.mxu0 %v583_v50  ;;  %3339 = vst [vmem:[#allocation79_spill] sm:$0xff] %v2783_v55  ;;  %3340 = vst [vmem:[#allocation80_spill] sm:$0xff] %v2787_v51  ;;  %v2789_v50 = vld [vmem:[#allocation2 + $0x3a8] sm:$0xff] }
  0xf2   :  { %2030 = vmatprep.subr.mxu1 %v2767_v59  ;;  %929 = vmatprep.mubr.f32.mxu1 %v585_v4  ;;  %3341 = vst [vmem:[#allocation81_spill] sm:$0xff] %v2789_v50  ;;  %v2793_v56 = vld [vmem:[#allocation2 + $0x228] sm:$0xff]  ;;  %v2799_v59 = vld [vmem:[#allocation2 + $0x2a0] sm:$0xff]  ;;  %v2811_v2 = vpop.f32.mrf.mxu1 }
  0xf3   :  { %1987 = vmatpush3.msra.mxu0 %v2771_v58  ;;  %2031 = vmatpush3.msra.mxu1 %v2773_v5  ;;  %3342 = vst [vmem:[#allocation82_spill] sm:$0xff] %v2793_v56  ;;  %v2795_v4 = vld [vmem:[#allocation2 + $0x328] sm:$0xff]  ;;  %3344 = vst [vmem:[#allocation84_spill] sm:$0xff] %v2799_v59  ;;  %v2801_v58 = vld [vmem:[#allocation2 + $0x3a0] sm:$0xff]  ;;  %v2803_v5 = vpop.f32.mrf.mxu0 }
  0xf4   :  { %1988 = vmatprep.subr.mxu0 %v2776_v10  ;;  %2032 = vmatprep.subr.mxu1 %v2778_v53  ;;  %3343 = vst [vmem:[#allocation83_spill] sm:$0xff] %v2795_v4  ;;  %3345 = vst [vmem:[#allocation85_spill] sm:$0xff] %v2801_v58  ;;  %v2807_v10 = vld [vmem:[#allocation2 + $0x220] sm:$0xff]  ;;  %v569_v61 = vpop.f32.mrf.mxu1 }
  0xf5   :  { %1989 = vmatpush3.msra.mxu0 %v2781_v52  ;;  %2033 = vmatpush3.msra.mxu1 %v2783_v55  ;;  %3346 = vst [vmem:[#allocation86_spill] sm:$0xff] %v2807_v10  ;;  %v2809_v53 = vld [vmem:[#allocation2 + $0x320] sm:$0xff]  ;;  %v2815_v55 = vld [vmem:[#allocation2 + $0x298] sm:$0xff] }
  0xf6   :  { %1990 = vmatprep.subr.mxu0 %v2787_v51  ;;  %2034 = vmatprep.subr.mxu1 %v2789_v50  ;;  %3347 = vst [vmem:[#allocation87_spill] sm:$0xff] %v2809_v53  ;;  %3348 = vst [vmem:[#allocation88_spill] sm:$0xff] %v2815_v55  ;;  %v2817_v52 = vld [vmem:[#allocation2 + $0x398] sm:$0xff] }
  0xf7   :  { %1991 = vmatpush3.msra.mxu0 %v2793_v56  ;;  %2035 = vmatpush3.msra.mxu1 %v2795_v4  ;;  %3349 = vst [vmem:[#allocation89_spill] sm:$0xff] %v2817_v52  ;;  %v2821_v51 = vld [vmem:[#allocation2 + $0x218] sm:$0xff]  ;;  %v2829_v56 = vld [vmem:[#allocation2 + $0x390] sm:$0xff]  ;;  %v480_v4 = vpop.f32.mrf.mxu0 }
  0xf8   :  { %1992 = vmatprep.subr.mxu0 %v2799_v59  ;;  %2036 = vmatprep.subr.mxu1 %v2801_v58  ;;  %3350 = vst [vmem:[#allocation90_spill] sm:$0xff] %v2821_v51  ;;  %v2823_v50 = vld [vmem:[#allocation2 + $0x318] sm:$0xff]  ;;  %3353 = vst [vmem:[#allocation93_spill] sm:$0xff] %v2829_v56  ;;  %v2833_v59 = vld [vmem:[#allocation2 + $0x210] sm:$0xff] }
  0xf9   :  { %3351 = vst [vmem:[#allocation91_spill] sm:$0xff] %v2823_v50  ;;  %1993 = vmatpush3.msra.mxu0 %v2807_v10  ;;  %2037 = vmatpush3.msra.mxu1 %v2809_v53  ;;  %3354 = vst [vmem:[#allocation94_spill] sm:$0xff] %v2833_v59  ;;  %v2835_v58 = vld [vmem:[#allocation2 + $0x310] sm:$0xff]  ;;  %v2839_v10 = vld [vmem:[#allocation2 + $0x288] sm:$0xff]  ;;  %v484_v7 = vpop.f32.mrf.mxu0 }
  0xfa   :  { %1994 = vmatprep.subr.mxu0 %v2815_v55  ;;  %2038 = vmatprep.subr.mxu1 %v2817_v52  ;;  %3355 = vst [vmem:[#allocation95_spill] sm:$0xff] %v2835_v58  ;;  %3356 = vst [vmem:[#allocation96_spill] sm:$0xff] %v2839_v10  ;;  %v2841_v53 = vld [vmem:[#allocation2 + $0x388] sm:$0xff]  ;;  %v556_v55 = vadd.f32 %v2709_v54, %v2643_v0  ;;  %v564_v54 = vadd.f32 %v563_v12, %v2649_v17 }
  0xfb   :  { %1995 = vmatpush3.msra.mxu0 %v2821_v51  ;;  %2039 = vmatpush3.msra.mxu1 %v2823_v50  ;;  %3357 = vst [vmem:[#allocation97_spill] sm:$0xff] %v2841_v53  ;;  %v2849_v52 = vld [vmem:[#allocation2 + $0x208] sm:$0xff]  ;;  %v475_v50 = vadd.f32 %v474_v13, %v2649_v17  ;;  %v2856_v51 = vld [vmem:[#allocation2 + $0x280] sm:$0xff]  ;;  %v573_v13 = vpop.f32.mrf.mxu1 }
  0xfc   :  { %1996 = vmatprep.subr.mxu0 %v2827_v8  ;;  %2040 = vmatprep.subr.mxu1 %v2829_v56  ;;  %3358 = vst [vmem:[#allocation98_spill] sm:$0xff] %v2849_v52  ;;  %3359 = vst [vmem:[#allocation99_spill] sm:$0xff] %v2856_v51  ;;  %v2863_v56 = vld [vmem:[#allocation2 + $0x200] sm:$0xff]  ;;  %v1855_v12 = vld [vmem:[%s3163_s0 + $0x48] sm:$0xff] }
  0xfd   :  { %1997 = vmatpush3.msra.mxu0 %v2833_v59  ;;  %2041 = vmatpush3.msra.mxu1 %v2835_v58  ;;  %3361 = vst [vmem:[#allocation101_spill] sm:$0xff] %v2863_v56  ;;  %v2865_v8 = vld [vmem:[#allocation2 + $0x300] sm:$0xff]  ;;  %v582_v58 = vmax.f32 %v467_v3, 0.0  ;;  %v584_v59 = vmax.f32 %v556_v55, 0.0  ;;  %v593_v3 = vmax.f32 %v564_v54, 0.0  ;;  %v570_v55 = vadd.f32 %v569_v61, %v2669_v63  ;;  %v1856_v54 = vld [vmem:[%s3163_s0 + $0x50] sm:$0xff] }
  0xfe   :  { %1998 = vmatprep.subr.mxu0 %v2839_v10  ;;  %2042 = vmatprep.subr.mxu1 %v2841_v53  ;;  %3362 = vst [vmem:[#allocation102_spill] sm:$0xff] %v2865_v8  ;;  %v562_v53 = vadd.f32 %v2765_v1, %v2649_v17  ;;  %v591_v10 = vmax.f32 %v475_v50, 0.0  ;;  %v1857_v1 = vld [vmem:[%s3163_s0 + $0x58] sm:$0xff]  ;;  %v1859_v50 = vld [vmem:[%s3163_s0 + $0x68] sm:$0xff]  ;;  %v479_v61 = vadd.f32 %v2803_v5, %v2669_v63 }
  0xff   :  { %1999 = vmatpush3.msra.mxu0 %v2849_v52  ;;  %2043 = vmatpush3.msra.mxu1 %v2851_v57  ;;  %v481_v52 = vadd.f32 %v480_v4, %v2669_v63  ;;  %v575_v4 = vpop.f32.mrf.mxu1  ;;  %v485_v5 = vadd.f32 %v484_v7, %v2703_v18  ;;  %v1858_v7 = vld [vmem:[%s3163_s0 + $0x60] sm:$0xff] }
 0x100   :  { %2000 = vmatprep.subr.mxu0 %v2856_v51  ;;  %2044 = vmatprep.subr.mxu1 %v2858_v9  ;;  %v486_v9 = vpop.f32.mrf.mxu0 }
 0x101   :  { %2001 = vmatpush3.msra.mxu0 %v2863_v56  ;;  %2045 = vmatpush3.msra.mxu1 %v2865_v8  ;;  %v590_v8 = vmax.f32 %v473_v60, 0.0  ;;  %v599_v56 = vmax.f32 %v481_v52, 0.0  ;;  %v487_v51 = vadd.f32 %v486_v9, %v2703_v18  ;;  %v576_v60 = vadd.f32 %v575_v4, %v2703_v18 }
 0x102   :  { %845 = vmatmul.mubr.f32.vlgmr.msra.gmra.mxu0 %v582_v58  ;;  %930 = vmatmul.mubr.f32.vlgmr.msra.gmra.mxu1 %v584_v59  ;;  %v592_v59 = vmax.f32 %v562_v53, 0.0  ;;  %v568_v58 = vadd.f32 %v2811_v2, %v2669_v63  ;;  %v598_v53 = vmax.f32 %v479_v61, 0.0  ;;  %v574_v52 = vadd.f32 %v573_v13, %v2703_v18 }
 0x103   :  { %1024 = vmatprep.subr.mxu0 %v1855_v12  ;;  %849 = vmatprep.mubr.f32.mxu0 %v591_v10  ;;  %v1861_v10 = vld [vmem:[%s3163_s0 + $0x78] sm:$0xff]  ;;  %v601_v12 = vmax.f32 %v570_v55, 0.0  ;;  %v607_v9 = vmax.f32 %v487_v51, 0.0  ;;  %v1860_v51 = vld [vmem:[%s3163_s0 + $0x70] sm:$0xff] }
 0x104   :  { %934 = vmatprep.mubr.f32.mxu1 %v593_v3  ;;  %1025 = vmatpush1.msra.mxu0 %v1854_v62  ;;  %v600_v2 = vmax.f32 %v568_v58, 0.0  ;;  %v609_v62 = vmax.f32 %v576_v60, 0.0  ;;  %v606_v3 = vmax.f32 %v485_v5, 0.0  ;;  %v608_v55 = vmax.f32 %v574_v52, 0.0 }
 0x105   :  { %1113 = vmatprep.subr.mxu1 %v1857_v1  ;;  %1202 = vmatprep.subr.mxu0 %v1859_v50 }
 0x106   :  { %1114 = vmatpush1.msra.mxu1 %v1856_v54  ;;  %850 = vmatmul.mubr.f32.gmra.mxu0 %v590_v8  ;;  %v3363_v8 = vmov 0.0  }
 0x107   :  { %935 = vmatmul.mubr.f32.gmra.mxu1 %v592_v59  ;;  %854 = vmatprep.mubr.f32.mxu0 %v599_v56 }
 0x108   :  { %939 = vmatprep.mubr.f32.mxu1 %v601_v12  ;;  %1291 = vmatprep.subr.mxu1 %v1861_v10 }
 0x10a   :  { %855 = vmatmul.mubr.f32.gmra.mxu0 %v598_v53 }
 0x10b   :  { %940 = vmatmul.mubr.f32.gmra.mxu1 %v600_v2  ;;  %859 = vmatprep.mubr.f32.mxu0 %v607_v9 }
 0x10c   :  { %944 = vmatprep.mubr.f32.mxu1 %v609_v62 }
 0x10e   :  { %860 = vmatmul.mubr.f32.gmra.mxu0 %v606_v3 }
 0x10f   :  { %945 = vmatmul.mubr.f32.gmra.mxu1 %v608_v55  ;;  %1058 = vmatprep.mubr.f32.mxu0 %v3363_v8 }
 0x110   :  { %1147 = vmatprep.mubr.f32.mxu1 %v3363_v8 }
 0x112   :  { %1862 = vmatmul.mubr.msk.f32.vlgmr.msra.gmra.mxu0 %vm209_vm0, %v2358_v6 }
 0x113   :  { %1866 = vmatmul.mubr.msk.f32.vlgmr.msra.gmra.mxu1 %vm209_vm0, %v2358_v6  ;;  %1064 = vmatprep.mubr.f32.mxu0 %v3363_v8 }
 0x114   :  { %1153 = vmatprep.mubr.f32.mxu1 %v3363_v8  ;;  %1203 = vmatpush1.msra.mxu0 %v1858_v7 }
 0x115   :  { %1292 = vmatpush1.msra.mxu1 %v1860_v51  ;;  %2058 = vmatprep.subr.mxu0 %v2393_v14  ;;  %v3366_v14 = vld [vmem:[#allocation10_spill] sm:$0xff] }
 0x116   :  { %1863 = vmatmul.mubr.msk.f32.gmra.mxu0 %vm209_vm0, %v2381_v11  ;;  %2102 = vmatprep.subr.mxu1 %v2395_v15  ;;  %v3367_v15 = vld [vmem:[#allocation11_spill] sm:$0xff] }
 0x117   :  { %1867 = vmatmul.mubr.msk.f32.gmra.mxu1 %vm209_vm0, %v2381_v11  ;;  %1070 = vmatprep.mubr.f32.mxu0 %v3363_v8 }
 0x118   :  { %1159 = vmatprep.mubr.f32.mxu1 %v3363_v8 }
 0x11a   :  { %1864 = vmatmul.mubr.msk.f32.gmra.mxu0 %vm209_vm0, %v2402_v16 }
 0x11b   :  { %1868 = vmatmul.mubr.msk.f32.gmra.mxu1 %vm209_vm0, %v2402_v16  ;;  %1076 = vmatprep.mubr.f32.mxu0 %v3363_v8 }
 0x11c   :  { %1165 = vmatprep.mubr.f32.mxu1 %v3363_v8 }
 0x11e   :  { %1865 = vmatmul.mubr.msk.f32.gmra.mxu0 %vm209_vm0, %v2421_v19 }
 0x11f   :  { %1869 = vmatmul.mubr.msk.f32.gmra.mxu1 %vm209_vm0, %v2421_v19  ;;  %1236 = vmatprep.mubr.f32.mxu0 %v3363_v8 }
 0x120   :  { %1325 = vmatprep.mubr.f32.mxu1 %v3363_v8 }
 0x122   :  { %1870 = vmatmul.mubr.msk.f32.vlgmr.msra.gmra.mxu0 %vm209_vm0, %v2358_v6 }
 0x123   :  { %1874 = vmatmul.mubr.msk.f32.vlgmr.msra.gmra.mxu1 %vm209_vm0, %v2358_v6  ;;  %1242 = vmatprep.mubr.f32.mxu0 %v3363_v8  ;;  %v3364_v6 = vld [vmem:[#allocation8_spill] sm:$0xff] }
 0x124   :  { %1331 = vmatprep.mubr.f32.mxu1 %v3363_v8  ;;  %2059 = vmatpush3.msra.mxu0 %v2429_v20  ;;  %v3370_v20 = vld [vmem:[#allocation14_spill] sm:$0xff] }
 0x125   :  { %2103 = vmatpush3.msra.mxu1 %v2431_v21  ;;  %2060 = vmatprep.subr.mxu0 %v2437_v22  ;;  %v3371_v21 = vld [vmem:[#allocation15_spill] sm:$0xff]  ;;  %v3372_v22 = vld [vmem:[#allocation16_spill] sm:$0xff] }
 0x126   :  { %1871 = vmatmul.mubr.msk.f32.gmra.mxu0 %vm209_vm0, %v2381_v11  ;;  %2104 = vmatprep.subr.mxu1 %v2439_v23  ;;  %v3373_v23 = vld [vmem:[#allocation17_spill] sm:$0xff] }
 0x127   :  { %1875 = vmatmul.mubr.msk.f32.gmra.mxu1 %vm209_vm0, %v2381_v11  ;;  %1248 = vmatprep.mubr.f32.mxu0 %v3363_v8  ;;  %v3365_v11 = vld [vmem:[#allocation9_spill] sm:$0xff] }
 0x128   :  { %1337 = vmatprep.mubr.f32.mxu1 %v3363_v8  ;;  %2061 = vmatpush3.msra.mxu0 %v2447_v24  ;;  %v3374_v24 = vld [vmem:[#allocation18_spill] sm:$0xff] }
 0x129   :  { %2105 = vmatpush3.msra.mxu1 %v2449_v25  ;;  %2062 = vmatprep.subr.mxu0 %v2455_v26  ;;  %v3375_v25 = vld [vmem:[#allocation19_spill] sm:$0xff]  ;;  %v3376_v26 = vld [vmem:[#allocation20_spill] sm:$0xff] }
 0x12a   :  { %1872 = vmatmul.mubr.msk.f32.gmra.mxu0 %vm209_vm0, %v2402_v16  ;;  %2106 = vmatprep.subr.mxu1 %v2457_v27  ;;  %v3377_v27 = vld [vmem:[#allocation21_spill] sm:$0xff] }
 0x12b   :  { %1876 = vmatmul.mubr.msk.f32.gmra.mxu1 %vm209_vm0, %v2402_v16  ;;  %1254 = vmatprep.mubr.f32.mxu0 %v3363_v8  ;;  %v3368_v16 = vld [vmem:[#allocation12_spill] sm:$0xff] }
 0x12c   :  { %1343 = vmatprep.mubr.f32.mxu1 %v3363_v8  ;;  %2063 = vmatpush3.msra.mxu0 %v2465_v28  ;;  %v3378_v28 = vld [vmem:[#allocation22_spill] sm:$0xff] }
 0x12d   :  { %2107 = vmatpush3.msra.mxu1 %v2467_v29  ;;  %2064 = vmatprep.subr.mxu0 %v2473_v30  ;;  %v3379_v29 = vld [vmem:[#allocation23_spill] sm:$0xff]  ;;  %v3380_v30 = vld [vmem:[#allocation24_spill] sm:$0xff] }
 0x12e   :  { %1873 = vmatmul.mubr.msk.f32.gmra.mxu0 %vm209_vm0, %v2421_v19  ;;  %2108 = vmatprep.subr.mxu1 %v2475_v31  ;;  %v3381_v31 = vld [vmem:[#allocation25_spill] sm:$0xff] }
 0x12f   :  { %1877 = vmatmul.mubr.msk.f32.gmra.mxu1 %vm209_vm0, %v2421_v19  ;;  %2065 = vmatpush3.msra.mxu0 %v2481_v32  ;;  %v3369_v19 = vld [vmem:[#allocation13_spill] sm:$0xff]  ;;  %v3382_v32 = vld [vmem:[#allocation26_spill] sm:$0xff] }
 0x130   :  { %2109 = vmatpush3.msra.mxu1 %v2483_v33  ;;  %2066 = vmatprep.subr.mxu0 %v2487_v34  ;;  %v3383_v33 = vld [vmem:[#allocation27_spill] sm:$0xff]  ;;  %v3384_v34 = vld [vmem:[#allocation28_spill] sm:$0xff] }
 0x131   :  { %2110 = vmatprep.subr.mxu1 %v2489_v35  ;;  %2067 = vmatpush3.msra.mxu0 %v2495_v36  ;;  %v3385_v35 = vld [vmem:[#allocation29_spill] sm:$0xff]  ;;  %v3386_v36 = vld [vmem:[#allocation30_spill] sm:$0xff] }
 0x132   :  { %2111 = vmatpush3.msra.mxu1 %v2497_v37  ;;  %2068 = vmatprep.subr.mxu0 %v2501_v38  ;;  %v3387_v37 = vld [vmem:[#allocation31_spill] sm:$0xff]  ;;  %v3388_v38 = vld [vmem:[#allocation32_spill] sm:$0xff] }
 0x133   :  { %2112 = vmatprep.subr.mxu1 %v2503_v39  ;;  %2069 = vmatpush3.msra.mxu0 %v2507_v40  ;;  %v3389_v39 = vld [vmem:[#allocation33_spill] sm:$0xff]  ;;  %v3390_v40 = vld [vmem:[#allocation34_spill] sm:$0xff] }
 0x134   :  { %2113 = vmatpush3.msra.mxu1 %v2509_v41  ;;  %2070 = vmatprep.subr.mxu0 %v2513_v42  ;;  %v3391_v41 = vld [vmem:[#allocation35_spill] sm:$0xff]  ;;  %v3392_v42 = vld [vmem:[#allocation36_spill] sm:$0xff] }
 0x135   :  { %2114 = vmatprep.subr.mxu1 %v2515_v43  ;;  %2071 = vmatpush3.msra.mxu0 %v2519_v44  ;;  %v3393_v43 = vld [vmem:[#allocation37_spill] sm:$0xff]  ;;  %v3394_v44 = vld [vmem:[#allocation38_spill] sm:$0xff] }
 0x136   :  { %2115 = vmatpush3.msra.mxu1 %v2521_v45  ;;  %2072 = vmatprep.subr.mxu0 %v2525_v46  ;;  %v3395_v45 = vld [vmem:[#allocation39_spill] sm:$0xff]  ;;  %v3396_v46 = vld [vmem:[#allocation40_spill] sm:$0xff] }
 0x137   :  { %2116 = vmatprep.subr.mxu1 %v2527_v47  ;;  %2073 = vmatpush3.msra.mxu0 %v2531_v48  ;;  %v3397_v47 = vld [vmem:[#allocation41_spill] sm:$0xff] }
 0x138   :  { %2117 = vmatpush3.msra.mxu1 %v2533_v49  ;;  %2074 = vmatprep.subr.mxu0 %v3364_v6 }
 0x139   :  { %2118 = vmatprep.subr.mxu1 %v3365_v11  ;;  %2075 = vmatpush3.msra.mxu0 %v3366_v14 }
 0x13a   :  { %2119 = vmatpush3.msra.mxu1 %v3367_v15  ;;  %2076 = vmatprep.subr.mxu0 %v3368_v16 }
 0x13b   :  { %2120 = vmatprep.subr.mxu1 %v3369_v19  ;;  %2077 = vmatpush3.msra.mxu0 %v3370_v20 }
 0x13c   :  { %2121 = vmatpush3.msra.mxu1 %v3371_v21  ;;  %2078 = vmatprep.subr.mxu0 %v3372_v22 }
 0x13d   :  { %2122 = vmatprep.subr.mxu1 %v3373_v23  ;;  %2079 = vmatpush3.msra.mxu0 %v3374_v24 }
 0x13e   :  { %2123 = vmatpush3.msra.mxu1 %v3375_v25  ;;  %2080 = vmatprep.subr.mxu0 %v3376_v26 }
 0x13f   :  { %2124 = vmatprep.subr.mxu1 %v3377_v27  ;;  %2081 = vmatpush3.msra.mxu0 %v3378_v28 }
 0x140   :  { %2125 = vmatpush3.msra.mxu1 %v3379_v29  ;;  %2082 = vmatprep.subr.mxu0 %v3380_v30 }
 0x141   :  { %2126 = vmatprep.subr.mxu1 %v3381_v31  ;;  %2083 = vmatpush3.msra.mxu0 %v3382_v32 }
 0x142   :  { %2127 = vmatpush3.msra.mxu1 %v3383_v33  ;;  %2084 = vmatprep.subr.mxu0 %v3384_v34 }
 0x143   :  { %2128 = vmatprep.subr.mxu1 %v3385_v35  ;;  %2085 = vmatpush3.msra.mxu0 %v3386_v36 }
 0x144   :  { %2129 = vmatpush3.msra.mxu1 %v3387_v37  ;;  %2086 = vmatprep.subr.mxu0 %v3388_v38 }
 0x145   :  { %2130 = vmatprep.subr.mxu1 %v3389_v39  ;;  %2087 = vmatpush3.msra.mxu0 %v3390_v40 }
 0x146   :  { %2131 = vmatpush3.msra.mxu1 %v3391_v41  ;;  %2088 = vmatprep.subr.mxu0 %v3392_v42 }
 0x147   :  { %2132 = vmatprep.subr.mxu1 %v3393_v43  ;;  %2089 = vmatpush3.msra.mxu0 %v3394_v44 }
 0x148   :  { %2133 = vmatpush3.msra.mxu1 %v3395_v45  ;;  %2146 = vmatprep.subr.mxu0 %v3396_v46 }
 0x149   :  { %2190 = vmatprep.subr.mxu1 %v3397_v47 }
 0x19b   :  { %v1914_v48 = vpop.f32.mrf.mxu0  ;;  %v1958_v49 = vpop.f32.mrf.mxu1 }
 0x19d   :  { %v1915_v56 = vpop.f32.mrf.mxu0  ;;  %v1959_v13 = vpop.f32.mrf.mxu1 }
 0x19e   :  { %v1916_v8 = vadd.f32 %v1915_v56, %v1914_v48  ;;  %v1960_v7 = vadd.f32 %v1959_v13, %v1958_v49 }
 0x1a0   :  { %v762_v15 = vadd.f32 %v1960_v7, %v1916_v8 }
 0x1a1   :  { %v1917_v1 = vpop.f32.mrf.mxu0  ;;  %v1961_v50 = vpop.f32.mrf.mxu1 }
 0x1a3   :  { %v1918_v4 = vpop.f32.mrf.mxu0  ;;  %v1962_v54 = vpop.f32.mrf.mxu1 }
 0x1a4   :  { %v1919_v16 = vadd.f32 %v1918_v4, %v1917_v1  ;;  %v1963_v19 = vadd.f32 %v1962_v54, %v1961_v50 }
 0x1a6   :  { %v767_v26 = vadd.f32 %v1963_v19, %v1919_v16  ;;  %v3399_v16 = vld [vmem:[#allocation43_spill] sm:$0xff]  ;;  %v3400_v19 = vld [vmem:[#allocation44_spill] sm:$0xff] }
 0x1a9   :  { %v1920_v61 = vpop.f32.mrf.mxu0  ;;  %v1964_v59 = vpop.f32.mrf.mxu1 }
 0x1ab   :  { %v1921_v58 = vpop.f32.mrf.mxu0  ;;  %v1965_v10 = vpop.f32.mrf.mxu1 }
 0x1ac   :  { %v1922_v12 = vadd.f32 %v1921_v58, %v1920_v61  ;;  %v1966_v60 = vadd.f32 %v1965_v10, %v1964_v59 }
 0x1ae   :  { %v772_v53 = vadd.f32 %v1966_v60, %v1922_v12 }
 0x1af   :  { %v1923_v5 = vpop.f32.mrf.mxu0  ;;  %v1967_v2 = vpop.f32.mrf.mxu1 }
 0x1b1   :  { %v1924_v52 = vpop.f32.mrf.mxu0  ;;  %v1968_v9 = vpop.f32.mrf.mxu1 }
 0x1b2   :  { %v1925_v62 = vadd.f32 %v1924_v52, %v1923_v5  ;;  %v1969_v3 = vadd.f32 %v1968_v9, %v1967_v2 }
 0x1b4   :  { %v777_v55 = vadd.f32 %v1969_v3, %v1925_v62 }
 0x1c2   :  { %v2002_v51 = vpop.f32.mrf.mxu0  ;;  %v2046_v6 = vpop.f32.mrf.mxu1 }
 0x1c4   :  { %v2003_v11 = vpop.f32.mrf.mxu0  ;;  %v2047_v14 = vpop.f32.mrf.mxu1 }
 0x1c5   :  { %v2004_v20 = vadd.f32 %v2003_v11, %v2002_v51  ;;  %v2048_v23 = vadd.f32 %v2047_v14, %v2046_v6  ;;  %v3398_v14 = vld [vmem:[#allocation42_spill] sm:$0xff] }
 0x1c6   :  { %v2005_v21 = vpop.f32.mrf.mxu0 }
 0x1c7   :  { %v847_v22 = vadd.f32 %v2004_v20, %v762_v15  ;;  %v2049_v24 = vpop.f32.mrf.mxu1 }
 0x1c8   :  { %v2006_v25 = vpop.f32.mrf.mxu0 }
 0x1c9   :  { %v2007_v27 = vadd.f32 %v2006_v25, %v2005_v21  ;;  %v2050_v28 = vpop.f32.mrf.mxu1  ;;  %v932_v29 = vadd.f32 %v2048_v23, %v847_v22  ;;  %v3401_v21 = vld [vmem:[#allocation45_spill] sm:$0xff] }
 0x1ca   :  { %v2008_v30 = vpop.f32.mrf.mxu0  ;;  %v2051_v32 = vadd.f32 %v2050_v28, %v2049_v24  ;;  %v3402_v24 = vld [vmem:[#allocation46_spill] sm:$0xff] }
 0x1cb   :  { %v852_v31 = vadd.f32 %v2007_v27, %v767_v26  ;;  %v2052_v33 = vpop.f32.mrf.mxu1  ;;  %959 = vadd.xlane.f32.xlu0 %v932_v29  ;;  %v3403_v27 = vld [vmem:[#allocation47_spill] sm:$0xff] }
 0x1cc   :  { %v2009_v34 = vpop.f32.mrf.mxu0 }
 0x1cd   :  { %v2010_v35 = vadd.f32 %v2009_v34, %v2008_v30  ;;  %v2053_v36 = vpop.f32.mrf.mxu1  ;;  %v937_v37 = vadd.f32 %v2051_v32, %v852_v31  ;;  %v3404_v30 = vld [vmem:[#allocation48_spill] sm:$0xff]  ;;  %v3405_v34 = vld [vmem:[#allocation49_spill] sm:$0xff] }
 0x1ce   :  { %v2054_v38 = vadd.f32 %v2053_v36, %v2052_v33  ;;  %v2011_v39 = vpop.f32.mrf.mxu0 }
 0x1cf   :  { %v857_v40 = vadd.f32 %v2010_v35, %v772_v53  ;;  %v2055_v41 = vpop.f32.mrf.mxu1  ;;  %961 = vadd.xlane.f32.xlu0 %v937_v37  ;;  %v950_v42 = vadd.f32 %v937_v37, %v932_v29 }
 0x1d0   :  { %v2012_v43 = vpop.f32.mrf.mxu0 }
 0x1d1   :  { %v2013_v44 = vadd.f32 %v2012_v43, %v2011_v39  ;;  %v2056_v45 = vpop.f32.mrf.mxu1  ;;  %v3025_v46 = vadd.f32 %v2054_v38, %v857_v40  ;;  %v3406_v38 = vld [vmem:[#allocation50_spill] sm:$0xff]  ;;  %v3407_v40 = vld [vmem:[#allocation51_spill] sm:$0xff] }
 0x1d2   :  { %v2057_v47 = vadd.f32 %v2056_v45, %v2055_v41  ;;  %v1060_v48 = vpop.f32.mrf.mxu0  ;;  %v3408_v41 = vld [vmem:[#allocation52_spill] sm:$0xff] }
 0x1d3   :  { %v862_v49 = vadd.f32 %v2013_v44, %v777_v55  ;;  %v1149_v56 = vpop.f32.mrf.mxu1  ;;  %v951_v13 = vadd.f32 %v950_v42, %v3025_v46  ;;  %v1061_v1 = vadd.f32 %v1060_v48, %v2643_v0  ;;  %v3409_v44 = vld [vmem:[#allocation53_spill] sm:$0xff] }
 0x1d4   :  { %v1062_v50 = vpop.f32.mrf.mxu0  ;;  %v1150_v4 = vadd.f32 %v1149_v56, %v2643_v0  ;;  %v3411_v56 = vld [vmem:[#allocation55_spill] sm:$0xff] }
 0x1d5   :  { %v1063_v54 = vadd.f32 %v1062_v50, %v2643_v0  ;;  %v1151_v61 = vpop.f32.mrf.mxu1  ;;  %v3031_v59 = vadd.f32 %v2057_v47, %v862_v49  ;;  %v1350_v5 = vmax.f32 %v1061_v1, 0.0  ;;  %v3410_v47 = vld [vmem:[#allocation54_spill] sm:$0xff]  ;;  %v3412_v1 = vld [vmem:[#allocation56_spill] sm:$0xff] }
 0x1d6   :  { %v1152_v58 = vadd.f32 %v1151_v61, %v2643_v0  ;;  %v1066_v10 = vpop.f32.mrf.mxu0  ;;  %v1352_v9 = vmax.f32 %v1150_v4, 0.0 }
 0x1d7   :  { %v1351_v12 = vmax.f32 %v1063_v54, 0.0  ;;  %v1155_v60 = vpop.f32.mrf.mxu1  ;;  %v3035_v53 = vadd.f32 %v951_v13, %v3031_v59  ;;  %v1067_v55 = vadd.f32 %v1066_v10, %v2649_v17  ;;  %v3413_v54 = vld [vmem:[#allocation57_spill] sm:$0xff] }
 0x1d8   :  { %v1353_v2 = vmax.f32 %v1152_v58, 0.0  ;;  %v1068_v52 = vpop.f32.mrf.mxu0  ;;  %v1156_v51 = vadd.f32 %v1155_v60, %v2649_v17 }
 0x1d9   :  { %v1069_v62 = vadd.f32 %v1068_v52, %v2649_v17  ;;  %v1157_v3 = vpop.f32.mrf.mxu1  ;;  %1446 = vmatprep.mubr.f32.mxu0 %v1351_v12  ;;  %v1358_v25 = vmax.f32 %v1067_v55, 0.0  ;;  %v3414_v12 = vld [vmem:[#allocation58_spill] sm:$0xff]  ;;  %v3417_v52 = vld [vmem:[#allocation61_spill] sm:$0xff] }
 0x1da   :  { %v1158_v8 = vadd.f32 %v1157_v3, %v2649_v17  ;;  %1531 = vmatprep.mubr.f32.mxu1 %v1353_v2  ;;  %v1072_v7 = vpop.f32.mrf.mxu0  ;;  %1447 = vmatmul.mubr.f32.vlgmr.msra.gmra.mxu0 %v1350_v5  ;;  %v1360_v29 = vmax.f32 %v1156_v51, 0.0  ;;  %v3415_v5 = vld [vmem:[#allocation59_spill] sm:$0xff]  ;;  %v3416_v2 = vld [vmem:[#allocation60_spill] sm:$0xff] }
 0x1db   :  { %v1359_v6 = vmax.f32 %v1069_v62, 0.0  ;;  %v1161_v11 = vpop.f32.mrf.mxu1  ;;  %1532 = vmatmul.mubr.f32.vlgmr.msra.gmra.mxu1 %v1352_v9  ;;  %2147 = vmatpush3.msra.mxu0 %v3398_v14  ;;  %v1073_v32 = vadd.f32 %v1072_v7, %v2669_v63  ;;  %v3418_v62 = vld [vmem:[#allocation62_spill] sm:$0xff]  ;;  %v3420_v51 = vld [vmem:[#allocation64_spill] sm:$0xff] }
 0x1dc   :  { %v1361_v15 = vmax.f32 %v1158_v8, 0.0  ;;  %2191 = vmatpush3.msra.mxu1 %v3399_v16  ;;  %2148 = vmatprep.subr.mxu0 %v3400_v19  ;;  %v1074_v20 = vpop.f32.mrf.mxu0  ;;  %v1162_v36 = vadd.f32 %v1161_v11, %v2669_v63  ;;  %v3419_v8 = vld [vmem:[#allocation63_spill] sm:$0xff] }
 0x1dd   :  { %2192 = vmatprep.subr.mxu1 %v3401_v21  ;;  %v1075_v22 = vadd.f32 %v1074_v20, %v2669_v63  ;;  %v1163_v23 = vpop.f32.mrf.mxu1  ;;  %2149 = vmatpush3.msra.mxu0 %v3402_v24  ;;  %v1366_v49 = vmax.f32 %v1073_v32, 0.0  ;;  %v3423_v20 = vld [vmem:[#allocation67_spill] sm:$0xff]  ;;  %v3424_v21 = vld [vmem:[#allocation68_spill] sm:$0xff]  ;;  %v3433_v32 = vld [vmem:[#allocation77_spill] sm:$0xff] }
 0x1de   :  { %v1164_v26 = vadd.f32 %v1163_v23, %v2669_v63  ;;  %2193 = vmatpush3.msra.mxu1 %v3403_v27  ;;  %1451 = vmatprep.mubr.f32.mxu0 %v1359_v6  ;;  %v1078_v28 = vpop.f32.mrf.mxu0  ;;  %v1368_v13 = vmax.f32 %v1162_v36, 0.0  ;;  %v3421_v6 = vld [vmem:[#allocation65_spill] sm:$0xff]  ;;  %v3426_v23 = vld [vmem:[#allocation70_spill] sm:$0xff]  ;;  %v3427_v24 = vld [vmem:[#allocation71_spill] sm:$0xff] }
 0x1df   :  { %1536 = vmatprep.mubr.f32.mxu1 %v1361_v15  ;;  %2150 = vmatprep.subr.mxu0 %v3404_v30  ;;  %v1167_v31 = vpop.f32.mrf.mxu1  ;;  %v1367_v33 = vmax.f32 %v1075_v22, 0.0  ;;  %v1079_v50 = vadd.f32 %v1078_v28, %v2703_v18  ;;  %v3422_v15 = vld [vmem:[#allocation66_spill] sm:$0xff]  ;;  %v3425_v22 = vld [vmem:[#allocation69_spill] sm:$0xff]  ;;  %v3431_v30 = vld [vmem:[#allocation75_spill] sm:$0xff] }
 0x1e0   :  { %2194 = vmatprep.subr.mxu1 %v3405_v34  ;;  %1452 = vmatmul.mubr.f32.gmra.mxu0 %v1358_v25  ;;  %v1080_v35 = vpop.f32.mrf.mxu0  ;;  %v1369_v37 = vmax.f32 %v1164_v26, 0.0  ;;  %v1168_v58 = vadd.f32 %v1167_v31, %v2703_v18  ;;  %v3428_v25 = vld [vmem:[#allocation72_spill] sm:$0xff]  ;;  %v3429_v27 = vld [vmem:[#allocation73_spill] sm:$0xff] }
 0x1e1   :  { %1537 = vmatmul.mubr.f32.gmra.mxu1 %v1360_v29  ;;  %2151 = vmatpush3.msra.mxu0 %v3406_v38  ;;  %v1169_v39 = vpop.f32.mrf.mxu1  ;;  %v1081_v42 = vadd.f32 %v1080_v35, %v2703_v18  ;;  %v1374_v3 = vmax.f32 %v1079_v50, 0.0  ;;  %v3430_v29 = vld [vmem:[#allocation74_spill] sm:$0xff]  ;;  %v3432_v31 = vld [vmem:[#allocation76_spill] sm:$0xff]  ;;  %v3435_v35 = vld [vmem:[#allocation79_spill] sm:$0xff] }
 0x1e2   :  { %2195 = vmatpush3.msra.mxu1 %v3407_v40  ;;  %2152 = vmatprep.subr.mxu0 %v3408_v41  ;;  %v3057_v43 = vpop.f32.mrf.mxu0  ;;  %v1170_v45 = vadd.f32 %v1169_v39, %v2703_v18  ;;  %v1376_v7 = vmax.f32 %v1168_v58, 0.0  ;;  %v3436_v36 = vld [vmem:[#allocation80_spill] sm:$0xff]  ;;  %v3437_v38 = vld [vmem:[#allocation81_spill] sm:$0xff]  ;;  %v3438_v39 = vld [vmem:[#allocation82_spill] sm:$0xff] }
 0x1e3   :  { %2196 = vmatprep.subr.mxu1 %v3409_v44  ;;  %2153 = vmatpush3.msra.mxu0 %v3410_v47  ;;  %v3062_v48 = vpop.f32.mrf.mxu1  ;;  %v1375_v4 = vmax.f32 %v1081_v42, 0.0  ;;  %v3439_v40 = vld [vmem:[#allocation83_spill] sm:$0xff]  ;;  %v3440_v41 = vld [vmem:[#allocation84_spill] sm:$0xff]  ;;  %v3441_v42 = vld [vmem:[#allocation85_spill] sm:$0xff]  ;;  %v1239_v50 = vadd.f32 %v3057_v43, %v2643_v0 }
 0x1e4   :  { %2197 = vmatpush3.msra.mxu1 %v3411_v56  ;;  %1456 = vmatprep.mubr.f32.mxu0 %v1367_v33  ;;  %v1240_v61 = vpop.f32.mrf.mxu0  ;;  %v1377_v10 = vmax.f32 %v1170_v45, 0.0  ;;  %v3434_v33 = vld [vmem:[#allocation78_spill] sm:$0xff]  ;;  %v3443_v47 = vld [vmem:[#allocation87_spill] sm:$0xff] }
 0x1e5   :  { %1541 = vmatprep.mubr.f32.mxu1 %v1369_v37  ;;  %2154 = vmatprep.subr.mxu0 %v3412_v1  ;;  %v1329_v60 = vpop.f32.mrf.mxu1  ;;  %v1241_v9 = vadd.f32 %v1240_v61, %v2643_v0  ;;  %v3442_v44 = vld [vmem:[#allocation86_spill] sm:$0xff]  ;;  %v1328_v61 = vadd.f32 %v3062_v48, %v2643_v0  ;;  %v3455_v48 = vld [vmem:[#allocation99_spill] sm:$0xff] }
 0x1e6   :  { %2198 = vmatprep.subr.mxu1 %v3413_v54  ;;  %1457 = vmatmul.mubr.f32.gmra.mxu0 %v1366_v49  ;;  %v1330_v55 = vadd.f32 %v1329_v60, %v2643_v0  ;;  %v1244_v14 = vpop.f32.mrf.mxu0  ;;  %v3444_v49 = vld [vmem:[#allocation88_spill] sm:$0xff]  ;;  %v3446_v1 = vld [vmem:[#allocation90_spill] sm:$0xff] }
 0x1e7   :  { %1542 = vmatmul.mubr.f32.gmra.mxu1 %v1368_v13  ;;  %2155 = vmatpush3.msra.mxu0 %v3414_v12  ;;  %v1355_v11 = vmax.f32 %v1241_v9, 0.0  ;;  %v1333_v19 = vpop.f32.mrf.mxu1  ;;  %v3445_v13 = vld [vmem:[#allocation89_spill] sm:$0xff]  ;;  %v3448_v54 = vld [vmem:[#allocation92_spill] sm:$0xff]  ;;  %v3450_v12 = vld [vmem:[#allocation94_spill] sm:$0xff]  ;;  %v1245_v0 = vadd.f32 %v1244_v14, %v2649_v17 }
 0x1e8   :  { %2199 = vmatpush3.msra.mxu1 %v3415_v5  ;;  %2156 = vmatprep.subr.mxu0 %v3416_v2  ;;  %v1357_v16 = vmax.f32 %v1330_v55, 0.0  ;;  %v1246_v26 = vpop.f32.mrf.mxu0  ;;  %v3451_v2 = vld [vmem:[#allocation95_spill] sm:$0xff]  ;;  %v3453_v9 = vld [vmem:[#allocation97_spill] sm:$0xff]  ;;  %v1356_v55 = vmax.f32 %v1328_v61, 0.0 }
 0x1e9   :  { %2200 = vmatprep.subr.mxu1 %v3417_v52  ;;  %2157 = vmatpush3.msra.mxu0 %v3418_v62  ;;  %v1335_v28 = vpop.f32.mrf.mxu1  ;;  %v1247_v58 = vadd.f32 %v1246_v26, %v2649_v17  ;;  %v3452_v52 = vld [vmem:[#allocation96_spill] sm:$0xff]  ;;  %v3454_v62 = vld [vmem:[#allocation98_spill] sm:$0xff]  ;;  %v1362_v14 = vmax.f32 %v1245_v0, 0.0 }
 0x1ea   :  { %2201 = vmatpush3.msra.mxu1 %v3419_v8  ;;  %1461 = vmatprep.mubr.f32.mxu0 %v1375_v4  ;;  %v1250_v34 = vpop.f32.mrf.mxu0  ;;  %v3447_v4 = vld [vmem:[#allocation91_spill] sm:$0xff]  ;;  %v1336_v60 = vadd.f32 %v1335_v28, %v2649_v17  ;;  %v1334_v8 = vadd.f32 %v1333_v19, %v2649_v17 }
 0x1eb   :  { %1546 = vmatprep.mubr.f32.mxu1 %v1377_v10  ;;  %2158 = vmatprep.subr.mxu0 %v3420_v51  ;;  %v1339_v37 = vpop.f32.mrf.mxu1  ;;  %v3449_v10 = vld [vmem:[#allocation93_spill] sm:$0xff]  ;;  %v1251_v17 = vadd.f32 %v1250_v34, %v2669_v63 }
 0x1ec   :  { %2202 = vmatprep.subr.mxu1 %v3421_v6  ;;  %1462 = vmatmul.mubr.f32.gmra.mxu0 %v1374_v3  ;;  %v1252_v45 = vpop.f32.mrf.mxu0  ;;  %v1354_v3 = vmax.f32 %v1239_v50, 0.0  ;;  %v3456_v6 = vld [vmem:[#allocation100_spill] sm:$0xff]  ;;  %v1364_v19 = vmax.f32 %v1334_v8, 0.0 }
 0x1ed   :  { %1547 = vmatmul.mubr.f32.gmra.mxu1 %v1376_v7  ;;  %2159 = vmatpush3.msra.mxu0 %v3422_v15  ;;  %v1341_v56 = vpop.f32.mrf.mxu1  ;;  %v1363_v7 = vmax.f32 %v1247_v58, 0.0  ;;  %v1253_v51 = vadd.f32 %v1252_v45, %v2669_v63  ;;  %v1365_v15 = vmax.f32 %v1336_v60, 0.0 }
 0x1ee   :  { %2203 = vmatpush3.msra.mxu1 %v3423_v20  ;;  %2160 = vmatprep.subr.mxu0 %v3424_v21  ;;  %v1256_v5 = vpop.f32.mrf.mxu0  ;;  %v3458_v21 = vld [vmem:[#allocation102_spill] sm:$0xff] }
 0x1ef   :  { %2204 = vmatprep.subr.mxu1 %v3425_v22  ;;  %2161 = vmatpush3.msra.mxu0 %v3426_v23  ;;  %v1345_v43 = vpop.f32.mrf.mxu1  ;;  %v1340_v22 = vadd.f32 %v1339_v37, %v2669_v63  ;;  %v1371_v23 = vmax.f32 %v1253_v51, 0.0  ;;  %v1257_v28 = vadd.f32 %v1256_v5, %v2703_v18 }
 0x1f0   :  { %2205 = vmatpush3.msra.mxu1 %v3427_v24  ;;  %2162 = vmatprep.subr.mxu0 %v3428_v25  ;;  %v1258_v20 = vpop.f32.mrf.mxu0 }
 0x1f1   :  { %1616 = vmatprep.mubr.f32.mxu0 %v1355_v11  ;;  %2206 = vmatprep.subr.mxu1 %v3429_v27  ;;  %v3457_v11 = vld [vmem:[#allocation101_spill] sm:$0xff]  ;;  %v1259_v24 = vadd.f32 %v1258_v20, %v2703_v18  ;;  %v1370_v27 = vmax.f32 %v1251_v17, 0.0 }
 0x1f2   :  { %1701 = vmatprep.mubr.f32.mxu1 %v1357_v16  ;;  %2163 = vmatpush3.msra.mxu0 %v3430_v29  ;;  %v1342_v16 = vadd.f32 %v1341_v56, %v2669_v63  ;;  %v1372_v29 = vmax.f32 %v1340_v22, 0.0  ;;  %v1378_v63 = vmax.f32 %v1257_v28, 0.0 }
 0x1f3   :  { %2207 = vmatpush3.msra.mxu1 %v3431_v30  ;;  %2164 = vmatprep.subr.mxu0 %v3432_v31  ;;  %v1346_v30 = vadd.f32 %v1345_v43, %v2703_v18  ;;  %v1379_v31 = vmax.f32 %v1259_v24, 0.0 }
 0x1f4   :  { %2208 = vmatprep.subr.mxu1 %v3433_v32  ;;  %2165 = vmatpush3.msra.mxu0 %v3434_v33  ;;  %v1373_v25 = vmax.f32 %v1342_v16, 0.0 }
 0x1f5   :  { %2209 = vmatpush3.msra.mxu1 %v3435_v35  ;;  %2166 = vmatprep.subr.mxu0 %v3436_v36  ;;  %v1380_v33 = vmax.f32 %v1346_v30, 0.0 }
 0x1f6   :  { %2210 = vmatprep.subr.mxu1 %v3437_v38  ;;  %2167 = vmatpush3.msra.mxu0 %v3438_v39 }
 0x1f7   :  { %2211 = vmatpush3.msra.mxu1 %v3439_v40  ;;  %2168 = vmatprep.subr.mxu0 %v3440_v41 }
 0x1f8   :  { %2212 = vmatprep.subr.mxu1 %v3441_v42  ;;  %2169 = vmatpush3.msra.mxu0 %v3442_v44 }
 0x1f9   :  { %2213 = vmatpush3.msra.mxu1 %v3443_v47  ;;  %2170 = vmatprep.subr.mxu0 %v3444_v49 }
 0x1fa   :  { %2214 = vmatprep.subr.mxu1 %v3445_v13  ;;  %2171 = vmatpush3.msra.mxu0 %v3446_v1 }
 0x1fb   :  { %2215 = vmatpush3.msra.mxu1 %v3447_v4  ;;  %2172 = vmatprep.subr.mxu0 %v3448_v54 }
 0x1fc   :  { %2216 = vmatprep.subr.mxu1 %v3449_v10  ;;  %2173 = vmatpush3.msra.mxu0 %v3450_v12 }
 0x1fd   :  { %2217 = vmatpush3.msra.mxu1 %v3451_v2  ;;  %2174 = vmatprep.subr.mxu0 %v3452_v52 }
 0x1fe   :  { %2218 = vmatprep.subr.mxu1 %v3453_v9  ;;  %2175 = vmatpush3.msra.mxu0 %v3454_v62 }
 0x1ff   :  { %2219 = vmatpush3.msra.mxu1 %v2851_v57  ;;  %2176 = vmatprep.subr.mxu0 %v3455_v48  ;;  %v1347_v57 = vpop.f32.mrf.mxu1 }
 0x200   :  { %2220 = vmatprep.subr.mxu1 %v3456_v6  ;;  %2177 = vmatpush3.msra.mxu0 %v3457_v11  ;;  %v1348_v26 = vadd.f32 %v1347_v57, %v2703_v18 }
 0x201   :  { %2221 = vmatpush3.msra.mxu1 %v3458_v21  ;;  %1617 = vmatmul.mubr.f32.vlgmr.msra.gmra.mxu0 %v1354_v3 }
 0x202   :  { %1702 = vmatmul.mubr.f32.vlgmr.msra.gmra.mxu1 %v1356_v55  ;;  %1621 = vmatprep.mubr.f32.mxu0 %v1363_v7  ;;  %v1381_v32 = vmax.f32 %v1348_v26, 0.0 }
 0x203   :  { %1706 = vmatprep.mubr.f32.mxu1 %v1365_v15 }
 0x205   :  { %1622 = vmatmul.mubr.f32.gmra.mxu0 %v1362_v14 }
 0x206   :  { %1707 = vmatmul.mubr.f32.gmra.mxu1 %v1364_v19  ;;  %1626 = vmatprep.mubr.f32.mxu0 %v1371_v23  ;;  %v953_v23 = vrot.slane %v3035_v53, 4 }
 0x207   :  { %1711 = vmatprep.mubr.f32.mxu1 %v1373_v25 }
 0x209   :  { %1627 = vmatmul.mubr.f32.gmra.mxu0 %v1370_v27 }
 0x20a   :  { %1712 = vmatmul.mubr.f32.gmra.mxu1 %v1372_v29  ;;  %1631 = vmatprep.mubr.f32.mxu0 %v1379_v31 }
 0x20b   :  { %1716 = vmatprep.mubr.f32.mxu1 %v1381_v32  ;;  %v954_v32 = vadd.f32 %v953_v23, %v3035_v53 }
 0x20d   :  { %1632 = vmatmul.mubr.f32.gmra.mxu0 %v1378_v63 }
 0x20e   :  { %1717 = vmatmul.mubr.f32.gmra.mxu1 %v1380_v33 }
 0x29a   :  { %v2090_v34 = vpop.f32.mrf.mxu0 }
 0x29b   :  { %v2134_v35 = vpop.f32.mrf.mxu1 }
 0x29c   :  { %v2091_v36 = vpop.f32.mrf.mxu0 }
 0x29d   :  { %v2135_v37 = vpop.f32.mrf.mxu1  ;;  %v2092_v13 = vadd.f32 %v2091_v36, %v2090_v34 }
 0x29e   :  { %v2136_v1 = vadd.f32 %v2135_v37, %v2134_v35  ;;  %v955_v37 = vrot.slane %v954_v32, 2 }
 0x2a0   :  { %v2093_v38 = vpop.f32.mrf.mxu0  ;;  %v1534_v58 = vadd.f32 %v2136_v1, %v2092_v13 }
 0x2a1   :  { %v2137_v39 = vpop.f32.mrf.mxu1 }
 0x2a2   :  { %v2094_v40 = vpop.f32.mrf.mxu0 }
 0x2a3   :  { %v2138_v41 = vpop.f32.mrf.mxu1  ;;  %v2095_v10 = vadd.f32 %v2094_v40, %v2093_v38 }
 0x2a4   :  { %v2139_v12 = vadd.f32 %v2138_v41, %v2137_v39  ;;  %v1766_v41 = vlaneseq }
 0x2a6   :  { %v2096_v42 = vpop.f32.mrf.mxu0  ;;  %v1539_v48 = vadd.f32 %v2139_v12, %v2095_v10  ;;  %v1767_v53 = vshrl.u32 %v1766_v41, 7 }
 0x2a7   :  { %v2140_v18 = vpop.f32.mrf.mxu1 }
 0x2a8   :  { %v2097_v44 = vpop.f32.mrf.mxu0 }
 0x2a9   :  { %v2141_v45 = vpop.f32.mrf.mxu1  ;;  %v2098_v62 = vadd.f32 %v2097_v44, %v2096_v42  ;;  %v956_v42 = vadd.f32 %v955_v37, %v954_v32 }
 0x2aa   :  { %v2142_v3 = vadd.f32 %v2141_v45, %v2140_v18 }
 0x2ac   :  { %v2099_v47 = vpop.f32.mrf.mxu0  ;;  %v1544_v16 = vadd.f32 %v2142_v3, %v2098_v62 }
 0x2ad   :  { %v2143_v49 = vpop.f32.mrf.mxu1 }
 0x2ae   :  { %v2100_v56 = vpop.f32.mrf.mxu0 }
 0x2af   :  { %v2144_v50 = vpop.f32.mrf.mxu1  ;;  %v2101_v21 = vadd.f32 %v2100_v56, %v2099_v47  ;;  %v957_v47 = vrot.slane %v956_v42, 1 }
 0x2b0   :  { %v2145_v57 = vadd.f32 %v2144_v50, %v2143_v49 }
 0x2b2   :  { %v1549_v28 = vadd.f32 %v2145_v57, %v2101_v21 }
 0x2c1   :  { %v2178_v4 = vpop.f32.mrf.mxu0 }
 0x2c2   :  { %v2222_v54 = vpop.f32.mrf.mxu1 }
 0x2c3   :  { %v2179_v61 = vpop.f32.mrf.mxu0 }
 0x2c4   :  { %v2180_v60 = vadd.f32 %v2179_v61, %v2178_v4  ;;  %v2223_v5 = vpop.f32.mrf.mxu1  ;;  %v960_v61 = vpop.xlane.xlu0 %959 }
 0x2c5   :  { %v2181_v2 = vpop.f32.mrf.mxu0  ;;  %v2224_v43 = vadd.f32 %v2223_v5, %v2222_v54  ;;  %v967_v5 = vmul.f32 0.015625, %v960_v61 }
 0x2c6   :  { %v1619_v52 = vadd.f32 %v2180_v60, %v1534_v58  ;;  %v2225_v9 = vpop.f32.mrf.mxu1  ;;  %v49_v60 = vld [vmem:[%s3166_s3 + $0x8] sm:$0xff] }
 0x2c7   :  { %v2182_v0 = vpop.f32.mrf.mxu0 }
 0x2c8   :  { %v2183_v55 = vadd.f32 %v2182_v0, %v2181_v2  ;;  %v2226_v8 = vpop.f32.mrf.mxu1  ;;  %v1704_v7 = vadd.f32 %v2224_v43, %v1619_v52  ;;  %v962_v58 = vpop.xlane.xlu0 %961  ;;  %v48_v2 = vld [vmem:[%s3166_s3] sm:$0xff]  ;;  %v50_v43 = vld [vmem:[%s3166_s3 + $0x10] sm:$0xff] }
 0x2c9   :  { %v2184_v51 = vpop.f32.mrf.mxu0  ;;  %v2227_v11 = vadd.f32 %v2226_v8, %v2225_v9  ;;  %v968_v12 = vmul.f32 0.015625, %v962_v58 }
 0x2ca   :  { %v1624_v6 = vadd.f32 %v2183_v55, %v1539_v48  ;;  %v2228_v15 = vpop.f32.mrf.mxu1  ;;  %1731 = vadd.xlane.f32.xlu0 %v1704_v7  ;;  %v971_v48 = vmul.f32 %v967_v5, %v48_v2 }
 0x2cb   :  { %v2185_v20 = vpop.f32.mrf.mxu0  ;;  %v972_v62 = vmul.f32 %v968_v12, %v49_v60 }
 0x2cc   :  { %v2186_v14 = vadd.f32 %v2185_v20, %v2184_v51  ;;  %v2229_v17 = vpop.f32.mrf.mxu1  ;;  %v1709_v19 = vadd.f32 %v2227_v11, %v1624_v6  ;;  %v51_v51 = vld [vmem:[%s3166_s3 + $0x18] sm:$0xff] }
 0x2cd   :  { %v2187_v22 = vpop.f32.mrf.mxu0  ;;  %v2230_v25 = vadd.f32 %v2229_v17, %v2228_v15  ;;  %v975_v11 = vadd.f32 %v972_v62, %v971_v48 }
 0x2ce   :  { %v1629_v24 = vadd.f32 %v2186_v14, %v1544_v16  ;;  %v2231_v26 = vpop.f32.mrf.mxu1  ;;  %1733 = vadd.xlane.f32.xlu1 %v1709_v19  ;;  %963 = vadd.xlane.f32.xlu0 %v3025_v46  ;;  %v1722_v63 = vadd.f32 %v1709_v19, %v1704_v7  ;;  %v2294_v46 = vmov 1966171168  }
 0x2cf   :  { %v2188_v27 = vpop.f32.mrf.mxu0  ;;  %v1764_v40 = vunpack.c.l.s4 %v2294_v46 }
 0x2d0   :  { %v2189_v29 = vadd.f32 %v2188_v27, %v2187_v22  ;;  %v2232_v30 = vpop.f32.mrf.mxu1  ;;  %v1714_v31 = vadd.f32 %v2230_v25, %v1629_v24 }
 0x2d1   :  { %v2233_v34 = vadd.f32 %v2232_v30, %v2231_v26  ;;  %v1765_v45 = vunpack.c.0.s8 %v1764_v40 }
 0x2d2   :  { %v1634_v33 = vadd.f32 %v2189_v29, %v1549_v28  ;;  %1735 = vadd.xlane.f32.xlu1 %v1714_v31  ;;  %965 = vadd.xlane.f32.xlu0 %v3031_v59  ;;  %v1723_v35 = vadd.f32 %v1722_v63, %v1714_v31  ;;  %v958_v59 = vadd.f32 %v957_v47, %v956_v42 }
 0x2d3   :  { %v1768_v13 = vsub.s32 %v1765_v45, %v1767_v53 }
 0x2d4   :  { %v1719_v36 = vadd.f32 %v2233_v34, %v1634_v33 }
 0x2d6   :  { %1737 = vadd.xlane.f32.xlu1 %v1719_v36  ;;  %v1724_v38 = vadd.f32 %v1723_v35, %v1719_v36 }
 0x2d8   :  { %v1725_v39 = vrot.slane %v1724_v38, 4 }
 0x2da   :  { %v1726_v18 = vadd.f32 %v1725_v39, %v1724_v38  ;;  %v52_v39 = vld [vmem:[%s3167_s4] sm:$0x1] }
 0x2dc   :  { %v1727_v44 = vrot.slane %v1726_v18, 2 }
 0x2de   :  { %v1728_v49 = vadd.f32 %v1727_v44, %v1726_v18 }
 0x2e0   :  { %v1729_v56 = vrot.slane %v1728_v49, 1 }
 0x2e2   :  { %v1730_v1 = vadd.f32 %v1729_v56, %v1728_v49 }
 0x2e4   :  { %v1789_v50 = vsel %vm1760_vm1, %v958_v59, %v1730_v1 }
 0x2e5   :  { %v1797_v4 = vrot.slane %v1789_v50, %v1768_v13 }
 0x2e7   :  { %v1798_v54 = vcombine.high %v1797_v4, %v1797_v4  ;;  %1880 = vst.sshfl [vmem:[%s3170_s7] sm:$0x1 pattern:$0x73625140] %v1797_v4 }
 0x2e9   :  { %1881 = vst.sshfl [vmem:[%s3170_s7 + $0x1] sm:$0x1 pattern:$0x73625140] %v1798_v54 }
 0x353   :  { %v1732_v10 = vpop.xlane.xlu0 %1731 }
 0x354   :  { %v1739_v55 = vmul.f32 0.015625, %v1732_v10 }
 0x356   :  { %v1743_v21 = vmul.f32 %v1739_v55, %v48_v2 }
 0x357   :  { %v1734_v52 = vpop.xlane.xlu1 %1733  ;;  %v964_v9 = vpop.xlane.xlu0 %963 }
 0x358   :  { %v1740_v3 = vmul.f32 0.015625, %v1734_v52  ;;  %v969_v0 = vmul.f32 0.015625, %v964_v9 }
 0x35a   :  { %v973_v8 = vmul.f32 %v969_v0, %v50_v43  ;;  %v1744_v15 = vmul.f32 %v1740_v3, %v49_v60 }
 0x35b   :  { %v1736_v7 = vpop.xlane.xlu1 %1735  ;;  %v966_v6 = vpop.xlane.xlu0 %965 }
 0x35c   :  { %v1741_v16 = vmul.f32 0.015625, %v1736_v7  ;;  %v970_v20 = vmul.f32 0.015625, %v966_v6  ;;  %v976_v57 = vadd.f32 %v975_v11, %v973_v8  ;;  %v1747_v22 = vadd.f32 %v1744_v15, %v1743_v21 }
 0x35e   :  { %v1745_v14 = vmul.f32 %v1741_v16, %v50_v43  ;;  %v974_v17 = vmul.f32 %v970_v20, %v51_v51 }
 0x35f   :  { %v1738_v19 = vpop.xlane.xlu1 %1737 }
 0x360   :  { %v977_v23 = vadd.f32 %v976_v57, %v974_v17  ;;  %v1742_v24 = vmul.f32 0.015625, %v1738_v19  ;;  %v1748_v25 = vadd.f32 %v1747_v22, %v1745_v14 }
 0x362   :  { %v978_v26 = vrot.slane %v977_v23, 4  ;;  %v1746_v27 = vmul.f32 %v1742_v24, %v51_v51 }
 0x364   :  { %v979_v28 = vadd.f32 %v978_v26, %v977_v23  ;;  %v1749_v29 = vadd.f32 %v1748_v25, %v1746_v27 }
 0x366   :  { %v980_v30 = vrot.slane %v979_v28, 2  ;;  %v1750_v31 = vrot.slane %v1749_v29, 4 }
 0x368   :  { %v981_v32 = vadd.f32 %v980_v30, %v979_v28  ;;  %v1751_v63 = vadd.f32 %v1750_v31, %v1749_v29 }
 0x36a   :  { %v1752_v33 = vrot.slane %v1751_v63, 2  ;;  %v982_v34 = vrot.slane %v981_v32, 1 }
 0x36c   :  { %v1753_v35 = vadd.f32 %v1752_v33, %v1751_v63  ;;  %v983_v37 = vadd.f32 %v982_v34, %v981_v32 }
 0x36e   :  { %v1754_v36 = vrot.slane %v1753_v35, 1  ;;  %v984_v40 = vadd.f32 %v983_v37, %v52_v39 }
 0x370   :  { %v1755_v38 = vadd.f32 %v1754_v36, %v1753_v35 }
 0x372   :  { %v1756_v46 = vadd.f32 %v1755_v38, %v52_v39 }
 0x374   :  { %v1758_v41 = vrot.slane %v1756_v46, 7 }
 0x376   :  { %v1761_v42 = vsel %vm1760_vm1, %v984_v40, %v1758_v41 }
 0x377   :  { %v1769_v18 = vrot.slane %v1761_v42, %v1768_v13 }
 0x379   :  { %v1770_v44 = vcombine.high %v1769_v18, %v1769_v18  ;;  %1878 = vst.sshfl [vmem:[#allocation5] sm:$0x1 pattern:$0x73625140] %v1769_v18 }
 0x37b   :  { %1879 = vst.sshfl [vmem:[#allocation5 + $0x1] sm:$0x1 pattern:$0x73625140] %v1770_v44 }
 0x37c   :  { %2276 = shalt.err (!%p2273_p9)
}
 0x37d   :  { %s2296_s4 = smov 16   ;;  %s2297_s17 = smov 1  }
 0x37e   :  { %1828 = dma.vmem_to_hbm [thread:$0]  %s1823_s15, 32, %s3169_s6, [#allocation4], %s2296_s4, %s2296_s4, %s2297_s17  }
 0x37f   :  { %2287 = dma.done.wait [#allocation4], 32  }
 0x380   :  { %2288 = vsyncadd [#allocation4], 4294967264 }
 0x381   :  { %1836 = vsyncpa [#allocation3], 1 }
 0x382   :  { %1837 = vsyncpa [#allocation4], 1 }

// kernel: mainnet_forward.3
= control target key start
LH: loop header
LB: loop body
LE: loop exit
PB: predicated region body
PF: predicated region fallthrough
CT: control target
= control target key end

     0   :  { %13 = vsyncpa [#allocation3], 0  ;;  %vm196_vm0 = vcmask 64512   ;;  %v3553_v5 = vmov 0.0   ;;  %v2286_v14 = vmov 0   ;;  %s3545_s0 = inlined_call_operand.vmem [shape: f32[2,8,1024], index: 0, kind: input, shape index: {}]   ;;  %s3546_s1 = inlined_call_operand.vmem [shape: f32[32,8], index: 1, kind: input, shape index: {}]   ;;  %s3547_s2 = inlined_call_operand.vmem [shape: f32[32,1], index: 2, kind: input, shape index: {}]   ;;  %s3548_s3 = inlined_call_operand.vmem [shape: f32[32,128], index: 3, kind: input, shape index: {}]   ;;  %s3549_s4 = inlined_call_operand.vmem [shape: f32[1,128], index: 4, kind: input, shape index: {}]   ;;  %s3550_s5 = inlined_call_operand.vmem [shape: f32[1024,128], index: 5, kind: input, shape index: {}]   ;;  %s3551_s6 = inlined_call_operand.hbm [shape: f32[2,1,128], index: 6, kind: output, shape index: {0}]   ;;  %s3552_s7 = inlined_call_operand.hbm [shape: f32[2,1,128], index: 7, kind: output, shape index: {1}]  }
   0x1   :  { %v169_v0 = vld [vmem:[%s3545_s0 + $0x8] sm:$0xff]  ;;  %v171_v1 = vld [vmem:[%s3545_s0 + $0x18] sm:$0xff]  ;;  %v168_v2 = vld [vmem:[%s3545_s0] sm:$0xff]  ;;  %273 = vmatprep.mubr.f32.mxu0 %v3553_v5  ;;  %362 = vmatprep.mubr.f32.mxu1 %v3553_v5 }
   0x2   :  { %239 = vmatprep.subr.mxu0 %v169_v0  ;;  %328 = vmatprep.subr.mxu1 %v171_v1  ;;  %v170_v3 = vld [vmem:[%s3545_s0 + $0x10] sm:$0xff]  ;;  %v2347_v4 = vld [vmem:[%s3546_s1] sm:$0xff]  ;;  %v173_v6 = vld [vmem:[%s3545_s0 + $0x28] sm:$0xff] }
   0x3   :  { %240 = vmatpush1.msra.mxu0 %v168_v2  ;;  %329 = vmatpush1.msra.mxu1 %v170_v3  ;;  %v175_v7 = vld [vmem:[%s3545_s0 + $0x38] sm:$0xff]  ;;  %v172_v8 = vld [vmem:[%s3545_s0 + $0x20] sm:$0xff]  ;;  %v174_v9 = vld [vmem:[%s3545_s0 + $0x30] sm:$0xff] }
   0x4   :  { %1836 = vmatmul.mubr.msk.f32.vlgmr.msra.gmra.mxu0 %vm196_vm0, %v2347_v4  ;;  %1840 = vmatmul.mubr.msk.f32.vlgmr.msra.gmra.mxu1 %vm196_vm0, %v2347_v4  ;;  %v2372_v10 = vld [vmem:[%s3546_s1 + $0x8] sm:$0xff]  ;;  %v31_v11 = vld [vmem:[%s3547_s2] sm:$0xff]  ;;  %v33_v12 = vld [vmem:[%s3547_s2 + $0x10] sm:$0xff] }
   0x5   :  { %279 = vmatprep.mubr.f32.mxu0 %v3553_v5  ;;  %368 = vmatprep.mubr.f32.mxu1 %v3553_v5  ;;  %v2389_v13 = vld [vmem:[%s3546_s1 + $0x10] sm:$0xff]  ;;  %v2394_v15 = vld [vmem:[%s3550_s5 + $0xf8] sm:$0xff]  ;;  %v32_v17 = vld [vmem:[%s3547_s2 + $0x8] sm:$0xff] }
   0x6   :  { %417 = vmatprep.subr.mxu0 %v173_v6  ;;  %506 = vmatprep.subr.mxu1 %v175_v7  ;;  %v2399_v16 = vld [vmem:[%s3550_s5 + $0x1f8] sm:$0xff]  ;;  %v2443_v22 = vld [vmem:[%s3550_s5 + $0xf0] sm:$0xff] }
   0x7   :  { %418 = vmatpush1.msra.mxu0 %v172_v8  ;;  %507 = vmatpush1.msra.mxu1 %v174_v9  ;;  %v34_v18 = vld [vmem:[%s3547_s2 + $0x18] sm:$0xff]  ;;  %v2448_v23 = vld [vmem:[%s3550_s5 + $0x1f0] sm:$0xff] }
   0x8   :  { %1837 = vmatmul.mubr.msk.f32.gmra.mxu0 %vm196_vm0, %v2372_v10  ;;  %1841 = vmatmul.mubr.msk.f32.gmra.mxu1 %vm196_vm0, %v2372_v10  ;;  %v2416_v19 = vld [vmem:[%s3546_s1 + $0x18] sm:$0xff] }
   0x9   :  { %285 = vmatprep.mubr.f32.mxu0 %v3553_v5  ;;  %374 = vmatprep.mubr.f32.mxu1 %v3553_v5  ;;  %v2429_v20 = vld [vmem:[%s3550_s5 + $0x78] sm:$0xff] }
   0xa   :  { %2239 = vset.pattern.permute.xlu0 %v2286_v14  ;;  %2240 = vset.pattern.permute.xlu1 %v2286_v14  ;;  %v2434_v21 = vld [vmem:[%s3550_s5 + $0x178] sm:$0xff] }
   0xb   :  { %178 = vperm.xlu0 %2239, %v31_v11   ;;  %188 = vperm.xlu1 %2240, %v33_v12  }
   0xc   :  { %1838 = vmatmul.mubr.msk.f32.gmra.mxu0 %vm196_vm0, %v2389_v13  ;;  %1842 = vmatmul.mubr.msk.f32.gmra.mxu1 %vm196_vm0, %v2389_v13 }
   0xd   :  { %291 = vmatprep.mubr.f32.mxu0 %v3553_v5  ;;  %380 = vmatprep.mubr.f32.mxu1 %v3553_v5 }
   0xe   :  { %1880 = vmatprep.subr.mxu0 %v2394_v15  ;;  %1924 = vmatprep.subr.mxu1 %v2399_v16 }
   0xf   :  { %183 = vperm.xlu0 %2239, %v32_v17   ;;  %193 = vperm.xlu1 %2240, %v34_v18  }
  0x10   :  { %1839 = vmatmul.mubr.msk.f32.gmra.mxu0 %vm196_vm0, %v2416_v19  ;;  %1843 = vmatmul.mubr.msk.f32.gmra.mxu1 %vm196_vm0, %v2416_v19 }
  0x11   :  { %451 = vmatprep.mubr.f32.mxu0 %v3553_v5  ;;  %540 = vmatprep.mubr.f32.mxu1 %v3553_v5 }
  0x14   :  { %1844 = vmatmul.mubr.msk.f32.vlgmr.msra.gmra.mxu0 %vm196_vm0, %v2347_v4  ;;  %1848 = vmatmul.mubr.msk.f32.vlgmr.msra.gmra.mxu1 %vm196_vm0, %v2347_v4 }
  0x15   :  { %457 = vmatprep.mubr.f32.mxu0 %v3553_v5  ;;  %546 = vmatprep.mubr.f32.mxu1 %v3553_v5 }
  0x16   :  { %1881 = vmatpush3.msra.mxu0 %v2429_v20  ;;  %1925 = vmatpush3.msra.mxu1 %v2434_v21 }
  0x17   :  { %14 = vsyncpa [#allocation5], 0  ;;  %1882 = vmatprep.subr.mxu0 %v2443_v22  ;;  %1926 = vmatprep.subr.mxu1 %v2448_v23  ;;  %v2459_v24 = vld [vmem:[%s3550_s5 + $0x70] sm:$0xff]  ;;  %v2473_v26 = vld [vmem:[%s3550_s5 + $0xe8] sm:$0xff]  ;;  %vm1747_vm1 = vcmask 1040384  }
  0x18   :  { %v2464_v25 = vld [vmem:[%s3550_s5 + $0x170] sm:$0xff]  ;;  %1845 = vmatmul.mubr.msk.f32.gmra.mxu0 %vm196_vm0, %v2372_v10  ;;  %1849 = vmatmul.mubr.msk.f32.gmra.mxu1 %vm196_vm0, %v2372_v10  ;;  %v2478_v27 = vld [vmem:[%s3550_s5 + $0x1e8] sm:$0xff]  ;;  %v2503_v30 = vld [vmem:[%s3550_s5 + $0xe0] sm:$0xff] }
  0x19   :  { %463 = vmatprep.mubr.f32.mxu0 %v3553_v5  ;;  %552 = vmatprep.mubr.f32.mxu1 %v3553_v5  ;;  %v2489_v28 = vld [vmem:[%s3550_s5 + $0x68] sm:$0xff]  ;;  %v2508_v31 = vld [vmem:[%s3550_s5 + $0x1e0] sm:$0xff]  ;;  %v2529_v34 = vld [vmem:[%s3550_s5 + $0xd8] sm:$0xff] }
  0x1a   :  { %1883 = vmatpush3.msra.mxu0 %v2459_v24  ;;  %1927 = vmatpush3.msra.mxu1 %v2464_v25  ;;  %v2494_v29 = vld [vmem:[%s3550_s5 + $0x168] sm:$0xff]  ;;  %v2517_v32 = vld [vmem:[%s3550_s5 + $0x60] sm:$0xff]  ;;  %v2534_v35 = vld [vmem:[%s3550_s5 + $0x1d8] sm:$0xff] }
  0x1b   :  { %1884 = vmatprep.subr.mxu0 %v2473_v26  ;;  %1928 = vmatprep.subr.mxu1 %v2478_v27  ;;  %v2522_v33 = vld [vmem:[%s3550_s5 + $0x160] sm:$0xff]  ;;  %v2543_v36 = vld [vmem:[%s3550_s5 + $0x58] sm:$0xff]  ;;  %v2555_v38 = vld [vmem:[%s3550_s5 + $0xd0] sm:$0xff] }
  0x1c   :  { %1846 = vmatmul.mubr.msk.f32.gmra.mxu0 %vm196_vm0, %v2389_v13  ;;  %1850 = vmatmul.mubr.msk.f32.gmra.mxu1 %vm196_vm0, %v2389_v13  ;;  %v2548_v37 = vld [vmem:[%s3550_s5 + $0x158] sm:$0xff]  ;;  %v2560_v39 = vld [vmem:[%s3550_s5 + $0x1d0] sm:$0xff]  ;;  %v2579_v42 = vld [vmem:[%s3550_s5 + $0xc8] sm:$0xff] }
  0x1d   :  { %469 = vmatprep.mubr.f32.mxu0 %v3553_v5  ;;  %558 = vmatprep.mubr.f32.mxu1 %v3553_v5  ;;  %v2567_v40 = vld [vmem:[%s3550_s5 + $0x50] sm:$0xff]  ;;  %v2584_v43 = vld [vmem:[%s3550_s5 + $0x1c8] sm:$0xff]  ;;  %v2603_v46 = vld [vmem:[%s3550_s5 + $0xc0] sm:$0xff] }
  0x1e   :  { %1885 = vmatpush3.msra.mxu0 %v2489_v28  ;;  %1929 = vmatpush3.msra.mxu1 %v2494_v29  ;;  %v2572_v41 = vld [vmem:[%s3550_s5 + $0x150] sm:$0xff]  ;;  %v2591_v44 = vld [vmem:[%s3550_s5 + $0x48] sm:$0xff]  ;;  %v2608_v47 = vld [vmem:[%s3550_s5 + $0x1c0] sm:$0xff] }
  0x1f   :  { %1886 = vmatprep.subr.mxu0 %v2503_v30  ;;  %1930 = vmatprep.subr.mxu1 %v2508_v31  ;;  %v2596_v45 = vld [vmem:[%s3550_s5 + $0x148] sm:$0xff]  ;;  %v2615_v48 = vld [vmem:[%s3550_s5 + $0x40] sm:$0xff]  ;;  %v2627_v50 = vld [vmem:[%s3550_s5 + $0xb8] sm:$0xff] }
  0x20   :  { %1847 = vmatmul.mubr.msk.f32.gmra.mxu0 %vm196_vm0, %v2416_v19  ;;  %1851 = vmatmul.mubr.msk.f32.gmra.mxu1 %vm196_vm0, %v2416_v19  ;;  %v2620_v49 = vld [vmem:[%s3550_s5 + $0x140] sm:$0xff]  ;;  %v2632_v51 = vld [vmem:[%s3550_s5 + $0x1b8] sm:$0xff]  ;;  %v2651_v54 = vld [vmem:[%s3550_s5 + $0xb0] sm:$0xff] }
  0x21   :  { %1887 = vmatpush3.msra.mxu0 %v2517_v32  ;;  %1931 = vmatpush3.msra.mxu1 %v2522_v33  ;;  %3651 = vst [vmem:[#allocation8_spill] sm:$0xff] %v2632_v51  ;;  %v2639_v52 = vld [vmem:[%s3550_s5 + $0x38] sm:$0xff]  ;;  %3654 = vst [vmem:[#allocation11_spill] sm:$0xff] %v2651_v54  ;;  %v2656_v55 = vld [vmem:[%s3550_s5 + $0x1b0] sm:$0xff] }
  0x22   :  { %1888 = vmatprep.subr.mxu0 %v2529_v34  ;;  %1932 = vmatprep.subr.mxu1 %v2534_v35  ;;  %3652 = vst [vmem:[#allocation9_spill] sm:$0xff] %v2639_v52  ;;  %v2644_v53 = vld [vmem:[%s3550_s5 + $0x138] sm:$0xff]  ;;  %3655 = vst [vmem:[#allocation12_spill] sm:$0xff] %v2656_v55  ;;  %v2663_v56 = vld [vmem:[%s3550_s5 + $0x30] sm:$0xff] }
  0x23   :  { %1889 = vmatpush3.msra.mxu0 %v2543_v36  ;;  %1933 = vmatpush3.msra.mxu1 %v2548_v37  ;;  %3653 = vst [vmem:[#allocation10_spill] sm:$0xff] %v2644_v53  ;;  %3656 = vst [vmem:[#allocation13_spill] sm:$0xff] %v2663_v56  ;;  %v2668_v57 = vld [vmem:[%s3550_s5 + $0x130] sm:$0xff]  ;;  %v2675_v58 = vld [vmem:[%s3550_s5 + $0xa8] sm:$0xff] }
  0x24   :  { %1890 = vmatprep.subr.mxu0 %v2555_v38  ;;  %1934 = vmatprep.subr.mxu1 %v2560_v39  ;;  %3657 = vst [vmem:[#allocation14_spill] sm:$0xff] %v2668_v57  ;;  %3658 = vst [vmem:[#allocation15_spill] sm:$0xff] %v2675_v58  ;;  %v2680_v59 = vld [vmem:[%s3550_s5 + $0x1a8] sm:$0xff]  ;;  %v2699_v62 = vld [vmem:[%s3550_s5 + $0xa0] sm:$0xff] }
  0x25   :  { %1891 = vmatpush3.msra.mxu0 %v2567_v40  ;;  %1935 = vmatpush3.msra.mxu1 %v2572_v41  ;;  %3659 = vst [vmem:[#allocation16_spill] sm:$0xff] %v2680_v59  ;;  %v2687_v60 = vld [vmem:[%s3550_s5 + $0x28] sm:$0xff]  ;;  %3662 = vst [vmem:[#allocation19_spill] sm:$0xff] %v2699_v62  ;;  %v2704_v63 = vld [vmem:[%s3550_s5 + $0x1a0] sm:$0xff] }
  0x26   :  { %1892 = vmatprep.subr.mxu0 %v2579_v42  ;;  %1936 = vmatprep.subr.mxu1 %v2584_v43  ;;  %3660 = vst [vmem:[#allocation17_spill] sm:$0xff] %v2687_v60  ;;  %v2692_v61 = vld [vmem:[%s3550_s5 + $0x128] sm:$0xff]  ;;  %3663 = vst [vmem:[#allocation20_spill] sm:$0xff] %v2704_v63  ;;  %v2711_v0 = vld [vmem:[%s3550_s5 + $0x20] sm:$0xff] }
  0x27   :  { %1893 = vmatpush3.msra.mxu0 %v2591_v44  ;;  %1937 = vmatpush3.msra.mxu1 %v2596_v45  ;;  %3661 = vst [vmem:[#allocation18_spill] sm:$0xff] %v2692_v61  ;;  %3664 = vst [vmem:[#allocation21_spill] sm:$0xff] %v2711_v0  ;;  %v2716_v1 = vld [vmem:[%s3550_s5 + $0x120] sm:$0xff]  ;;  %v2723_v2 = vld [vmem:[%s3550_s5 + $0x98] sm:$0xff] }
  0x28   :  { %1894 = vmatprep.subr.mxu0 %v2603_v46  ;;  %1938 = vmatprep.subr.mxu1 %v2608_v47  ;;  %3665 = vst [vmem:[#allocation22_spill] sm:$0xff] %v2716_v1  ;;  %3666 = vst [vmem:[#allocation23_spill] sm:$0xff] %v2723_v2  ;;  %v2728_v3 = vld [vmem:[%s3550_s5 + $0x198] sm:$0xff]  ;;  %v2751_v8 = vld [vmem:[%s3550_s5 + $0x90] sm:$0xff] }
  0x29   :  { %1895 = vmatpush3.msra.mxu0 %v2615_v48  ;;  %1939 = vmatpush3.msra.mxu1 %v2620_v49  ;;  %3667 = vst [vmem:[#allocation24_spill] sm:$0xff] %v2728_v3  ;;  %v2739_v6 = vld [vmem:[%s3550_s5 + $0x18] sm:$0xff]  ;;  %3670 = vst [vmem:[#allocation27_spill] sm:$0xff] %v2751_v8  ;;  %v2756_v9 = vld [vmem:[%s3550_s5 + $0x190] sm:$0xff] }
  0x2a   :  { %1896 = vmatprep.subr.mxu0 %v2627_v50  ;;  %1940 = vmatprep.subr.mxu1 %v2632_v51  ;;  %3668 = vst [vmem:[#allocation25_spill] sm:$0xff] %v2739_v6  ;;  %v2744_v7 = vld [vmem:[%s3550_s5 + $0x118] sm:$0xff]  ;;  %3671 = vst [vmem:[#allocation28_spill] sm:$0xff] %v2756_v9  ;;  %v2763_v11 = vld [vmem:[%s3550_s5 + $0x10] sm:$0xff] }
  0x2b   :  { %1897 = vmatpush3.msra.mxu0 %v2639_v52  ;;  %1941 = vmatpush3.msra.mxu1 %v2644_v53  ;;  %3669 = vst [vmem:[#allocation26_spill] sm:$0xff] %v2744_v7  ;;  %3672 = vst [vmem:[#allocation29_spill] sm:$0xff] %v2763_v11  ;;  %v2768_v12 = vld [vmem:[%s3550_s5 + $0x110] sm:$0xff]  ;;  %v2775_v14 = vld [vmem:[%s3550_s5 + $0x88] sm:$0xff] }
  0x2c   :  { %1898 = vmatprep.subr.mxu0 %v2651_v54  ;;  %1942 = vmatprep.subr.mxu1 %v2656_v55  ;;  %3673 = vst [vmem:[#allocation30_spill] sm:$0xff] %v2768_v12  ;;  %3674 = vst [vmem:[#allocation31_spill] sm:$0xff] %v2775_v14  ;;  %v2780_v17 = vld [vmem:[%s3550_s5 + $0x188] sm:$0xff]  ;;  %v2979_v53 = vld [vmem:[%s3550_s5 + $0x250] sm:$0xff] }
  0x2d   :  { %1899 = vmatpush3.msra.mxu0 %v2663_v56  ;;  %1943 = vmatpush3.msra.mxu1 %v2668_v57  ;;  %3675 = vst [vmem:[#allocation32_spill] sm:$0xff] %v2780_v17  ;;  %v2787_v18 = vld [vmem:[%s3550_s5 + $0x8] sm:$0xff]  ;;  %3705 = vst [vmem:[#allocation62_spill] sm:$0xff] %v2979_v53 }
  0x2e   :  { %1900 = vmatprep.subr.mxu0 %v2675_v58  ;;  %1944 = vmatprep.subr.mxu1 %v2680_v59  ;;  %3676 = vst [vmem:[#allocation33_spill] sm:$0xff] %v2787_v18  ;;  %v2792_v5 = vld [vmem:[%s3550_s5 + $0x108] sm:$0xff] }
  0x2f   :  { %1901 = vmatpush3.msra.mxu0 %v2687_v60  ;;  %1945 = vmatpush3.msra.mxu1 %v2692_v61  ;;  %3677 = vst [vmem:[#allocation34_spill] sm:$0xff] %v2792_v5  ;;  %v2900_v57 = vld [vmem:[%s3550_s5 + $0x368] sm:$0xff] }
  0x30   :  { %1902 = vmatprep.subr.mxu0 %v2699_v62  ;;  %1946 = vmatprep.subr.mxu1 %v2704_v63  ;;  %3694 = vst [vmem:[#allocation51_spill] sm:$0xff] %v2900_v57 }
  0x31   :  { %1903 = vmatpush3.msra.mxu0 %v2711_v0  ;;  %1947 = vmatpush3.msra.mxu1 %v2716_v1 }
  0x32   :  { %1904 = vmatprep.subr.mxu0 %v2723_v2  ;;  %1948 = vmatprep.subr.mxu1 %v2728_v3 }
  0x33   :  { %1905 = vmatpush3.msra.mxu0 %v2739_v6  ;;  %1949 = vmatpush3.msra.mxu1 %v2744_v7 }
  0x34   :  { %1906 = vmatprep.subr.mxu0 %v2751_v8  ;;  %1950 = vmatprep.subr.mxu1 %v2756_v9 }
  0x35   :  { %1907 = vmatpush3.msra.mxu0 %v2763_v11  ;;  %1951 = vmatpush3.msra.mxu1 %v2768_v12 }
  0x36   :  { %1908 = vmatprep.subr.mxu0 %v2775_v14  ;;  %1952 = vmatprep.subr.mxu1 %v2780_v17  ;;  %v2799_v14 = vld [vmem:[%s3550_s5 + $0x80] sm:$0xff] }
  0x37   :  { %1909 = vmatpush3.msra.mxu0 %v2787_v18  ;;  %1953 = vmatpush3.msra.mxu1 %v2792_v5  ;;  %3678 = vst [vmem:[#allocation35_spill] sm:$0xff] %v2799_v14  ;;  %v2804_v17 = vld [vmem:[%s3550_s5 + $0x180] sm:$0xff] }
  0x38   :  { %3679 = vst [vmem:[#allocation36_spill] sm:$0xff] %v2804_v17  ;;  %1910 = vmatprep.subr.mxu0 %v2799_v14  ;;  %1954 = vmatprep.subr.mxu1 %v2804_v17  ;;  %v2811_v18 = vld [vmem:[%s3550_s5] sm:$0xff]  ;;  %v2823_v14 = vld [vmem:[%s3550_s5 + $0x2f8] sm:$0xff] }
  0x39   :  { %3680 = vst [vmem:[#allocation37_spill] sm:$0xff] %v2811_v18  ;;  %v2816_v5 = vld [vmem:[%s3550_s5 + $0x100] sm:$0xff]  ;;  %1911 = vmatpush3.msra.mxu0 %v2811_v18  ;;  %3682 = vst [vmem:[#allocation39_spill] sm:$0xff] %v2823_v14  ;;  %v2828_v17 = vld [vmem:[%s3550_s5 + $0x3f8] sm:$0xff] }
  0x3a   :  { %3681 = vst [vmem:[#allocation38_spill] sm:$0xff] %v2816_v5  ;;  %1955 = vmatpush3.msra.mxu1 %v2816_v5  ;;  %3683 = vst [vmem:[#allocation40_spill] sm:$0xff] %v2828_v17  ;;  %1968 = vmatprep.subr.mxu0 %v2823_v14 }
  0x3b   :  { %2012 = vmatprep.subr.mxu1 %v2828_v17 }
  0x86   :  { %v2832_v12 = vpop.permute.xlu0 %178 }
  0x87   :  { %3684 = vst [vmem:[#allocation41_spill] sm:$0xff] %v2832_v12 }
  0x8a   :  { %v2838_v14 = vpop.permute.xlu0 %183 }
  0xc4   :  { %v275_v11 = vpop.f32.mrf.mxu0  ;;  %v364_v18 = vpop.f32.mrf.mxu1 }
  0xc5   :  { %v365_v5 = vadd.f32 %v364_v18, %v2832_v12  ;;  %v276_v9 = vadd.f32 %v275_v11, %v2832_v12  ;;  %v2843_v11 = vld [vmem:[%s3550_s5 + $0x278] sm:$0xff] }
  0xc6   :  { %v277_v8 = vpop.f32.mrf.mxu0  ;;  %v366_v7 = vpop.f32.mrf.mxu1  ;;  %3685 = vst [vmem:[#allocation42_spill] sm:$0xff] %v2843_v11 }
  0xc7   :  { %v278_v6 = vadd.f32 %v277_v8, %v2832_v12  ;;  %v367_v3 = vadd.f32 %v366_v7, %v2832_v12  ;;  %v567_v2 = vmax.f32 %v365_v5, 0.0  ;;  %v565_v62 = vmax.f32 %v276_v9, 0.0  ;;  %v2848_v8 = vld [vmem:[%s3550_s5 + $0x378] sm:$0xff] }
  0xc8   :  { %v281_v1 = vpop.f32.mrf.mxu0  ;;  %v370_v0 = vpop.f32.mrf.mxu1  ;;  %3686 = vst [vmem:[#allocation43_spill] sm:$0xff] %v2848_v8 }
  0xc9   :  { %v566_v17 = vmax.f32 %v278_v6, 0.0  ;;  %v568_v63 = vmax.f32 %v367_v3, 0.0  ;;  %v2855_v3 = vld [vmem:[%s3550_s5 + $0x2f0] sm:$0xff]  ;;  %v282_v9 = vadd.f32 %v281_v1, %v2838_v14  ;;  %v371_v18 = vadd.f32 %v370_v0, %v2838_v14  ;;  %v2876_v0 = vpop.permute.xlu1 %188 }
  0xca   :  { %v283_v61 = vpop.f32.mrf.mxu0  ;;  %v372_v60 = vpop.f32.mrf.mxu1  ;;  %3687 = vst [vmem:[#allocation44_spill] sm:$0xff] %v2855_v3  ;;  %v2860_v6 = vld [vmem:[%s3550_s5 + $0x3f0] sm:$0xff] }
  0xcb   :  { %v284_v5 = vadd.f32 %v283_v61, %v2838_v14  ;;  %v373_v7 = vadd.f32 %v372_v60, %v2838_v14  ;;  %661 = vmatprep.mubr.f32.mxu0 %v566_v17  ;;  %746 = vmatprep.mubr.f32.mxu1 %v568_v63  ;;  %3688 = vst [vmem:[#allocation45_spill] sm:$0xff] %v2860_v6  ;;  %v2867_v60 = vld [vmem:[%s3550_s5 + $0x270] sm:$0xff] }
  0xcc   :  { %v287_v59 = vpop.f32.mrf.mxu0  ;;  %v376_v61 = vpop.f32.mrf.mxu1  ;;  %662 = vmatmul.mubr.f32.vlgmr.msra.gmra.mxu0 %v565_v62  ;;  %747 = vmatmul.mubr.f32.vlgmr.msra.gmra.mxu1 %v567_v2  ;;  %3689 = vst [vmem:[#allocation46_spill] sm:$0xff] %v2867_v60  ;;  %v2872_v63 = vld [vmem:[%s3550_s5 + $0x370] sm:$0xff]  ;;  %v2883_v2 = vld [vmem:[%s3550_s5 + $0x2e8] sm:$0xff] }
  0xcd   :  { %3690 = vst [vmem:[#allocation47_spill] sm:$0xff] %v2872_v63  ;;  %v574_v17 = vmax.f32 %v284_v5, 0.0  ;;  %v576_v58 = vmax.f32 %v373_v7, 0.0  ;;  %1969 = vmatpush3.msra.mxu0 %v2843_v11  ;;  %2013 = vmatpush3.msra.mxu1 %v2848_v8  ;;  %3691 = vst [vmem:[#allocation48_spill] sm:$0xff] %v2883_v2  ;;  %v2888_v5 = vld [vmem:[%s3550_s5 + $0x3e8] sm:$0xff]  ;;  %v573_v7 = vmax.f32 %v282_v9, 0.0  ;;  %v2940_v56 = vpop.permute.xlu1 %193 }
  0xce   :  { %1970 = vmatprep.subr.mxu0 %v2855_v3  ;;  %2014 = vmatprep.subr.mxu1 %v2860_v6  ;;  %v289_v62 = vpop.f32.mrf.mxu0  ;;  %v378_v1 = vpop.f32.mrf.mxu1  ;;  %3692 = vst [vmem:[#allocation49_spill] sm:$0xff] %v2888_v5  ;;  %v575_v3 = vmax.f32 %v371_v18, 0.0  ;;  %v2895_v11 = vld [vmem:[%s3550_s5 + $0x268] sm:$0xff]  ;;  %v2914_v9 = vld [vmem:[%s3550_s5 + $0x3e0] sm:$0xff] }
  0xcf   :  { %1971 = vmatpush3.msra.mxu0 %v2867_v60  ;;  %2015 = vmatpush3.msra.mxu1 %v2872_v63  ;;  %3693 = vst [vmem:[#allocation50_spill] sm:$0xff] %v2895_v11  ;;  %v290_v60 = vadd.f32 %v289_v62, %v2876_v0  ;;  %v379_v63 = vadd.f32 %v378_v1, %v2876_v0  ;;  %3696 = vst [vmem:[#allocation53_spill] sm:$0xff] %v2914_v9  ;;  %v2919_v62 = vld [vmem:[%s3550_s5 + $0x260] sm:$0xff] }
  0xd0   :  { %666 = vmatprep.mubr.f32.mxu0 %v574_v17  ;;  %751 = vmatprep.mubr.f32.mxu1 %v576_v58  ;;  %v293_v6 = vpop.f32.mrf.mxu0  ;;  %v382_v8 = vpop.f32.mrf.mxu1  ;;  %v2909_v58 = vld [vmem:[%s3550_s5 + $0x2e0] sm:$0xff]  ;;  %3697 = vst [vmem:[#allocation54_spill] sm:$0xff] %v2919_v62 }
  0xd1   :  { %1972 = vmatprep.subr.mxu0 %v2883_v2  ;;  %2016 = vmatprep.subr.mxu1 %v2888_v5  ;;  %3695 = vst [vmem:[#allocation52_spill] sm:$0xff] %v2909_v58  ;;  %v2924_v1 = vld [vmem:[%s3550_s5 + $0x360] sm:$0xff]  ;;  %v288_v5 = vadd.f32 %v287_v59, %v2876_v0  ;;  %v377_v2 = vadd.f32 %v376_v61, %v2876_v0  ;;  %v582_v55 = vmax.f32 %v290_v60, 0.0  ;;  %v584_v54 = vmax.f32 %v379_v63, 0.0 }
  0xd2   :  { %667 = vmatmul.mubr.f32.gmra.mxu0 %v573_v7  ;;  %752 = vmatmul.mubr.f32.gmra.mxu1 %v575_v3  ;;  %v295_v18 = vpop.f32.mrf.mxu0  ;;  %v384_v17 = vpop.f32.mrf.mxu1  ;;  %3698 = vst [vmem:[#allocation55_spill] sm:$0xff] %v2924_v1  ;;  %v2933_v3 = vld [vmem:[%s3550_s5 + $0x2d8] sm:$0xff] }
  0xd3   :  { %1973 = vmatpush3.msra.mxu0 %v2895_v11  ;;  %2017 = vmatpush3.msra.mxu1 %v2900_v57  ;;  %3699 = vst [vmem:[#allocation56_spill] sm:$0xff] %v2933_v3  ;;  %v2938_v7 = vld [vmem:[%s3550_s5 + $0x3d8] sm:$0xff]  ;;  %v581_v60 = vmax.f32 %v288_v5, 0.0  ;;  %v583_v63 = vmax.f32 %v377_v2, 0.0  ;;  %v2984_v2 = vld [vmem:[%s3550_s5 + $0x350] sm:$0xff]  ;;  %v294_v5 = vadd.f32 %v293_v6, %v2940_v56  ;;  %v3009_v6 = vld [vmem:[%s3550_s5 + $0x348] sm:$0xff] }
  0xd4   :  { %3700 = vst [vmem:[#allocation57_spill] sm:$0xff] %v2938_v7  ;;  %1974 = vmatprep.subr.mxu0 %v2909_v58  ;;  %2018 = vmatprep.subr.mxu1 %v2914_v9  ;;  %v2944_v59 = vpop.f32.mrf.mxu0  ;;  %v2946_v61 = vpop.f32.mrf.mxu1  ;;  %v2951_v57 = vld [vmem:[%s3550_s5 + $0x258] sm:$0xff]  ;;  %v2965_v9 = vld [vmem:[%s3550_s5 + $0x2d0] sm:$0xff]  ;;  %3706 = vst [vmem:[#allocation63_spill] sm:$0xff] %v2984_v2 }
  0xd5   :  { %3701 = vst [vmem:[#allocation58_spill] sm:$0xff] %v2951_v57  ;;  %v2956_v11 = vld [vmem:[%s3550_s5 + $0x358] sm:$0xff]  ;;  %1975 = vmatpush3.msra.mxu0 %v2919_v62  ;;  %2019 = vmatpush3.msra.mxu1 %v2924_v1  ;;  %3703 = vst [vmem:[#allocation60_spill] sm:$0xff] %v2965_v9  ;;  %v2970_v58 = vld [vmem:[%s3550_s5 + $0x3d0] sm:$0xff]  ;;  %v296_v62 = vadd.f32 %v295_v18, %v2940_v56  ;;  %v385_v1 = vadd.f32 %v384_v17, %v2940_v56 }
  0xd6   :  { %3702 = vst [vmem:[#allocation59_spill] sm:$0xff] %v2956_v11  ;;  %1976 = vmatprep.subr.mxu0 %v2933_v3  ;;  %2020 = vmatprep.subr.mxu1 %v2938_v7  ;;  %3704 = vst [vmem:[#allocation61_spill] sm:$0xff] %v2970_v58  ;;  %v455_v7 = vpop.f32.mrf.mxu0  ;;  %v544_v3 = vpop.f32.mrf.mxu1  ;;  %v383_v18 = vadd.f32 %v382_v8, %v2940_v56  ;;  %v3004_v8 = vld [vmem:[%s3550_s5 + $0x248] sm:$0xff] }
  0xd7   :  { %1977 = vmatpush3.msra.mxu0 %v2951_v57  ;;  %2021 = vmatpush3.msra.mxu1 %v2956_v11  ;;  %v456_v17 = vadd.f32 %v455_v7, %v2832_v12  ;;  %3709 = vst [vmem:[#allocation66_spill] sm:$0xff] %v3004_v8  ;;  %3710 = vst [vmem:[#allocation67_spill] sm:$0xff] %v3009_v6  ;;  %v545_v11 = vadd.f32 %v544_v3, %v2832_v12  ;;  %v3019_v7 = vld [vmem:[%s3550_s5 + $0x2c0] sm:$0xff] }
  0xd8   :  { %671 = vmatprep.mubr.f32.mxu0 %v582_v55  ;;  %756 = vmatprep.mubr.f32.mxu1 %v584_v54  ;;  %v2993_v54 = vld [vmem:[%s3550_s5 + $0x2c8] sm:$0xff]  ;;  %3711 = vst [vmem:[#allocation68_spill] sm:$0xff] %v3019_v7  ;;  %v591_v3 = vmax.f32 %v383_v18, 0.0  ;;  %v3052_v18 = vld [vmem:[%s3550_s5 + $0x3b8] sm:$0xff] }
  0xd9   :  { %1978 = vmatprep.subr.mxu0 %v2965_v9  ;;  %2022 = vmatprep.subr.mxu1 %v2970_v58  ;;  %3707 = vst [vmem:[#allocation64_spill] sm:$0xff] %v2993_v54  ;;  %v2998_v55 = vld [vmem:[%s3550_s5 + $0x3c8] sm:$0xff]  ;;  %v590_v58 = vmax.f32 %v296_v62, 0.0  ;;  %v592_v9 = vmax.f32 %v385_v1, 0.0  ;;  %v3024_v62 = vld [vmem:[%s3550_s5 + $0x3c0] sm:$0xff]  ;;  %v589_v1 = vmax.f32 %v294_v5, 0.0  ;;  %v3038_v5 = vpop.f32.mrf.mxu0 }
  0xda   :  { %3708 = vst [vmem:[#allocation65_spill] sm:$0xff] %v2998_v55  ;;  %672 = vmatmul.mubr.f32.gmra.mxu0 %v581_v60  ;;  %757 = vmatmul.mubr.f32.gmra.mxu1 %v583_v63  ;;  %3712 = vst [vmem:[#allocation69_spill] sm:$0xff] %v3024_v62  ;;  %v570_v60 = vmax.f32 %v456_v17, 0.0  ;;  %v3031_v63 = vld [vmem:[%s3550_s5 + $0x240] sm:$0xff]  ;;  %v3064_v17 = vld [vmem:[%s3550_s5 + $0x338] sm:$0xff] }
  0xdb   :  { %1979 = vmatpush3.msra.mxu0 %v2979_v53  ;;  %2023 = vmatpush3.msra.mxu1 %v2984_v2  ;;  %3713 = vst [vmem:[#allocation70_spill] sm:$0xff] %v3031_v63  ;;  %3716 = vst [vmem:[#allocation73_spill] sm:$0xff] %v3052_v18  ;;  %v454_v2 = vadd.f32 %v2944_v59, %v2832_v12  ;;  %v543_v53 = vadd.f32 %v2946_v61, %v2832_v12  ;;  %v3222_v59 = vld [vmem:[%s3550_s5 + $0x280] sm:$0xff] }
  0xdc   :  { %1980 = vmatprep.subr.mxu0 %v2993_v54  ;;  %2024 = vmatprep.subr.mxu1 %v2998_v55  ;;  %v3036_v55 = vld [vmem:[%s3550_s5 + $0x340] sm:$0xff]  ;;  %v572_v54 = vmax.f32 %v545_v11, 0.0  ;;  %v3059_v11 = vld [vmem:[%s3550_s5 + $0x238] sm:$0xff]  ;;  %3718 = vst [vmem:[#allocation75_spill] sm:$0xff] %v3064_v17  ;;  %3742 = vst [vmem:[#allocation99_spill] sm:$0xff] %v3222_v59 }
  0xdd   :  { %1981 = vmatpush3.msra.mxu0 %v3004_v8  ;;  %2025 = vmatpush3.msra.mxu1 %v3009_v6  ;;  %3714 = vst [vmem:[#allocation71_spill] sm:$0xff] %v3036_v55  ;;  %3717 = vst [vmem:[#allocation74_spill] sm:$0xff] %v3059_v11  ;;  %v3227_v61 = vld [vmem:[%s3550_s5 + $0x380] sm:$0xff]  ;;  %v571_v12 = vmax.f32 %v543_v53, 0.0 }
  0xde   :  { %676 = vmatprep.mubr.f32.mxu0 %v590_v58  ;;  %761 = vmatprep.mubr.f32.mxu1 %v592_v9  ;;  %v3045_v58 = vld [vmem:[%s3550_s5 + $0x2b8] sm:$0xff]  ;;  %v3047_v9 = vpop.f32.mrf.mxu1  ;;  %3743 = vst [vmem:[#allocation100_spill] sm:$0xff] %v3227_v61  ;;  %v1852_v53 = vld [vmem:[%s3545_s0 + $0x40] sm:$0xff] }
  0xdf   :  { %1982 = vmatprep.subr.mxu0 %v3019_v7  ;;  %2026 = vmatprep.subr.mxu1 %v3024_v62  ;;  %3715 = vst [vmem:[#allocation72_spill] sm:$0xff] %v3045_v58  ;;  %v549_v52 = vadd.f32 %v3047_v9, %v2838_v14 }
  0xe0   :  { %677 = vmatmul.mubr.f32.gmra.mxu0 %v589_v1  ;;  %762 = vmatmul.mubr.f32.gmra.mxu1 %v591_v3  ;;  %v3070_v1 = vld [vmem:[%s3550_s5 + $0x2b0] sm:$0xff] }
  0xe1   :  { %1983 = vmatpush3.msra.mxu0 %v3031_v63  ;;  %2027 = vmatpush3.msra.mxu1 %v3036_v55  ;;  %3719 = vst [vmem:[#allocation76_spill] sm:$0xff] %v3070_v1  ;;  %v3075_v3 = vld [vmem:[%s3550_s5 + $0x3b0] sm:$0xff]  ;;  %v461_v55 = vpop.f32.mrf.mxu0 }
  0xe2   :  { %1984 = vmatprep.subr.mxu0 %v3045_v58  ;;  %831 = vmatprep.mubr.f32.mxu0 %v570_v60  ;;  %3720 = vst [vmem:[#allocation77_spill] sm:$0xff] %v3075_v3  ;;  %v3081_v63 = vld [vmem:[%s3550_s5 + $0x230] sm:$0xff]  ;;  %v550_v58 = vpop.f32.mrf.mxu1  ;;  %v462_v57 = vadd.f32 %v461_v55, %v2838_v14  ;;  %v3235_v55 = vld [vmem:[%s3550_s5 + $0x200] sm:$0xff] }
  0xe3   :  { %2028 = vmatprep.subr.mxu1 %v3052_v18  ;;  %916 = vmatprep.mubr.f32.mxu1 %v572_v54  ;;  %3721 = vst [vmem:[#allocation78_spill] sm:$0xff] %v3081_v63  ;;  %v3086_v60 = vld [vmem:[%s3550_s5 + $0x330] sm:$0xff]  ;;  %v3093_v18 = vld [vmem:[%s3550_s5 + $0x2a8] sm:$0xff]  ;;  %v3124_v62 = vpop.f32.mrf.mxu0  ;;  %3744 = vst [vmem:[#allocation101_spill] sm:$0xff] %v3235_v55 }
  0xe4   :  { %3722 = vst [vmem:[#allocation79_spill] sm:$0xff] %v3086_v60  ;;  %1985 = vmatpush3.msra.mxu0 %v3059_v11  ;;  %2029 = vmatpush3.msra.mxu1 %v3064_v17  ;;  %3723 = vst [vmem:[#allocation80_spill] sm:$0xff] %v3093_v18  ;;  %v3098_v54 = vld [vmem:[%s3550_s5 + $0x3a8] sm:$0xff]  ;;  %v3138_v7 = vpop.f32.mrf.mxu1  ;;  %v578_v51 = vmax.f32 %v462_v57, 0.0  ;;  %v1855_v57 = vld [vmem:[%s3545_s0 + $0x58] sm:$0xff] }
  0xe5   :  { %3724 = vst [vmem:[#allocation81_spill] sm:$0xff] %v3098_v54  ;;  %1986 = vmatprep.subr.mxu0 %v3070_v1  ;;  %2030 = vmatprep.subr.mxu1 %v3075_v3  ;;  %v3105_v11 = vld [vmem:[%s3550_s5 + $0x228] sm:$0xff]  ;;  %v3117_v1 = vld [vmem:[%s3550_s5 + $0x2a0] sm:$0xff]  ;;  %v467_v6 = vpop.f32.mrf.mxu0 }
  0xe6   :  { %3725 = vst [vmem:[#allocation82_spill] sm:$0xff] %v3105_v11  ;;  %v3110_v17 = vld [vmem:[%s3550_s5 + $0x328] sm:$0xff]  ;;  %1987 = vmatpush3.msra.mxu0 %v3081_v63  ;;  %2031 = vmatpush3.msra.mxu1 %v3086_v60  ;;  %3727 = vst [vmem:[#allocation84_spill] sm:$0xff] %v3117_v1  ;;  %v3122_v3 = vld [vmem:[%s3550_s5 + $0x3a0] sm:$0xff]  ;;  %v556_v8 = vpop.f32.mrf.mxu1 }
  0xe7   :  { %3726 = vst [vmem:[#allocation83_spill] sm:$0xff] %v3110_v17  ;;  %3728 = vst [vmem:[#allocation85_spill] sm:$0xff] %v3122_v3  ;;  %1988 = vmatprep.subr.mxu0 %v3093_v18  ;;  %2032 = vmatprep.subr.mxu1 %v3098_v54  ;;  %v3131_v60 = vld [vmem:[%s3550_s5 + $0x220] sm:$0xff]  ;;  %v3145_v54 = vld [vmem:[%s3550_s5 + $0x298] sm:$0xff] }
  0xe8   :  { %3729 = vst [vmem:[#allocation86_spill] sm:$0xff] %v3131_v60  ;;  %v3136_v63 = vld [vmem:[%s3550_s5 + $0x320] sm:$0xff]  ;;  %1989 = vmatpush3.msra.mxu0 %v3105_v11  ;;  %2033 = vmatpush3.msra.mxu1 %v3110_v17  ;;  %3731 = vst [vmem:[#allocation88_spill] sm:$0xff] %v3145_v54  ;;  %v3150_v18 = vld [vmem:[%s3550_s5 + $0x398] sm:$0xff] }
  0xe9   :  { %3730 = vst [vmem:[#allocation87_spill] sm:$0xff] %v3136_v63  ;;  %3732 = vst [vmem:[#allocation89_spill] sm:$0xff] %v3150_v18  ;;  %1990 = vmatprep.subr.mxu0 %v3117_v1  ;;  %2034 = vmatprep.subr.mxu1 %v3122_v3  ;;  %v3157_v11 = vld [vmem:[%s3550_s5 + $0x218] sm:$0xff]  ;;  %v3169_v1 = vld [vmem:[%s3550_s5 + $0x290] sm:$0xff] }
  0xea   :  { %3733 = vst [vmem:[#allocation90_spill] sm:$0xff] %v3157_v11  ;;  %v3162_v17 = vld [vmem:[%s3550_s5 + $0x318] sm:$0xff]  ;;  %1991 = vmatpush3.msra.mxu0 %v3131_v60  ;;  %2035 = vmatpush3.msra.mxu1 %v3136_v63  ;;  %3735 = vst [vmem:[#allocation92_spill] sm:$0xff] %v3169_v1  ;;  %v3174_v3 = vld [vmem:[%s3550_s5 + $0x390] sm:$0xff] }
  0xeb   :  { %3734 = vst [vmem:[#allocation91_spill] sm:$0xff] %v3162_v17  ;;  %3736 = vst [vmem:[#allocation93_spill] sm:$0xff] %v3174_v3  ;;  %1992 = vmatprep.subr.mxu0 %v3145_v54  ;;  %2036 = vmatprep.subr.mxu1 %v3150_v18  ;;  %v3181_v60 = vld [vmem:[%s3550_s5 + $0x210] sm:$0xff]  ;;  %v3193_v54 = vld [vmem:[%s3550_s5 + $0x288] sm:$0xff] }
  0xec   :  { %3737 = vst [vmem:[#allocation94_spill] sm:$0xff] %v3181_v60  ;;  %v3186_v63 = vld [vmem:[%s3550_s5 + $0x310] sm:$0xff]  ;;  %1993 = vmatpush3.msra.mxu0 %v3157_v11  ;;  %2037 = vmatpush3.msra.mxu1 %v3162_v17  ;;  %3739 = vst [vmem:[#allocation96_spill] sm:$0xff] %v3193_v54  ;;  %v3198_v18 = vld [vmem:[%s3550_s5 + $0x388] sm:$0xff] }
  0xed   :  { %3738 = vst [vmem:[#allocation95_spill] sm:$0xff] %v3186_v63  ;;  %3740 = vst [vmem:[#allocation97_spill] sm:$0xff] %v3198_v18  ;;  %1994 = vmatprep.subr.mxu0 %v3169_v1  ;;  %2038 = vmatprep.subr.mxu1 %v3174_v3  ;;  %v3209_v17 = vld [vmem:[%s3550_s5 + $0x208] sm:$0xff]  ;;  %v551_v3 = vadd.f32 %v550_v58, %v2838_v14  ;;  %v471_v1 = vpop.f32.mrf.mxu0  ;;  %v569_v58 = vmax.f32 %v454_v2, 0.0 }
  0xee   :  { %3741 = vst [vmem:[#allocation98_spill] sm:$0xff] %v3209_v17  ;;  %v3214_v11 = vld [vmem:[%s3550_s5 + $0x308] sm:$0xff]  ;;  %1995 = vmatpush3.msra.mxu0 %v3181_v60  ;;  %2039 = vmatpush3.msra.mxu1 %v3186_v63  ;;  %v3240_v63 = vld [vmem:[%s3550_s5 + $0x300] sm:$0xff]  ;;  %v560_v60 = vpop.f32.mrf.mxu1 }
  0xef   :  { %1996 = vmatprep.subr.mxu0 %v3193_v54  ;;  %2040 = vmatprep.subr.mxu1 %v3198_v18  ;;  %3745 = vst [vmem:[#allocation102_spill] sm:$0xff] %v3240_v63  ;;  %v460_v18 = vadd.f32 %v3038_v5, %v2838_v14  ;;  %v1853_v54 = vld [vmem:[%s3545_s0 + $0x48] sm:$0xff]  ;;  %v580_v2 = vmax.f32 %v551_v3, 0.0  ;;  %v557_v5 = vadd.f32 %v556_v8, %v2876_v0  ;;  %v1854_v3 = vld [vmem:[%s3545_s0 + $0x50] sm:$0xff] }
  0xf0   :  { %1997 = vmatpush3.msra.mxu0 %v3209_v17  ;;  %2041 = vmatpush3.msra.mxu1 %v3214_v11  ;;  %v468_v17 = vadd.f32 %v467_v6, %v2876_v0  ;;  %v1857_v6 = vld [vmem:[%s3545_s0 + $0x68] sm:$0xff]  ;;  %v562_v9 = vpop.f32.mrf.mxu1  ;;  %v466_v8 = vadd.f32 %v3124_v62, %v2876_v0  ;;  %v472_v62 = vadd.f32 %v471_v1, %v2940_v56  ;;  %v1856_v1 = vld [vmem:[%s3545_s0 + $0x60] sm:$0xff] }
  0xf1   :  { %1998 = vmatprep.subr.mxu0 %v3222_v59  ;;  %2042 = vmatprep.subr.mxu1 %v3227_v61  ;;  %v473_v61 = vpop.f32.mrf.mxu0 }
  0xf2   :  { %1999 = vmatpush3.msra.mxu0 %v3235_v55  ;;  %2043 = vmatpush3.msra.mxu1 %v3240_v63  ;;  %v577_v63 = vmax.f32 %v460_v18, 0.0  ;;  %v586_v55 = vmax.f32 %v468_v17, 0.0  ;;  %v474_v59 = vadd.f32 %v473_v61, %v2940_v56  ;;  %v563_v18 = vadd.f32 %v562_v9, %v2940_v56 }
  0xf3   :  { %832 = vmatmul.mubr.f32.vlgmr.msra.gmra.mxu0 %v569_v58  ;;  %917 = vmatmul.mubr.f32.vlgmr.msra.gmra.mxu1 %v571_v12  ;;  %v579_v12 = vmax.f32 %v549_v52, 0.0  ;;  %v555_v58 = vadd.f32 %v3138_v7, %v2876_v0  ;;  %v585_v52 = vmax.f32 %v466_v8, 0.0  ;;  %v561_v17 = vadd.f32 %v560_v60, %v2940_v56  ;;  %v1858_v60 = vld [vmem:[%s3545_s0 + $0x70] sm:$0xff] }
  0xf4   :  { %1011 = vmatprep.subr.mxu0 %v1853_v54  ;;  %836 = vmatprep.mubr.f32.mxu0 %v578_v51  ;;  %v1859_v51 = vld [vmem:[%s3545_s0 + $0x78] sm:$0xff]  ;;  %v588_v54 = vmax.f32 %v557_v5, 0.0  ;;  %v594_v61 = vmax.f32 %v474_v59, 0.0  ;;  %s2288_s0 = smov [#allocation4]  }
  0xf5   :  { %921 = vmatprep.mubr.f32.mxu1 %v580_v2  ;;  %1012 = vmatpush1.msra.mxu0 %v1852_v53  ;;  %v587_v7 = vmax.f32 %v555_v58, 0.0  ;;  %v596_v53 = vmax.f32 %v563_v18, 0.0  ;;  %v593_v2 = vmax.f32 %v472_v62, 0.0  ;;  %v595_v5 = vmax.f32 %v561_v17, 0.0  ;;  %s1821_s29 = sshll.u32 %s2288_s0, 4  ;;  %s1822_s29 = int_to_ptr.vmem [resolvable:$true] %s1821_s29 }
  0xf6   :  { %1100 = vmatprep.subr.mxu1 %v1855_v57  ;;  %1189 = vmatprep.subr.mxu0 %v1857_v6  ;;  %s2241_s30 = scalar_lea.vmem %s1822_s29, 32  ;;  %p2246_p1 = scmp.lt.s32.totalorder %s1822_s29, %s1822_s29 }
  0xf7   :  { %1101 = vmatpush1.msra.mxu1 %v1854_v3  ;;  %837 = vmatmul.mubr.f32.gmra.mxu0 %v577_v63  ;;  %v3746_v63 = vmov 0.0   ;;  %p2242_p0 = scmp.ne.s32.totalorder %s1822_s29, %s2241_s30  ;;  %p2247_p2 = scmp.lt.s32.totalorder %s2241_s30, %s2241_s30 }
  0xf8   :  { %922 = vmatmul.mubr.f32.gmra.mxu1 %v579_v12  ;;  %841 = vmatprep.mubr.f32.mxu0 %v586_v55 }
  0xf9   :  { %926 = vmatprep.mubr.f32.mxu1 %v588_v54  ;;  %1278 = vmatprep.subr.mxu1 %v1859_v51  ;;  %p2248_p3 = por %p2247_p2, %p2246_p1 }
  0xfb   :  { %842 = vmatmul.mubr.f32.gmra.mxu0 %v585_v52  ;;  %p2249_p4 = pnand %p2248_p3, %p2242_p0 }
  0xfc   :  { %927 = vmatmul.mubr.f32.gmra.mxu1 %v587_v7  ;;  %846 = vmatprep.mubr.f32.mxu0 %v594_v61 }
  0xfd   :  { %931 = vmatprep.mubr.f32.mxu1 %v596_v53 }
  0xff   :  { %847 = vmatmul.mubr.f32.gmra.mxu0 %v593_v2 }
 0x100   :  { %932 = vmatmul.mubr.f32.gmra.mxu1 %v595_v5  ;;  %1045 = vmatprep.mubr.f32.mxu0 %v3746_v63 }
 0x101   :  { %1134 = vmatprep.mubr.f32.mxu1 %v3746_v63 }
 0x103   :  { %1860 = vmatmul.mubr.msk.f32.vlgmr.msra.gmra.mxu0 %vm196_vm0, %v2347_v4 }
 0x104   :  { %1864 = vmatmul.mubr.msk.f32.vlgmr.msra.gmra.mxu1 %vm196_vm0, %v2347_v4  ;;  %1051 = vmatprep.mubr.f32.mxu0 %v3746_v63 }
 0x105   :  { %1140 = vmatprep.mubr.f32.mxu1 %v3746_v63  ;;  %1190 = vmatpush1.msra.mxu0 %v1856_v1 }
 0x106   :  { %1279 = vmatpush1.msra.mxu1 %v1858_v60  ;;  %2056 = vmatprep.subr.mxu0 %v2394_v15  ;;  %v3750_v15 = vld [vmem:[#allocation11_spill] sm:$0xff] }
 0x107   :  { %1861 = vmatmul.mubr.msk.f32.gmra.mxu0 %vm196_vm0, %v2372_v10  ;;  %2100 = vmatprep.subr.mxu1 %v2399_v16  ;;  %v3751_v16 = vld [vmem:[#allocation12_spill] sm:$0xff] }
 0x108   :  { %1865 = vmatmul.mubr.msk.f32.gmra.mxu1 %vm196_vm0, %v2372_v10  ;;  %1057 = vmatprep.mubr.f32.mxu0 %v3746_v63 }
 0x109   :  { %1146 = vmatprep.mubr.f32.mxu1 %v3746_v63 }
 0x10b   :  { %1862 = vmatmul.mubr.msk.f32.gmra.mxu0 %vm196_vm0, %v2389_v13 }
 0x10c   :  { %1866 = vmatmul.mubr.msk.f32.gmra.mxu1 %vm196_vm0, %v2389_v13  ;;  %1063 = vmatprep.mubr.f32.mxu0 %v3746_v63 }
 0x10d   :  { %1152 = vmatprep.mubr.f32.mxu1 %v3746_v63 }
 0x10f   :  { %1863 = vmatmul.mubr.msk.f32.gmra.mxu0 %vm196_vm0, %v2416_v19 }
 0x110   :  { %1867 = vmatmul.mubr.msk.f32.gmra.mxu1 %vm196_vm0, %v2416_v19  ;;  %1223 = vmatprep.mubr.f32.mxu0 %v3746_v63 }
 0x111   :  { %1312 = vmatprep.mubr.f32.mxu1 %v3746_v63 }
 0x113   :  { %1868 = vmatmul.mubr.msk.f32.vlgmr.msra.gmra.mxu0 %vm196_vm0, %v2347_v4 }
 0x114   :  { %1872 = vmatmul.mubr.msk.f32.vlgmr.msra.gmra.mxu1 %vm196_vm0, %v2347_v4  ;;  %1229 = vmatprep.mubr.f32.mxu0 %v3746_v63  ;;  %v3747_v4 = vld [vmem:[#allocation8_spill] sm:$0xff] }
 0x115   :  { %1318 = vmatprep.mubr.f32.mxu1 %v3746_v63  ;;  %2057 = vmatpush3.msra.mxu0 %v2429_v20  ;;  %v3753_v20 = vld [vmem:[#allocation14_spill] sm:$0xff] }
 0x116   :  { %2101 = vmatpush3.msra.mxu1 %v2434_v21  ;;  %2058 = vmatprep.subr.mxu0 %v2443_v22  ;;  %v3754_v21 = vld [vmem:[#allocation15_spill] sm:$0xff]  ;;  %v3755_v22 = vld [vmem:[#allocation16_spill] sm:$0xff] }
 0x117   :  { %1869 = vmatmul.mubr.msk.f32.gmra.mxu0 %vm196_vm0, %v2372_v10  ;;  %2102 = vmatprep.subr.mxu1 %v2448_v23  ;;  %v3756_v23 = vld [vmem:[#allocation17_spill] sm:$0xff] }
 0x118   :  { %1873 = vmatmul.mubr.msk.f32.gmra.mxu1 %vm196_vm0, %v2372_v10  ;;  %1235 = vmatprep.mubr.f32.mxu0 %v3746_v63  ;;  %v3748_v10 = vld [vmem:[#allocation9_spill] sm:$0xff] }
 0x119   :  { %1324 = vmatprep.mubr.f32.mxu1 %v3746_v63  ;;  %2059 = vmatpush3.msra.mxu0 %v2459_v24  ;;  %v3757_v24 = vld [vmem:[#allocation18_spill] sm:$0xff] }
 0x11a   :  { %2103 = vmatpush3.msra.mxu1 %v2464_v25  ;;  %2060 = vmatprep.subr.mxu0 %v2473_v26  ;;  %v3758_v25 = vld [vmem:[#allocation19_spill] sm:$0xff]  ;;  %v3759_v26 = vld [vmem:[#allocation20_spill] sm:$0xff] }
 0x11b   :  { %1870 = vmatmul.mubr.msk.f32.gmra.mxu0 %vm196_vm0, %v2389_v13  ;;  %2104 = vmatprep.subr.mxu1 %v2478_v27  ;;  %v3760_v27 = vld [vmem:[#allocation21_spill] sm:$0xff] }
 0x11c   :  { %1874 = vmatmul.mubr.msk.f32.gmra.mxu1 %vm196_vm0, %v2389_v13  ;;  %1241 = vmatprep.mubr.f32.mxu0 %v3746_v63  ;;  %v3749_v13 = vld [vmem:[#allocation10_spill] sm:$0xff] }
 0x11d   :  { %1330 = vmatprep.mubr.f32.mxu1 %v3746_v63  ;;  %2061 = vmatpush3.msra.mxu0 %v2489_v28  ;;  %v3761_v28 = vld [vmem:[#allocation22_spill] sm:$0xff] }
 0x11e   :  { %2105 = vmatpush3.msra.mxu1 %v2494_v29  ;;  %2062 = vmatprep.subr.mxu0 %v2503_v30  ;;  %v3762_v29 = vld [vmem:[#allocation23_spill] sm:$0xff]  ;;  %v3763_v30 = vld [vmem:[#allocation24_spill] sm:$0xff] }
 0x11f   :  { %1871 = vmatmul.mubr.msk.f32.gmra.mxu0 %vm196_vm0, %v2416_v19  ;;  %2106 = vmatprep.subr.mxu1 %v2508_v31  ;;  %v3764_v31 = vld [vmem:[#allocation25_spill] sm:$0xff] }
 0x120   :  { %1875 = vmatmul.mubr.msk.f32.gmra.mxu1 %vm196_vm0, %v2416_v19  ;;  %2063 = vmatpush3.msra.mxu0 %v2517_v32  ;;  %v3752_v19 = vld [vmem:[#allocation13_spill] sm:$0xff]  ;;  %v3765_v32 = vld [vmem:[#allocation26_spill] sm:$0xff] }
 0x121   :  { %2107 = vmatpush3.msra.mxu1 %v2522_v33  ;;  %2064 = vmatprep.subr.mxu0 %v2529_v34  ;;  %v3766_v33 = vld [vmem:[#allocation27_spill] sm:$0xff]  ;;  %v3767_v34 = vld [vmem:[#allocation28_spill] sm:$0xff] }
 0x122   :  { %2108 = vmatprep.subr.mxu1 %v2534_v35  ;;  %2065 = vmatpush3.msra.mxu0 %v2543_v36  ;;  %v3768_v35 = vld [vmem:[#allocation29_spill] sm:$0xff]  ;;  %v3769_v36 = vld [vmem:[#allocation30_spill] sm:$0xff] }
 0x123   :  { %2109 = vmatpush3.msra.mxu1 %v2548_v37  ;;  %2066 = vmatprep.subr.mxu0 %v2555_v38  ;;  %v3770_v37 = vld [vmem:[#allocation31_spill] sm:$0xff]  ;;  %v3771_v38 = vld [vmem:[#allocation32_spill] sm:$0xff] }
 0x124   :  { %2110 = vmatprep.subr.mxu1 %v2560_v39  ;;  %2067 = vmatpush3.msra.mxu0 %v2567_v40  ;;  %v3772_v39 = vld [vmem:[#allocation33_spill] sm:$0xff]  ;;  %v3773_v40 = vld [vmem:[#allocation34_spill] sm:$0xff] }
 0x125   :  { %2111 = vmatpush3.msra.mxu1 %v2572_v41  ;;  %2068 = vmatprep.subr.mxu0 %v2579_v42  ;;  %v3774_v41 = vld [vmem:[#allocation35_spill] sm:$0xff]  ;;  %v3775_v42 = vld [vmem:[#allocation36_spill] sm:$0xff] }
 0x126   :  { %2112 = vmatprep.subr.mxu1 %v2584_v43  ;;  %2069 = vmatpush3.msra.mxu0 %v2591_v44  ;;  %v3776_v43 = vld [vmem:[#allocation37_spill] sm:$0xff]  ;;  %v3777_v44 = vld [vmem:[#allocation38_spill] sm:$0xff] }
 0x127   :  { %2113 = vmatpush3.msra.mxu1 %v2596_v45  ;;  %2070 = vmatprep.subr.mxu0 %v2603_v46  ;;  %v3778_v45 = vld [vmem:[#allocation39_spill] sm:$0xff]  ;;  %v3779_v46 = vld [vmem:[#allocation40_spill] sm:$0xff] }
 0x128   :  { %2114 = vmatprep.subr.mxu1 %v2608_v47  ;;  %2071 = vmatpush3.msra.mxu0 %v2615_v48 }
 0x129   :  { %2115 = vmatpush3.msra.mxu1 %v2620_v49  ;;  %2072 = vmatprep.subr.mxu0 %v2627_v50 }
 0x12a   :  { %2116 = vmatprep.subr.mxu1 %v3747_v4  ;;  %2073 = vmatpush3.msra.mxu0 %v3748_v10 }
 0x12b   :  { %2117 = vmatpush3.msra.mxu1 %v3749_v13  ;;  %2074 = vmatprep.subr.mxu0 %v3750_v15 }
 0x12c   :  { %2118 = vmatprep.subr.mxu1 %v3751_v16  ;;  %2075 = vmatpush3.msra.mxu0 %v3752_v19 }
 0x12d   :  { %2119 = vmatpush3.msra.mxu1 %v3753_v20  ;;  %2076 = vmatprep.subr.mxu0 %v3754_v21 }
 0x12e   :  { %2120 = vmatprep.subr.mxu1 %v3755_v22  ;;  %2077 = vmatpush3.msra.mxu0 %v3756_v23 }
 0x12f   :  { %2121 = vmatpush3.msra.mxu1 %v3757_v24  ;;  %2078 = vmatprep.subr.mxu0 %v3758_v25 }
 0x130   :  { %2122 = vmatprep.subr.mxu1 %v3759_v26  ;;  %2079 = vmatpush3.msra.mxu0 %v3760_v27 }
 0x131   :  { %2123 = vmatpush3.msra.mxu1 %v3761_v28  ;;  %2080 = vmatprep.subr.mxu0 %v3762_v29 }
 0x132   :  { %2124 = vmatprep.subr.mxu1 %v3763_v30  ;;  %2081 = vmatpush3.msra.mxu0 %v3764_v31 }
 0x133   :  { %2125 = vmatpush3.msra.mxu1 %v3765_v32  ;;  %2082 = vmatprep.subr.mxu0 %v3766_v33 }
 0x134   :  { %2126 = vmatprep.subr.mxu1 %v3767_v34  ;;  %2083 = vmatpush3.msra.mxu0 %v3768_v35 }
 0x135   :  { %2127 = vmatpush3.msra.mxu1 %v3769_v36  ;;  %2084 = vmatprep.subr.mxu0 %v3770_v37 }
 0x136   :  { %2128 = vmatprep.subr.mxu1 %v3771_v38  ;;  %2085 = vmatpush3.msra.mxu0 %v3772_v39 }
 0x137   :  { %2129 = vmatpush3.msra.mxu1 %v3773_v40  ;;  %2086 = vmatprep.subr.mxu0 %v3774_v41 }
 0x138   :  { %2130 = vmatprep.subr.mxu1 %v3775_v42  ;;  %2087 = vmatpush3.msra.mxu0 %v3776_v43 }
 0x139   :  { %2131 = vmatpush3.msra.mxu1 %v3777_v44  ;;  %2144 = vmatprep.subr.mxu0 %v3778_v45 }
 0x13a   :  { %2188 = vmatprep.subr.mxu1 %v3779_v46 }
 0x18c   :  { %v1912_v47 = vpop.f32.mrf.mxu0  ;;  %v1956_v48 = vpop.f32.mrf.mxu1 }
 0x18e   :  { %v1913_v49 = vpop.f32.mrf.mxu0  ;;  %v1957_v50 = vpop.f32.mrf.mxu1 }
 0x18f   :  { %v1914_v2 = vadd.f32 %v1913_v49, %v1912_v47  ;;  %v1958_v5 = vadd.f32 %v1957_v50, %v1956_v48  ;;  %v3780_v50 = vld [vmem:[#allocation41_spill] sm:$0xff] }
 0x191   :  { %v749_v10 = vadd.f32 %v1958_v5, %v1914_v2 }
 0x192   :  { %v1915_v59 = vpop.f32.mrf.mxu0  ;;  %v1959_v55 = vpop.f32.mrf.mxu1 }
 0x194   :  { %v1916_v57 = vpop.f32.mrf.mxu0  ;;  %v1960_v6 = vpop.f32.mrf.mxu1 }
 0x195   :  { %v1917_v13 = vadd.f32 %v1916_v57, %v1915_v59  ;;  %v1961_v15 = vadd.f32 %v1960_v6, %v1959_v55 }
 0x197   :  { %v754_v24 = vadd.f32 %v1961_v15, %v1917_v13  ;;  %v3782_v13 = vld [vmem:[#allocation43_spill] sm:$0xff]  ;;  %v3783_v15 = vld [vmem:[#allocation44_spill] sm:$0xff] }
 0x19a   :  { %v1918_v9 = vpop.f32.mrf.mxu0  ;;  %v1962_v3 = vpop.f32.mrf.mxu1 }
 0x19c   :  { %v1919_v8 = vpop.f32.mrf.mxu0  ;;  %v1963_v12 = vpop.f32.mrf.mxu1 }
 0x19d   :  { %v1920_v58 = vadd.f32 %v1919_v8, %v1918_v9  ;;  %v1964_v51 = vadd.f32 %v1963_v12, %v1962_v3 }
 0x19f   :  { %v759_v54 = vadd.f32 %v1964_v51, %v1920_v58 }
 0x1a0   :  { %v1921_v18 = vpop.f32.mrf.mxu0  ;;  %v1965_v52 = vpop.f32.mrf.mxu1 }
 0x1a2   :  { %v1922_v62 = vpop.f32.mrf.mxu0  ;;  %v1966_v7 = vpop.f32.mrf.mxu1 }
 0x1a3   :  { %v1923_v17 = vadd.f32 %v1922_v62, %v1921_v18  ;;  %v1967_v61 = vadd.f32 %v1966_v7, %v1965_v52 }
 0x1a5   :  { %v764_v53 = vadd.f32 %v1967_v61, %v1923_v17 }
 0x1b3   :  { %v2000_v63 = vpop.f32.mrf.mxu0  ;;  %v2044_v1 = vpop.f32.mrf.mxu1 }
 0x1b5   :  { %v2001_v60 = vpop.f32.mrf.mxu0  ;;  %v2045_v4 = vpop.f32.mrf.mxu1 }
 0x1b6   :  { %v2002_v16 = vadd.f32 %v2001_v60, %v2000_v63  ;;  %v2046_v21 = vadd.f32 %v2045_v4, %v2044_v1  ;;  %v3781_v4 = vld [vmem:[#allocation42_spill] sm:$0xff] }
 0x1b7   :  { %v2003_v19 = vpop.f32.mrf.mxu0 }
 0x1b8   :  { %v834_v20 = vadd.f32 %v2002_v16, %v749_v10  ;;  %v2047_v22 = vpop.f32.mrf.mxu1 }
 0x1b9   :  { %v2004_v23 = vpop.f32.mrf.mxu0 }
 0x1ba   :  { %v2005_v25 = vadd.f32 %v2004_v23, %v2003_v19  ;;  %v2048_v26 = vpop.f32.mrf.mxu1  ;;  %v919_v27 = vadd.f32 %v2046_v21, %v834_v20  ;;  %v3784_v19 = vld [vmem:[#allocation45_spill] sm:$0xff] }
 0x1bb   :  { %v2006_v28 = vpop.f32.mrf.mxu0  ;;  %v2049_v30 = vadd.f32 %v2048_v26, %v2047_v22  ;;  %v3785_v22 = vld [vmem:[#allocation46_spill] sm:$0xff] }
 0x1bc   :  { %v839_v29 = vadd.f32 %v2005_v25, %v754_v24  ;;  %v2050_v31 = vpop.f32.mrf.mxu1  ;;  %946 = vadd.xlane.f32.xlu0 %v919_v27  ;;  %v3786_v25 = vld [vmem:[#allocation47_spill] sm:$0xff] }
 0x1bd   :  { %v2007_v32 = vpop.f32.mrf.mxu0 }
 0x1be   :  { %v2008_v33 = vadd.f32 %v2007_v32, %v2006_v28  ;;  %v2051_v34 = vpop.f32.mrf.mxu1  ;;  %v924_v35 = vadd.f32 %v2049_v30, %v839_v29  ;;  %v3787_v28 = vld [vmem:[#allocation48_spill] sm:$0xff]  ;;  %v3788_v32 = vld [vmem:[#allocation49_spill] sm:$0xff] }
 0x1bf   :  { %v2052_v36 = vadd.f32 %v2051_v34, %v2050_v31  ;;  %v2009_v37 = vpop.f32.mrf.mxu0 }
 0x1c0   :  { %v844_v38 = vadd.f32 %v2008_v33, %v759_v54  ;;  %v2053_v39 = vpop.f32.mrf.mxu1  ;;  %948 = vadd.xlane.f32.xlu0 %v924_v35  ;;  %v937_v40 = vadd.f32 %v924_v35, %v919_v27 }
 0x1c1   :  { %v2010_v41 = vpop.f32.mrf.mxu0 }
 0x1c2   :  { %v2011_v42 = vadd.f32 %v2010_v41, %v2009_v37  ;;  %v2054_v43 = vpop.f32.mrf.mxu1  ;;  %v3400_v44 = vadd.f32 %v2052_v36, %v844_v38  ;;  %v3789_v36 = vld [vmem:[#allocation50_spill] sm:$0xff]  ;;  %v3790_v38 = vld [vmem:[#allocation51_spill] sm:$0xff] }
 0x1c3   :  { %v2055_v45 = vadd.f32 %v2054_v43, %v2053_v39  ;;  %v1047_v46 = vpop.f32.mrf.mxu0  ;;  %v3791_v39 = vld [vmem:[#allocation52_spill] sm:$0xff] }
 0x1c4   :  { %v849_v47 = vadd.f32 %v2011_v42, %v764_v53  ;;  %v1136_v48 = vpop.f32.mrf.mxu1  ;;  %v938_v49 = vadd.f32 %v937_v40, %v3400_v44  ;;  %v1048_v59 = vadd.f32 %v1047_v46, %v3780_v50  ;;  %v3792_v42 = vld [vmem:[#allocation53_spill] sm:$0xff] }
 0x1c5   :  { %v1049_v55 = vpop.f32.mrf.mxu0  ;;  %v1137_v57 = vadd.f32 %v1136_v48, %v3780_v50  ;;  %v3794_v48 = vld [vmem:[#allocation55_spill] sm:$0xff] }
 0x1c6   :  { %v1050_v6 = vadd.f32 %v1049_v55, %v3780_v50  ;;  %v1138_v9 = vpop.f32.mrf.mxu1  ;;  %v3406_v3 = vadd.f32 %v2055_v45, %v849_v47  ;;  %v1337_v18 = vmax.f32 %v1048_v59, 0.0  ;;  %v3793_v45 = vld [vmem:[#allocation54_spill] sm:$0xff]  ;;  %v3795_v59 = vld [vmem:[#allocation56_spill] sm:$0xff] }
 0x1c7   :  { %v1139_v8 = vadd.f32 %v1138_v9, %v3780_v50  ;;  %v1053_v12 = vpop.f32.mrf.mxu0  ;;  %v1339_v7 = vmax.f32 %v1137_v57, 0.0 }
 0x1c8   :  { %v1338_v58 = vmax.f32 %v1050_v6, 0.0  ;;  %v1142_v51 = vpop.f32.mrf.mxu1  ;;  %v3410_v54 = vadd.f32 %v938_v49, %v3406_v3  ;;  %v1054_v53 = vadd.f32 %v1053_v12, %v2838_v14  ;;  %v3796_v6 = vld [vmem:[#allocation57_spill] sm:$0xff] }
 0x1c9   :  { %v1340_v52 = vmax.f32 %v1139_v8, 0.0  ;;  %v1055_v62 = vpop.f32.mrf.mxu0  ;;  %v1143_v63 = vadd.f32 %v1142_v51, %v2838_v14 }
 0x1ca   :  { %v1056_v17 = vadd.f32 %v1055_v62, %v2838_v14  ;;  %v1144_v61 = vpop.f32.mrf.mxu1  ;;  %1433 = vmatprep.mubr.f32.mxu0 %v1338_v58  ;;  %v1345_v23 = vmax.f32 %v1054_v53, 0.0  ;;  %v3797_v58 = vld [vmem:[#allocation58_spill] sm:$0xff]  ;;  %v3800_v62 = vld [vmem:[#allocation61_spill] sm:$0xff] }
 0x1cb   :  { %v1145_v2 = vadd.f32 %v1144_v61, %v2838_v14  ;;  %1518 = vmatprep.mubr.f32.mxu1 %v1340_v52  ;;  %v1059_v5 = vpop.f32.mrf.mxu0  ;;  %1434 = vmatmul.mubr.f32.vlgmr.msra.gmra.mxu0 %v1337_v18  ;;  %v1347_v27 = vmax.f32 %v1143_v63, 0.0  ;;  %v3798_v18 = vld [vmem:[#allocation59_spill] sm:$0xff]  ;;  %v3799_v52 = vld [vmem:[#allocation60_spill] sm:$0xff] }
 0x1cc   :  { %v1346_v1 = vmax.f32 %v1056_v17, 0.0  ;;  %v1148_v60 = vpop.f32.mrf.mxu1  ;;  %1519 = vmatmul.mubr.f32.vlgmr.msra.gmra.mxu1 %v1339_v7  ;;  %2145 = vmatpush3.msra.mxu0 %v3781_v4  ;;  %v1060_v30 = vadd.f32 %v1059_v5, %v2876_v0  ;;  %v3801_v17 = vld [vmem:[#allocation62_spill] sm:$0xff]  ;;  %v3803_v63 = vld [vmem:[#allocation64_spill] sm:$0xff] }
 0x1cd   :  { %v1348_v10 = vmax.f32 %v1145_v2, 0.0  ;;  %2189 = vmatpush3.msra.mxu1 %v3782_v13  ;;  %2146 = vmatprep.subr.mxu0 %v3783_v15  ;;  %v1061_v16 = vpop.f32.mrf.mxu0  ;;  %v1149_v34 = vadd.f32 %v1148_v60, %v2876_v0  ;;  %v3802_v2 = vld [vmem:[#allocation63_spill] sm:$0xff] }
 0x1ce   :  { %2190 = vmatprep.subr.mxu1 %v3784_v19  ;;  %v1062_v20 = vadd.f32 %v1061_v16, %v2876_v0  ;;  %v1150_v21 = vpop.f32.mrf.mxu1  ;;  %2147 = vmatpush3.msra.mxu0 %v3785_v22  ;;  %v1353_v47 = vmax.f32 %v1060_v30, 0.0  ;;  %v3806_v16 = vld [vmem:[#allocation67_spill] sm:$0xff]  ;;  %v3807_v19 = vld [vmem:[#allocation68_spill] sm:$0xff]  ;;  %v3816_v30 = vld [vmem:[#allocation77_spill] sm:$0xff] }
 0x1cf   :  { %v1151_v24 = vadd.f32 %v1150_v21, %v2876_v0  ;;  %2191 = vmatpush3.msra.mxu1 %v3786_v25  ;;  %1438 = vmatprep.mubr.f32.mxu0 %v1346_v1  ;;  %v1065_v26 = vpop.f32.mrf.mxu0  ;;  %v1355_v49 = vmax.f32 %v1149_v34, 0.0  ;;  %v3804_v1 = vld [vmem:[#allocation65_spill] sm:$0xff]  ;;  %v3809_v21 = vld [vmem:[#allocation70_spill] sm:$0xff]  ;;  %v3810_v22 = vld [vmem:[#allocation71_spill] sm:$0xff] }
 0x1d0   :  { %1523 = vmatprep.mubr.f32.mxu1 %v1348_v10  ;;  %2148 = vmatprep.subr.mxu0 %v3787_v28  ;;  %v1154_v29 = vpop.f32.mrf.mxu1  ;;  %v1354_v31 = vmax.f32 %v1062_v20, 0.0  ;;  %v1066_v55 = vadd.f32 %v1065_v26, %v2940_v56  ;;  %v3805_v10 = vld [vmem:[#allocation66_spill] sm:$0xff]  ;;  %v3808_v20 = vld [vmem:[#allocation69_spill] sm:$0xff]  ;;  %v3814_v28 = vld [vmem:[#allocation75_spill] sm:$0xff] }
 0x1d1   :  { %2192 = vmatprep.subr.mxu1 %v3788_v32  ;;  %1439 = vmatmul.mubr.f32.gmra.mxu0 %v1345_v23  ;;  %v1067_v33 = vpop.f32.mrf.mxu0  ;;  %v1356_v35 = vmax.f32 %v1151_v24, 0.0  ;;  %v1155_v8 = vadd.f32 %v1154_v29, %v2940_v56  ;;  %v3811_v23 = vld [vmem:[#allocation72_spill] sm:$0xff]  ;;  %v3812_v25 = vld [vmem:[#allocation73_spill] sm:$0xff] }
 0x1d2   :  { %1524 = vmatmul.mubr.f32.gmra.mxu1 %v1347_v27  ;;  %2149 = vmatpush3.msra.mxu0 %v3789_v36  ;;  %v1156_v37 = vpop.f32.mrf.mxu1  ;;  %v1068_v40 = vadd.f32 %v1067_v33, %v2940_v56  ;;  %v1361_v61 = vmax.f32 %v1066_v55, 0.0  ;;  %v3813_v27 = vld [vmem:[#allocation74_spill] sm:$0xff]  ;;  %v3815_v29 = vld [vmem:[#allocation76_spill] sm:$0xff]  ;;  %v3818_v33 = vld [vmem:[#allocation79_spill] sm:$0xff] }
 0x1d3   :  { %2193 = vmatpush3.msra.mxu1 %v3790_v38  ;;  %2150 = vmatprep.subr.mxu0 %v3791_v39  ;;  %v3432_v41 = vpop.f32.mrf.mxu0  ;;  %v1157_v43 = vadd.f32 %v1156_v37, %v2940_v56  ;;  %v1363_v5 = vmax.f32 %v1155_v8, 0.0  ;;  %v3819_v34 = vld [vmem:[#allocation80_spill] sm:$0xff]  ;;  %v3820_v36 = vld [vmem:[#allocation81_spill] sm:$0xff]  ;;  %v3821_v37 = vld [vmem:[#allocation82_spill] sm:$0xff] }
 0x1d4   :  { %2194 = vmatprep.subr.mxu1 %v3792_v42  ;;  %2151 = vmatpush3.msra.mxu0 %v3793_v45  ;;  %v3437_v46 = vpop.f32.mrf.mxu1  ;;  %v1362_v57 = vmax.f32 %v1068_v40, 0.0  ;;  %v3822_v38 = vld [vmem:[#allocation83_spill] sm:$0xff]  ;;  %v3823_v39 = vld [vmem:[#allocation84_spill] sm:$0xff]  ;;  %v3824_v40 = vld [vmem:[#allocation85_spill] sm:$0xff]  ;;  %v1226_v55 = vadd.f32 %v3432_v41, %v3780_v50 }
 0x1d5   :  { %2195 = vmatpush3.msra.mxu1 %v3794_v48  ;;  %1443 = vmatprep.mubr.f32.mxu0 %v1354_v31  ;;  %v1227_v9 = vpop.f32.mrf.mxu0  ;;  %v1364_v12 = vmax.f32 %v1157_v43, 0.0  ;;  %v3817_v31 = vld [vmem:[#allocation78_spill] sm:$0xff]  ;;  %v3826_v45 = vld [vmem:[#allocation87_spill] sm:$0xff] }
 0x1d6   :  { %1528 = vmatprep.mubr.f32.mxu1 %v1356_v35  ;;  %2152 = vmatprep.subr.mxu0 %v3795_v59  ;;  %v1316_v51 = vpop.f32.mrf.mxu1  ;;  %v1228_v7 = vadd.f32 %v1227_v9, %v3780_v50  ;;  %v3825_v42 = vld [vmem:[#allocation86_spill] sm:$0xff]  ;;  %v1315_v9 = vadd.f32 %v3437_v46, %v3780_v50  ;;  %v3838_v46 = vld [vmem:[#allocation99_spill] sm:$0xff] }
 0x1d7   :  { %2196 = vmatprep.subr.mxu1 %v3796_v6  ;;  %1444 = vmatmul.mubr.f32.gmra.mxu0 %v1353_v47  ;;  %v1317_v53 = vadd.f32 %v1316_v51, %v3780_v50  ;;  %v1231_v4 = vpop.f32.mrf.mxu0  ;;  %v3827_v47 = vld [vmem:[#allocation88_spill] sm:$0xff]  ;;  %v3829_v59 = vld [vmem:[#allocation90_spill] sm:$0xff] }
 0x1d8   :  { %1529 = vmatmul.mubr.f32.gmra.mxu1 %v1355_v49  ;;  %2153 = vmatpush3.msra.mxu0 %v3797_v58  ;;  %v1342_v60 = vmax.f32 %v1228_v7, 0.0  ;;  %v1320_v15 = vpop.f32.mrf.mxu1  ;;  %v3828_v49 = vld [vmem:[#allocation89_spill] sm:$0xff]  ;;  %v3831_v6 = vld [vmem:[#allocation92_spill] sm:$0xff]  ;;  %v3833_v58 = vld [vmem:[#allocation94_spill] sm:$0xff]  ;;  %v1232_v50 = vadd.f32 %v1231_v4, %v2838_v14 }
 0x1d9   :  { %2197 = vmatpush3.msra.mxu1 %v3798_v18  ;;  %2154 = vmatprep.subr.mxu0 %v3799_v52  ;;  %v1344_v13 = vmax.f32 %v1317_v53, 0.0  ;;  %v1233_v24 = vpop.f32.mrf.mxu0  ;;  %v3834_v52 = vld [vmem:[#allocation95_spill] sm:$0xff]  ;;  %v3836_v7 = vld [vmem:[#allocation97_spill] sm:$0xff]  ;;  %v1343_v53 = vmax.f32 %v1315_v9, 0.0 }
 0x1da   :  { %2198 = vmatprep.subr.mxu1 %v3800_v62  ;;  %2155 = vmatpush3.msra.mxu0 %v3801_v17  ;;  %v1322_v26 = vpop.f32.mrf.mxu1  ;;  %v1234_v8 = vadd.f32 %v1233_v24, %v2838_v14  ;;  %v3835_v62 = vld [vmem:[#allocation96_spill] sm:$0xff]  ;;  %v3837_v17 = vld [vmem:[#allocation98_spill] sm:$0xff]  ;;  %v1349_v4 = vmax.f32 %v1232_v50, 0.0 }
 0x1db   :  { %2199 = vmatpush3.msra.mxu1 %v3802_v2  ;;  %1448 = vmatprep.mubr.f32.mxu0 %v1362_v57  ;;  %v1237_v32 = vpop.f32.mrf.mxu0  ;;  %v3830_v57 = vld [vmem:[#allocation91_spill] sm:$0xff]  ;;  %v1323_v51 = vadd.f32 %v1322_v26, %v2838_v14  ;;  %v1321_v2 = vadd.f32 %v1320_v15, %v2838_v14 }
 0x1dc   :  { %1533 = vmatprep.mubr.f32.mxu1 %v1364_v12  ;;  %2156 = vmatprep.subr.mxu0 %v3803_v63  ;;  %v1326_v35 = vpop.f32.mrf.mxu1  ;;  %v3832_v12 = vld [vmem:[#allocation93_spill] sm:$0xff]  ;;  %v1238_v14 = vadd.f32 %v1237_v32, %v2876_v0 }
 0x1dd   :  { %2200 = vmatprep.subr.mxu1 %v3804_v1  ;;  %1449 = vmatmul.mubr.f32.gmra.mxu0 %v1361_v61  ;;  %v1239_v43 = vpop.f32.mrf.mxu0  ;;  %v1341_v61 = vmax.f32 %v1226_v55, 0.0  ;;  %v3839_v1 = vld [vmem:[#allocation100_spill] sm:$0xff]  ;;  %v1351_v15 = vmax.f32 %v1321_v2, 0.0 }
 0x1de   :  { %1534 = vmatmul.mubr.f32.gmra.mxu1 %v1363_v5  ;;  %2157 = vmatpush3.msra.mxu0 %v3805_v10  ;;  %v1328_v48 = vpop.f32.mrf.mxu1  ;;  %v1350_v5 = vmax.f32 %v1234_v8, 0.0  ;;  %v1240_v63 = vadd.f32 %v1239_v43, %v2876_v0  ;;  %v1352_v10 = vmax.f32 %v1323_v51, 0.0 }
 0x1df   :  { %2201 = vmatpush3.msra.mxu1 %v3806_v16  ;;  %2158 = vmatprep.subr.mxu0 %v3807_v19  ;;  %v1243_v18 = vpop.f32.mrf.mxu0  ;;  %v3841_v19 = vld [vmem:[#allocation102_spill] sm:$0xff] }
 0x1e0   :  { %2202 = vmatprep.subr.mxu1 %v3808_v20  ;;  %2159 = vmatpush3.msra.mxu0 %v3809_v21  ;;  %v1332_v41 = vpop.f32.mrf.mxu1  ;;  %v1327_v20 = vadd.f32 %v1326_v35, %v2876_v0  ;;  %v1358_v21 = vmax.f32 %v1240_v63, 0.0  ;;  %v1244_v26 = vadd.f32 %v1243_v18, %v2940_v56 }
 0x1e1   :  { %2203 = vmatpush3.msra.mxu1 %v3810_v22  ;;  %2160 = vmatprep.subr.mxu0 %v3811_v23  ;;  %v1245_v16 = vpop.f32.mrf.mxu0 }
 0x1e2   :  { %1603 = vmatprep.mubr.f32.mxu0 %v1342_v60  ;;  %2204 = vmatprep.subr.mxu1 %v3812_v25  ;;  %v3840_v60 = vld [vmem:[#allocation101_spill] sm:$0xff]  ;;  %v1246_v22 = vadd.f32 %v1245_v16, %v2940_v56  ;;  %v1357_v25 = vmax.f32 %v1238_v14, 0.0 }
 0x1e3   :  { %1688 = vmatprep.mubr.f32.mxu1 %v1344_v13  ;;  %2161 = vmatpush3.msra.mxu0 %v3813_v27  ;;  %v1329_v13 = vadd.f32 %v1328_v48, %v2876_v0  ;;  %v1359_v27 = vmax.f32 %v1327_v20, 0.0  ;;  %v1365_v0 = vmax.f32 %v1244_v26, 0.0 }
 0x1e4   :  { %2205 = vmatpush3.msra.mxu1 %v3814_v28  ;;  %2162 = vmatprep.subr.mxu0 %v3815_v29  ;;  %v1333_v28 = vadd.f32 %v1332_v41, %v2940_v56  ;;  %v1366_v29 = vmax.f32 %v1246_v22, 0.0 }
 0x1e5   :  { %2206 = vmatprep.subr.mxu1 %v3816_v30  ;;  %2163 = vmatpush3.msra.mxu0 %v3817_v31  ;;  %v1360_v23 = vmax.f32 %v1329_v13, 0.0 }
 0x1e6   :  { %2207 = vmatpush3.msra.mxu1 %v3818_v33  ;;  %2164 = vmatprep.subr.mxu0 %v3819_v34  ;;  %v1367_v31 = vmax.f32 %v1333_v28, 0.0 }
 0x1e7   :  { %2208 = vmatprep.subr.mxu1 %v3820_v36  ;;  %2165 = vmatpush3.msra.mxu0 %v3821_v37 }
 0x1e8   :  { %2209 = vmatpush3.msra.mxu1 %v3822_v38  ;;  %2166 = vmatprep.subr.mxu0 %v3823_v39 }
 0x1e9   :  { %2210 = vmatprep.subr.mxu1 %v3824_v40  ;;  %2167 = vmatpush3.msra.mxu0 %v3825_v42 }
 0x1ea   :  { %2211 = vmatpush3.msra.mxu1 %v3826_v45  ;;  %2168 = vmatprep.subr.mxu0 %v3827_v47 }
 0x1eb   :  { %2212 = vmatprep.subr.mxu1 %v3828_v49  ;;  %2169 = vmatpush3.msra.mxu0 %v3829_v59 }
 0x1ec   :  { %2213 = vmatpush3.msra.mxu1 %v3830_v57  ;;  %2170 = vmatprep.subr.mxu0 %v3831_v6 }
 0x1ed   :  { %2214 = vmatprep.subr.mxu1 %v3832_v12  ;;  %2171 = vmatpush3.msra.mxu0 %v3833_v58 }
 0x1ee   :  { %2215 = vmatpush3.msra.mxu1 %v3834_v52  ;;  %2172 = vmatprep.subr.mxu0 %v3835_v62 }
 0x1ef   :  { %2216 = vmatprep.subr.mxu1 %v3836_v7  ;;  %2173 = vmatpush3.msra.mxu0 %v3837_v17 }
 0x1f0   :  { %2217 = vmatpush3.msra.mxu1 %v3214_v11  ;;  %2174 = vmatprep.subr.mxu0 %v3838_v46  ;;  %v1334_v11 = vpop.f32.mrf.mxu1 }
 0x1f1   :  { %2218 = vmatprep.subr.mxu1 %v3839_v1  ;;  %2175 = vmatpush3.msra.mxu0 %v3840_v60  ;;  %v1335_v24 = vadd.f32 %v1334_v11, %v2940_v56 }
 0x1f2   :  { %2219 = vmatpush3.msra.mxu1 %v3841_v19  ;;  %1604 = vmatmul.mubr.f32.vlgmr.msra.gmra.mxu0 %v1341_v61 }
 0x1f3   :  { %1689 = vmatmul.mubr.f32.vlgmr.msra.gmra.mxu1 %v1343_v53  ;;  %1608 = vmatprep.mubr.f32.mxu0 %v1350_v5  ;;  %v1368_v30 = vmax.f32 %v1335_v24, 0.0 }
 0x1f4   :  { %1693 = vmatprep.mubr.f32.mxu1 %v1352_v10 }
 0x1f6   :  { %1609 = vmatmul.mubr.f32.gmra.mxu0 %v1349_v4 }
 0x1f7   :  { %1694 = vmatmul.mubr.f32.gmra.mxu1 %v1351_v15  ;;  %1613 = vmatprep.mubr.f32.mxu0 %v1358_v21  ;;  %v940_v21 = vrot.slane %v3410_v54, 4 }
 0x1f8   :  { %1698 = vmatprep.mubr.f32.mxu1 %v1360_v23 }
 0x1fa   :  { %1614 = vmatmul.mubr.f32.gmra.mxu0 %v1357_v25 }
 0x1fb   :  { %1699 = vmatmul.mubr.f32.gmra.mxu1 %v1359_v27  ;;  %1618 = vmatprep.mubr.f32.mxu0 %v1366_v29 }
 0x1fc   :  { %1703 = vmatprep.mubr.f32.mxu1 %v1368_v30  ;;  %v941_v30 = vadd.f32 %v940_v21, %v3410_v54 }
 0x1fe   :  { %1619 = vmatmul.mubr.f32.gmra.mxu0 %v1365_v0 }
 0x1ff   :  { %1704 = vmatmul.mubr.f32.gmra.mxu1 %v1367_v31 }
 0x28b   :  { %v2088_v32 = vpop.f32.mrf.mxu0 }
 0x28c   :  { %v2132_v33 = vpop.f32.mrf.mxu1 }
 0x28d   :  { %v2089_v34 = vpop.f32.mrf.mxu0 }
 0x28e   :  { %v2133_v35 = vpop.f32.mrf.mxu1  ;;  %v2090_v49 = vadd.f32 %v2089_v34, %v2088_v32 }
 0x28f   :  { %v2134_v59 = vadd.f32 %v2133_v35, %v2132_v33  ;;  %v942_v35 = vrot.slane %v941_v30, 2 }
 0x291   :  { %v2091_v36 = vpop.f32.mrf.mxu0  ;;  %v1521_v8 = vadd.f32 %v2134_v59, %v2090_v49 }
 0x292   :  { %v2135_v37 = vpop.f32.mrf.mxu1 }
 0x293   :  { %v2092_v38 = vpop.f32.mrf.mxu0 }
 0x294   :  { %v2136_v39 = vpop.f32.mrf.mxu1  ;;  %v2093_v12 = vadd.f32 %v2092_v38, %v2091_v36 }
 0x295   :  { %v2137_v58 = vadd.f32 %v2136_v39, %v2135_v37  ;;  %v1753_v39 = vlaneseq }
 0x297   :  { %v2094_v40 = vpop.f32.mrf.mxu0  ;;  %v1526_v46 = vadd.f32 %v2137_v58, %v2093_v12  ;;  %v1754_v54 = vshrl.u32 %v1753_v39, 7 }
 0x298   :  { %v2138_v56 = vpop.f32.mrf.mxu1 }
 0x299   :  { %v2095_v42 = vpop.f32.mrf.mxu0 }
 0x29a   :  { %v2139_v43 = vpop.f32.mrf.mxu1  ;;  %v2096_v17 = vadd.f32 %v2095_v42, %v2094_v40  ;;  %v943_v40 = vadd.f32 %v942_v35, %v941_v30 }
 0x29b   :  { %v2140_v61 = vadd.f32 %v2139_v43, %v2138_v56 }
 0x29d   :  { %v2097_v45 = vpop.f32.mrf.mxu0  ;;  %v1531_v13 = vadd.f32 %v2140_v61, %v2096_v17 }
 0x29e   :  { %v2141_v47 = vpop.f32.mrf.mxu1 }
 0x29f   :  { %v2098_v48 = vpop.f32.mrf.mxu0 }
 0x2a0   :  { %v2142_v55 = vpop.f32.mrf.mxu1  ;;  %v2099_v19 = vadd.f32 %v2098_v48, %v2097_v45  ;;  %v944_v45 = vrot.slane %v943_v40, 1 }
 0x2a1   :  { %v2143_v11 = vadd.f32 %v2142_v55, %v2141_v47 }
 0x2a3   :  { %v1536_v26 = vadd.f32 %v2143_v11, %v2099_v19 }
 0x2b2   :  { %v2176_v57 = vpop.f32.mrf.mxu0 }
 0x2b3   :  { %v2220_v6 = vpop.f32.mrf.mxu1 }
 0x2b4   :  { %v2177_v9 = vpop.f32.mrf.mxu0 }
 0x2b5   :  { %v2178_v51 = vadd.f32 %v2177_v9, %v2176_v57  ;;  %v2221_v18 = vpop.f32.mrf.mxu1 }
 0x2b6   :  { %v2179_v52 = vpop.f32.mrf.mxu0  ;;  %v2222_v41 = vadd.f32 %v2221_v18, %v2220_v6 }
 0x2b7   :  { %v1606_v62 = vadd.f32 %v2178_v51, %v1521_v8  ;;  %v2223_v7 = vpop.f32.mrf.mxu1 }
 0x2b8   :  { %v2180_v50 = vpop.f32.mrf.mxu0 }
 0x2b9   :  { %v2181_v53 = vadd.f32 %v2180_v50, %v2179_v52  ;;  %v2224_v2 = vpop.f32.mrf.mxu1  ;;  %v1691_v5 = vadd.f32 %v2222_v41, %v1606_v62 }
 0x2ba   :  { %v2182_v63 = vpop.f32.mrf.mxu0  ;;  %v2225_v60 = vadd.f32 %v2224_v2, %v2223_v7 }
 0x2bb   :  { %v1611_v1 = vadd.f32 %v2181_v53, %v1526_v46  ;;  %v2226_v10 = vpop.f32.mrf.mxu1  ;;  %1718 = vadd.xlane.f32.xlu0 %v1691_v5 }
 0x2bc   :  { %v2183_v16 = vpop.f32.mrf.mxu0 }
 0x2bd   :  { %v2184_v4 = vadd.f32 %v2183_v16, %v2182_v63  ;;  %v2227_v14 = vpop.f32.mrf.mxu1  ;;  %v1696_v15 = vadd.f32 %v2225_v60, %v1611_v1 }
 0x2be   :  { %v2185_v20 = vpop.f32.mrf.mxu0  ;;  %v2228_v23 = vadd.f32 %v2227_v14, %v2226_v10 }
 0x2bf   :  { %v1616_v22 = vadd.f32 %v2184_v4, %v1531_v13  ;;  %v2229_v24 = vpop.f32.mrf.mxu1  ;;  %1720 = vadd.xlane.f32.xlu1 %v1696_v15  ;;  %950 = vadd.xlane.f32.xlu0 %v3400_v44  ;;  %v1709_v0 = vadd.f32 %v1696_v15, %v1691_v5  ;;  %v2287_v44 = vmov 1966171168  }
 0x2c0   :  { %v2186_v25 = vpop.f32.mrf.mxu0  ;;  %v1751_v38 = vunpack.c.l.s4 %v2287_v44 }
 0x2c1   :  { %v2187_v27 = vadd.f32 %v2186_v25, %v2185_v20  ;;  %v2230_v28 = vpop.f32.mrf.mxu1  ;;  %v1701_v29 = vadd.f32 %v2228_v23, %v1616_v22 }
 0x2c2   :  { %v2231_v32 = vadd.f32 %v2230_v28, %v2229_v24  ;;  %v1752_v43 = vunpack.c.0.s8 %v1751_v38 }
 0x2c3   :  { %v1621_v31 = vadd.f32 %v2187_v27, %v1536_v26  ;;  %1722 = vadd.xlane.f32.xlu1 %v1701_v29  ;;  %952 = vadd.xlane.f32.xlu0 %v3406_v3  ;;  %v1710_v33 = vadd.f32 %v1709_v0, %v1701_v29  ;;  %v945_v3 = vadd.f32 %v944_v45, %v943_v40 }
 0x2c4   :  { %v3512_v49 = vsub.s32 %v1752_v43, %v1754_v54 }
 0x2c5   :  { %v1706_v34 = vadd.f32 %v2231_v32, %v1621_v31 }
 0x2c7   :  { %1724 = vadd.xlane.f32.xlu1 %v1706_v34  ;;  %v1711_v36 = vadd.f32 %v1710_v33, %v1706_v34 }
 0x2c9   :  { %v1712_v37 = vrot.slane %v1711_v36, 4 }
 0x2cb   :  { %v1713_v56 = vadd.f32 %v1712_v37, %v1711_v36 }
 0x2cd   :  { %v1714_v42 = vrot.slane %v1713_v56, 2 }
 0x2cf   :  { %v1715_v47 = vadd.f32 %v1714_v42, %v1713_v56 }
 0x2d1   :  { %v1716_v48 = vrot.slane %v1715_v47, 1 }
 0x2d3   :  { %v1717_v59 = vadd.f32 %v1716_v48, %v1715_v47 }
 0x2d5   :  { %v1776_v55 = vsel %vm1747_vm1, %v945_v3, %v1717_v59 }
 0x2d6   :  { %v1784_v57 = vrot.slane %v1776_v55, %v3512_v49 }
 0x2d8   :  { %v1785_v6 = vcombine.high %v1784_v57, %v1784_v57  ;;  %1878 = vst.sshfl [vmem:[#allocation4] sm:$0x1 pattern:$0x73625140] %v1784_v57 }
 0x2da   :  { %1879 = vst.sshfl [vmem:[#allocation4 + $0x1] sm:$0x1 pattern:$0x73625140] %v1785_v6 }
 0x2db   :  { %2252 = shalt.err (!%p2249_p4)
}
 0x2dc   :  { %s2289_s8 = smov 16   ;;  %s2290_s9 = smov 1   ;;  %v947_v9 = vpop.xlane.xlu0 %946  ;;  %v36_v51 = vld [vmem:[%s3548_s3 + $0x8] sm:$0xff]  ;;  %v35_v52 = vld [vmem:[%s3548_s3] sm:$0xff]  ;;  %v37_v41 = vld [vmem:[%s3548_s3 + $0x10] sm:$0xff] }
 0x2dd   :  { %1827 = dma.vmem_to_hbm [thread:$0]  %s1822_s29, 32, %s3552_s7, [#allocation5], %s2289_s8, %s2289_s8, %s2290_s9   ;;  %v954_v18 = vmul.f32 0.015625, %v947_v9 }
 0x2de   :  { %v38_v63 = vld [vmem:[%s3548_s3 + $0x18] sm:$0xff]  ;;  %v39_v37 = vld [vmem:[%s3549_s4] sm:$0x1]  ;;  %s2291_s17 = smov [#allocation2]  }
 0x2df   :  { %v958_v46 = vmul.f32 %v954_v18, %v35_v52  ;;  %s1809_s18 = sshll.u32 %s2291_s17, 4  ;;  %s1810_s18 = int_to_ptr.vmem [resolvable:$true] %s1809_s18 }
 0x2e0   :  { %v949_v8 = vpop.xlane.xlu0 %948  ;;  %s2261_s19 = scalar_lea.vmem %s1810_s18, 32  ;;  %p2266_p6 = scmp.lt.s32.totalorder %s1810_s18, %s1810_s18 }
 0x2e1   :  { %v955_v58 = vmul.f32 0.015625, %v949_v8  ;;  %p2262_p5 = scmp.ne.s32.totalorder %s1810_s18, %s2261_s19  ;;  %p2267_p7 = scmp.lt.s32.totalorder %s2261_s19, %s2261_s19 }
 0x2e3   :  { %v959_v17 = vmul.f32 %v955_v58, %v36_v51  ;;  %p2268_p8 = por %p2267_p7, %p2266_p6 }
 0x2e5   :  { %v962_v60 = vadd.f32 %v959_v17, %v958_v46  ;;  %p2269_p9 = pnand %p2268_p8, %p2262_p5 }
 0x344   :  { %v1719_v12 = vpop.xlane.xlu0 %1718 }
 0x345   :  { %v1726_v53 = vmul.f32 0.015625, %v1719_v12 }
 0x347   :  { %v1730_v19 = vmul.f32 %v1726_v53, %v35_v52 }
 0x348   :  { %v1721_v62 = vpop.xlane.xlu1 %1720  ;;  %v951_v7 = vpop.xlane.xlu0 %950 }
 0x349   :  { %v1727_v61 = vmul.f32 0.015625, %v1721_v62  ;;  %v956_v50 = vmul.f32 0.015625, %v951_v7 }
 0x34b   :  { %v960_v2 = vmul.f32 %v956_v50, %v37_v41  ;;  %v1731_v10 = vmul.f32 %v1727_v61, %v36_v51 }
 0x34c   :  { %v1723_v5 = vpop.xlane.xlu1 %1722  ;;  %v953_v1 = vpop.xlane.xlu0 %952 }
 0x34d   :  { %v1728_v13 = vmul.f32 0.015625, %v1723_v5  ;;  %v957_v16 = vmul.f32 0.015625, %v953_v1  ;;  %v963_v11 = vadd.f32 %v962_v60, %v960_v2  ;;  %v1734_v20 = vadd.f32 %v1731_v10, %v1730_v19 }
 0x34f   :  { %v1732_v4 = vmul.f32 %v1728_v13, %v37_v41  ;;  %v961_v14 = vmul.f32 %v957_v16, %v38_v63 }
 0x350   :  { %v1725_v15 = vpop.xlane.xlu1 %1724 }
 0x351   :  { %v964_v21 = vadd.f32 %v963_v11, %v961_v14  ;;  %v1729_v22 = vmul.f32 0.015625, %v1725_v15  ;;  %v1735_v23 = vadd.f32 %v1734_v20, %v1732_v4 }
 0x353   :  { %v965_v24 = vrot.slane %v964_v21, 4  ;;  %v1733_v25 = vmul.f32 %v1729_v22, %v38_v63 }
 0x355   :  { %v966_v26 = vadd.f32 %v965_v24, %v964_v21  ;;  %v1736_v27 = vadd.f32 %v1735_v23, %v1733_v25 }
 0x357   :  { %v967_v28 = vrot.slane %v966_v26, 2  ;;  %v1737_v29 = vrot.slane %v1736_v27, 4 }
 0x359   :  { %v968_v30 = vadd.f32 %v967_v28, %v966_v26  ;;  %v1738_v0 = vadd.f32 %v1737_v29, %v1736_v27 }
 0x35b   :  { %v1739_v31 = vrot.slane %v1738_v0, 2  ;;  %v969_v32 = vrot.slane %v968_v30, 1 }
 0x35d   :  { %v1740_v33 = vadd.f32 %v1739_v31, %v1738_v0  ;;  %v970_v35 = vadd.f32 %v969_v32, %v968_v30 }
 0x35f   :  { %v1741_v34 = vrot.slane %v1740_v33, 1  ;;  %v971_v38 = vadd.f32 %v970_v35, %v39_v37 }
 0x361   :  { %v1742_v36 = vadd.f32 %v1741_v34, %v1740_v33 }
 0x363   :  { %v1743_v44 = vadd.f32 %v1742_v36, %v39_v37 }
 0x365   :  { %v1745_v39 = vrot.slane %v1743_v44, 7 }
 0x367   :  { %v1748_v40 = vsel %vm1747_vm1, %v971_v38, %v1745_v39 }
 0x368   :  { %v1756_v56 = vrot.slane %v1748_v40, %v3512_v49 }
 0x36a   :  { %v1757_v42 = vcombine.high %v1756_v56, %v1756_v56  ;;  %1876 = vst.sshfl [vmem:[#allocation2] sm:$0x1 pattern:$0x73625140] %v1756_v56 }
 0x36c   :  { %1877 = vst.sshfl [vmem:[#allocation2 + $0x1] sm:$0x1 pattern:$0x73625140] %v1757_v42 }
 0x36d   :  { %2272 = shalt.err (!%p2269_p9)
}
 0x36e   :  { %1815 = dma.vmem_to_hbm [thread:$0]  %s1810_s18, 32, %s3551_s6, [#allocation3], %s2289_s8, %s2289_s8, %s2290_s9  }
 0x36f   :  { %2281 = dma.done.wait [#allocation3], 32  }
 0x370   :  { %2282 = vsyncadd [#allocation3], 4294967264 }
 0x371   :  { %2283 = dma.done.wait [#allocation5], 32  }
 0x372   :  { %2284 = vsyncadd [#allocation5], 4294967264 }
 0x373   :  { %1834 = vsyncpa [#allocation3], 1 }
 0x374   :  { %1835 = vsyncpa [#allocation5], 1 }

</bundles_post_ra>
